<compile_context>
chip_gen: v7x
topology: tpu7x:2x2x1
jax: 0.10.0
libtpu: 0.0.40
codegen_flags: <defaults>
</compile_context>

<pallas_src>
import jax
import jax.numpy as jnp
from jax.experimental import pallas as pl
from jax.experimental.pallas import tpu as pltpu


def convblock_kernel(x0s_ref, dst_ref, msg_ref, xhop_ref, a_ref,
                     w1_ref, b1_ref, w2_ref, b2_ref, s3_ref, t3_ref, out_ref):
    # x0s_ref : [TM, dim_p]      f32  (1 + eps[0]) * X[0] row tile
    # dst_ref : [1, Et]          i32  tile-LOCAL dst ids of this tile's edges (pad = -1)
    # msg_ref : [Et, dim_p]      bf16 (1 + eps[1]) * relu(X[0][src] + edge_attr), bucketed
    # xhop_ref: [k-1, N, dim_p]  bf16 (1 + eps[i+1]) * relu(X[i]) for i = 1..k-1
    # a_ref   : [k-1, TM, N]     bf16 row tile of dense adjacency counts, hops 1..k-1
    # w1/b1, w2/b2 : GINEPLUS.nn linears with BN1/BN2 folded in (w bf16, b f32)
    # s3/t3   : ConvBlock BN3 folded scale/shift
    k1 = xhop_ref.shape[0]
    Et = msg_ref.shape[0]
    TM = out_ref.shape[0]

    result = x0s_ref[...]                                     # f32 accumulator [TM, dim_p]

    # ---- hop 0: scatter-add of precomputed per-edge messages into this row tile ----
    row_ids = jax.lax.broadcasted_iota(jnp.int32, (TM, Et), 0)
    smat = (dst_ref[...] == row_ids).astype(jnp.bfloat16)     # [TM, Et]; pad id -1 never matches
    result = result + jnp.dot(smat, msg_ref[...], preferred_element_type=jnp.float32)

    # ---- hops 1..k-1: A_i[row tile, :] @ ((1+eps[i+1]) * relu(X[i]))  (prefolded bf16) ----
    for i in range(k1):                                       # static, unrolled
        result = result + jnp.dot(a_ref[i], xhop_ref[i],
                                  preferred_element_type=jnp.float32)

    # ---- GINEPLUS.nn: Linear->BN->ReLU->Linear->BN->ReLU (BN1/BN2 folded into linears) ----
    h = jnp.dot(result.astype(jnp.bfloat16), w1_ref[...],
                preferred_element_type=jnp.float32) + b1_ref[...]
    h = jnp.maximum(h, 0.0)
    h = jnp.dot(h.astype(jnp.bfloat16), w2_ref[...],
                preferred_element_type=jnp.float32) + b2_ref[...]
    h = jnp.maximum(h, 0.0)

    # ---- ConvBlock: BN3 (not foldable through the ReLU above) -> ReLU -> dropout(eval)=id
    h = jnp.maximum(h * s3_ref[...] + t3_ref[...], 0.0)
    out_ref[...] = h.astype(out_ref.dtype)


def conv_block_pallas(X, eps, src, dst, A, edge_attr,
                      W1, b1, bn1, W2, b2, bn2, bn3, *, tm=256):
    """Returns the new node features h (H[0] of the PyTorch module's output list)."""
    k, N, dim = X.shape
    E = src.shape[0]
    hid = W1.shape[1]
    assert k >= 2

    LANE = 128
    dim_p = ((dim + LANE - 1) // LANE) * LANE
    hid_p = ((hid + LANE - 1) // LANE) * LANE
    TM = min(tm, N)                   # tm=256 fills the 256-wide MXU on v6e/v7x; use 128 on v5e
    assert N % TM == 0 and TM % 8 == 0, (N, TM)
    n_tiles = N // TM

    def pad_last(a, target):
        p = target - a.shape[-1]
        return a if p == 0 else jnp.pad(a, [(0, 0)] * (a.ndim - 1) + [(0, p)])

    def fold_bn(p, eps_bn=1e-5):
        gamma, beta, mean, var = p
        scale = gamma / jnp.sqrt(var + eps_bn)
        return scale, beta - mean * scale

    s1, t1 = fold_bn(bn1)
    s2, t2 = fold_bn(bn2)
    s3, t3 = fold_bn(bn3)

    # Fold BN1/BN2 affines into the linears: relu((x@W + b)*s + t) = relu(x@(W*s) + (b*s + t))
    W1f = jnp.pad(W1 * s1[None, :], ((0, dim_p - dim), (0, hid_p - hid))).astype(jnp.bfloat16)
    b1f = pad_last((b1 * s1 + t1)[None, :], hid_p)
    W2f = jnp.pad(W2 * s2[None, :], ((0, hid_p - hid), (0, dim_p - dim))).astype(jnp.bfloat16)
    b2f = pad_last((b2 * s2 + t2)[None, :], dim_p)
    s3p = pad_last(s3[None, :], dim_p)
    t3p = pad_last(t3[None, :], dim_p)

    one_eps = 1.0 + eps                                               # [k+1, dim]

    # ---- hoisted, tile-invariant work (done once, not per row tile / per TensorCore) ----
    x0s = pad_last(one_eps[0][None, :] * X[0], dim_p)                  # [N, dim_p] f32
    xhop = pad_last(jnp.maximum(X[1:], 0.0) * one_eps[2:][:, None, :],
                    dim_p).astype(jnp.bfloat16)                        # [k-1, N, dim_p] bf16
    # hop-0 messages via a plain XLA gather, (1+eps[1]) folded in (commutes through scatter).
    msg = jnp.maximum(X[0][src] + edge_attr, 0.0) * one_eps[1][None, :]   # [E, dim] f32

    # ---- bucket edges per output row tile (sorted-edge per-tile scatter) ----
    src = src.astype(jnp.int32)
    dst = dst.astype(jnp.int32)
    tile_of_edge = dst // TM                                           # [E]
    counts = jnp.bincount(tile_of_edge, length=n_tiles)
    Et = int(jnp.max(counts))                                          # concrete (eager wrapper)
    Et = max(LANE, ((Et + LANE - 1) // LANE) * LANE)                   # lane-dense contraction dim
    order = jnp.argsort(tile_of_edge)
    tile_sorted = tile_of_edge[order]
    offsets = jnp.concatenate([jnp.zeros((1,), counts.dtype), jnp.cumsum(counts)[:-1]])
    pos = jnp.arange(E, dtype=jnp.int32) - offsets[tile_sorted].astype(jnp.int32)
    msg_tiled = (jnp.zeros((n_tiles, Et, dim_p), jnp.float32)
                 .at[tile_sorted, pos].set(pad_last(msg[order], dim_p))
                 .astype(jnp.bfloat16))                                # [n_tiles, Et, dim_p]
    dst_tiled = (jnp.full((n_tiles, Et), -1, jnp.int32)                # pad id -1 -> zero one-hot row
                 .at[tile_sorted, pos].set(dst[order] - tile_sorted * TM)
                 .reshape(n_tiles, 1, Et))                             # tile-local ids

    Abf = A.astype(jnp.bfloat16)     # integer edge counts are exact in bf16 (up to 256)

    inputs = (x0s, dst_tiled, msg_tiled, xhop, Abf,
              W1f, b1f, W2f, b2f, s3p, t3p)

    in_specs = [
        pl.BlockSpec((TM, dim_p), lambda i: (i, 0)),                  # (1+eps0)*X[0] row tile
        pl.BlockSpec((None, 1, Et), lambda i: (i, 0, 0)),             # tile-local dst ids
        pl.BlockSpec((None, Et, dim_p), lambda i: (i, 0, 0)),         # this tile's msg bucket
        pl.BlockSpec((k - 1, N, dim_p), lambda i: (0, 0, 0)),         # prefolded hop features
        pl.BlockSpec((k - 1, TM, N), lambda i: (0, i, 0)),            # A row tiles
        pl.BlockSpec((dim_p, hid_p), lambda i: (0, 0)),               # W1'
        pl.BlockSpec((1, hid_p), lambda i: (0, 0)),                   # b1'
        pl.BlockSpec((hid_p, dim_p), lambda i: (0, 0)),               # W2'
        pl.BlockSpec((1, dim_p), lambda i: (0, 0)),                   # b2'
        pl.BlockSpec((1, dim_p), lambda i: (0, 0)),                   # s3
        pl.BlockSpec((1, dim_p), lambda i: (0, 0)),                   # t3
    ]
    out_spec = pl.BlockSpec((TM, dim_p), lambda i: (i, 0))

    flops = 2 * (N * Et * dim_p                      # per-tile scatter matmuls (sum over tiles)
                 + (k - 1) * N * N * dim_p           # dense hops
                 + N * dim_p * hid_p + N * hid_p * dim_p)
    bytes_accessed = int(sum(int(a.size) * a.dtype.itemsize for a in inputs)
                         + N * dim_p * 4)

    out = pl.pallas_call(
        convblock_kernel,
        out_shape=jax.ShapeDtypeStruct((N, dim_p), jnp.float32),
        grid_spec=pltpu.PrefetchScalarGridSpec(
            num_scalar_prefetch=0,
            grid=(n_tiles,),
            in_specs=in_specs,
            out_specs=out_spec,
        ),
        compiler_params=pltpu.CompilerParams(
            dimension_semantics=("parallel",),       # row tiles shard across v7x's 2 TCs
            vmem_limit_bytes=32 * 1024 * 1024,       # ample here; raise on v6e for larger tiles
        ),
        cost_estimate=pl.CostEstimate(flops=int(flops), transcendentals=0,
                                      bytes_accessed=bytes_accessed),
    )(*inputs)
    return out[:, :dim]


def conv_block_reference(X, eps, src, dst, A, edge_attr,
                         W1, b1, bn1, W2, b2, bn2, bn3):
    """Pure-JAX f32 reference mirroring the PyTorch (eval-mode) semantics."""
    k, N, dim = X.shape
    hp = jax.lax.Precision.HIGHEST

    def bn(x, p, eps_bn=1e-5):
        gamma, beta, mean, var = p
        return gamma * (x - mean) / jnp.sqrt(var + eps_bn) + beta

    result = (1.0 + eps[0]) * X[0]
    msg = jnp.maximum(X[0][src] + edge_attr, 0.0)
    out0 = jnp.zeros((N, dim), jnp.float32).at[dst].add(msg)
    result = result + (1.0 + eps[1]) * out0
    for i in range(1, k):
        outi = jnp.dot(A[i - 1], jnp.maximum(X[i], 0.0), precision=hp)
        result = result + (1.0 + eps[i + 1]) * outi

    h = jnp.dot(result, W1, precision=hp) + b1
    h = jnp.maximum(bn(h, bn1), 0.0)
    h = jnp.dot(h, W2, precision=hp) + b2
    h = jnp.maximum(bn(h, bn2), 0.0)
    h = jnp.maximum(bn(h, bn3), 0.0)      # ConvBlock norm + relu; dropout(eval) = id
    return h


if __name__ == "__main__":
    N, dim, E, k = 512, 64, 1024, 4
    key = jax.random.PRNGKey(0)
    ks = jax.random.split(key, 32)

    # data.x is a list of k previous node-feature tensors (XX[0] newest)
    X = 0.5 * jax.random.normal(ks[0], (k, N, dim), jnp.float32)
    edge_attr = 0.5 * jax.random.normal(ks[1], (E, dim), jnp.float32)

    # hop 0 graph as COO edges (source_to_target flow)
    src = jax.random.randint(ks[2], (E,), 0, N)
    dst = jax.random.randint(ks[3], (E,), 0, N)

    # hops 1..k-1 as dense adjacency-count matrices A_i[v, u] = #edges u->v
    A_list = []
    for i in range(k - 1):
        si = jax.random.randint(ks[4 + 2 * i], (E,), 0, N)
        di = jax.random.randint(ks[5 + 2 * i], (E,), 0, N)
        A_list.append(jnp.zeros((N, N), jnp.float32).at[di, si].add(1.0))
    A = jnp.stack(A_list)                                   # [k-1, N, N]

    # GINEPLUS parameters
    eps = 0.05 * jax.random.normal(ks[12], (k + 1, dim), jnp.float32)
    W1 = 0.05 * jax.random.normal(ks[13], (dim, 2 * dim), jnp.float32)   # x @ W1
    b1 = 0.05 * jax.random.normal(ks[14], (2 * dim,), jnp.float32)
    W2 = 0.05 * jax.random.normal(ks[15], (2 * dim, dim), jnp.float32)
    b2 = 0.05 * jax.random.normal(ks[16], (dim,), jnp.float32)

    def make_bn(k1, k2, k3, k4, c):
        gamma = 1.0 + 0.1 * jax.random.normal(k1, (c,), jnp.float32)
        beta = 0.1 * jax.random.normal(k2, (c,), jnp.float32)
        mean = 0.1 * jax.random.normal(k3, (c,), jnp.float32)
        var = 0.9 + 0.2 * jnp.abs(jax.random.normal(k4, (c,), jnp.float32))
        return (gamma, beta, mean, var)

    bn1 = make_bn(ks[17], ks[18], ks[19], ks[20], 2 * dim)
    bn2 = make_bn(ks[21], ks[22], ks[23], ks[24], dim)
    bn3 = make_bn(ks[25], ks[26], ks[27], ks[28], dim)   # ConvBlock.norm

    h_new = conv_block_pallas(X, eps, src, dst, A, edge_attr,
                              W1, b1, bn1, W2, b2, bn2, bn3, tm=256)   # 2 row tiles of 256
    h_new = jax.block_until_ready(h_new)

    # The module returns data with data.x = [h_new] + XX (list); the kernel computes h_new.
    H_out = [h_new] + [X[i] for i in range(k)]

    h_ref = conv_block_reference(X, eps, src, dst, A, edge_attr,
                                 W1, b1, bn1, W2, b2, bn2, bn3)
    max_err = float(jnp.max(jnp.abs(h_new - h_ref)))
    # bf16 MXU operands / f32 accumulation: inference-grade precision contract.
    assert jnp.allclose(h_new, h_ref, atol=2e-2, rtol=2e-2), max_err

    print("KERNEL_OK")
</pallas_src>

<mosaic_0001>
module attributes {stable_mosaic.version = 11 : i64} {
  func.func @convblock_kernel(%arg0: i32, %arg1: memref<256x128xf32, #tpu.memory_space<vmem>>, %arg2: memref<1x1x640xi32, #tpu.memory_space<vmem>>, %arg3: memref<1x640x128xbf16, #tpu.memory_space<vmem>>, %arg4: memref<3x512x128xbf16, #tpu.memory_space<vmem>>, %arg5: memref<3x256x512xbf16, #tpu.memory_space<vmem>>, %arg6: memref<128x128xbf16, #tpu.memory_space<vmem>>, %arg7: memref<1x128xf32, #tpu.memory_space<vmem>>, %arg8: memref<128x128xbf16, #tpu.memory_space<vmem>>, %arg9: memref<1x128xf32, #tpu.memory_space<vmem>>, %arg10: memref<1x128xf32, #tpu.memory_space<vmem>>, %arg11: memref<1x128xf32, #tpu.memory_space<vmem>>, %arg12: memref<256x128xf32, #tpu.memory_space<vmem>>) attributes {dimension_semantics = [#tpu.dimension_semantics<parallel>], iteration_bounds = array<i64: 2>, scalar_prefetch = 0 : i64, scratch_operands = 0 : i64, tpu.core_type = #tpu.core_type<tc>, window_params = [{transform_indices = @transform_0, window_bounds = array<i64: 256, 128>}, {transform_indices = @transform_1, window_bounds = array<i64: 1, 1, 640>}, {transform_indices = @transform_2, window_bounds = array<i64: 1, 640, 128>}, {pipeline_mode = #tpu.pipeline_mode<synchronous>, transform_indices = @transform_3, window_bounds = array<i64: 3, 512, 128>}, {transform_indices = @transform_4, window_bounds = array<i64: 3, 256, 512>}, {pipeline_mode = #tpu.pipeline_mode<synchronous>, transform_indices = @transform_5, window_bounds = array<i64: 128, 128>}, {pipeline_mode = #tpu.pipeline_mode<synchronous>, transform_indices = @transform_6, window_bounds = array<i64: 1, 128>}, {pipeline_mode = #tpu.pipeline_mode<synchronous>, transform_indices = @transform_7, window_bounds = array<i64: 128, 128>}, {pipeline_mode = #tpu.pipeline_mode<synchronous>, transform_indices = @transform_8, window_bounds = array<i64: 1, 128>}, {pipeline_mode = #tpu.pipeline_mode<synchronous>, transform_indices = @transform_9, window_bounds = array<i64: 1, 128>}, {pipeline_mode = #tpu.pipeline_mode<synchronous>, transform_indices = @transform_10, window_bounds = array<i64: 1, 128>}, {transform_indices = @transform_11, window_bounds = array<i64: 256, 128>}]} {
    %c0 = arith.constant 0 : index
    %c0_0 = arith.constant 0 : index
    %0 = vector.load %arg1[%c0, %c0_0] : memref<256x128xf32, #tpu.memory_space<vmem>>, vector<256x128xf32>
    %1 = tpu.iota {dimensions = array<i32: 0>} : vector<256x640xi32>
    %c0_1 = arith.constant 0 : index
    %c0_2 = arith.constant 0 : index
    %c0_3 = arith.constant 0 : index
    %2 = vector.load %arg2[%c0_1, %c0_2, %c0_3] : memref<1x1x640xi32, #tpu.memory_space<vmem>>, vector<1x1x640xi32>
    %3 = vector.shape_cast %2 : vector<1x1x640xi32> to vector<1x640xi32>
    %4 = vector.broadcast %3 : vector<1x640xi32> to vector<256x640xi32>
    %5 = arith.cmpi eq, %4, %1 : vector<256x640xi32>
    %6 = arith.extui %5 : vector<256x640xi1> to vector<256x640xi32>
    %7 = arith.sitofp %6 : vector<256x640xi32> to vector<256x640xf32>
    %8 = arith.truncf %7 : vector<256x640xf32> to vector<256x640xbf16>
    %c0_4 = arith.constant 0 : index
    %c0_5 = arith.constant 0 : index
    %c0_6 = arith.constant 0 : index
    %9 = vector.load %arg3[%c0_4, %c0_5, %c0_6] : memref<1x640x128xbf16, #tpu.memory_space<vmem>>, vector<1x640x128xbf16>
    %10 = vector.shape_cast %9 : vector<1x640x128xbf16> to vector<640x128xbf16>
    %cst = arith.constant dense<0.000000e+00> : vector<256x128xf32>
    %11 = tpu.matmul %8, %10, %cst {dimension_numbers = #tpu.dot_dimension_numbers<[1], [0], [0], [1], [0, 0, 1, 1], [], []>} : vector<256x640xbf16>, vector<640x128xbf16>, vector<256x128xf32> -> vector<256x128xf32>
    %12 = arith.addf %0, %11 : vector<256x128xf32>
    %c0_7 = arith.constant 0 : index
    %c0_8 = arith.constant 0 : index
    %c0_9 = arith.constant 0 : index
    %13 = vector.load %arg5[%c0_7, %c0_8, %c0_9] : memref<3x256x512xbf16, #tpu.memory_space<vmem>>, vector<1x256x512xbf16>
    %14 = vector.shape_cast %13 : vector<1x256x512xbf16> to vector<256x512xbf16>
    %c0_10 = arith.constant 0 : index
    %c0_11 = arith.constant 0 : index
    %c0_12 = arith.constant 0 : index
    %15 = vector.load %arg4[%c0_10, %c0_11, %c0_12] : memref<3x512x128xbf16, #tpu.memory_space<vmem>>, vector<1x512x128xbf16>
    %16 = vector.shape_cast %15 : vector<1x512x128xbf16> to vector<512x128xbf16>
    %cst_13 = arith.constant dense<0.000000e+00> : vector<256x128xf32>
    %17 = tpu.matmul %14, %16, %cst_13 {dimension_numbers = #tpu.dot_dimension_numbers<[1], [0], [0], [1], [0, 0, 1, 1], [], []>} : vector<256x512xbf16>, vector<512x128xbf16>, vector<256x128xf32> -> vector<256x128xf32>
    %18 = arith.addf %12, %17 : vector<256x128xf32>
    %c1 = arith.constant 1 : index
    %c0_14 = arith.constant 0 : index
    %c0_15 = arith.constant 0 : index
    %19 = vector.load %arg5[%c1, %c0_14, %c0_15] : memref<3x256x512xbf16, #tpu.memory_space<vmem>>, vector<1x256x512xbf16>
    %20 = vector.shape_cast %19 : vector<1x256x512xbf16> to vector<256x512xbf16>
    %c1_16 = arith.constant 1 : index
    %c0_17 = arith.constant 0 : index
    %c0_18 = arith.constant 0 : index
    %21 = vector.load %arg4[%c1_16, %c0_17, %c0_18] : memref<3x512x128xbf16, #tpu.memory_space<vmem>>, vector<1x512x128xbf16>
    %22 = vector.shape_cast %21 : vector<1x512x128xbf16> to vector<512x128xbf16>
    %cst_19 = arith.constant dense<0.000000e+00> : vector<256x128xf32>
    %23 = tpu.matmul %20, %22, %cst_19 {dimension_numbers = #tpu.dot_dimension_numbers<[1], [0], [0], [1], [0, 0, 1, 1], [], []>} : vector<256x512xbf16>, vector<512x128xbf16>, vector<256x128xf32> -> vector<256x128xf32>
    %24 = arith.addf %18, %23 : vector<256x128xf32>
    %c2 = arith.constant 2 : index
    %c0_20 = arith.constant 0 : index
    %c0_21 = arith.constant 0 : index
    %25 = vector.load %arg5[%c2, %c0_20, %c0_21] : memref<3x256x512xbf16, #tpu.memory_space<vmem>>, vector<1x256x512xbf16>
    %26 = vector.shape_cast %25 : vector<1x256x512xbf16> to vector<256x512xbf16>
    %c2_22 = arith.constant 2 : index
    %c0_23 = arith.constant 0 : index
    %c0_24 = arith.constant 0 : index
    %27 = vector.load %arg4[%c2_22, %c0_23, %c0_24] : memref<3x512x128xbf16, #tpu.memory_space<vmem>>, vector<1x512x128xbf16>
    %28 = vector.shape_cast %27 : vector<1x512x128xbf16> to vector<512x128xbf16>
    %cst_25 = arith.constant dense<0.000000e+00> : vector<256x128xf32>
    %29 = tpu.matmul %26, %28, %cst_25 {dimension_numbers = #tpu.dot_dimension_numbers<[1], [0], [0], [1], [0, 0, 1, 1], [], []>} : vector<256x512xbf16>, vector<512x128xbf16>, vector<256x128xf32> -> vector<256x128xf32>
    %30 = arith.addf %24, %29 : vector<256x128xf32>
    %31 = arith.truncf %30 : vector<256x128xf32> to vector<256x128xbf16>
    %c0_26 = arith.constant 0 : index
    %c0_27 = arith.constant 0 : index
    %32 = vector.load %arg6[%c0_26, %c0_27] : memref<128x128xbf16, #tpu.memory_space<vmem>>, vector<128x128xbf16>
    %cst_28 = arith.constant dense<0.000000e+00> : vector<256x128xf32>
    %33 = tpu.matmul %31, %32, %cst_28 {dimension_numbers = #tpu.dot_dimension_numbers<[1], [0], [0], [1], [0, 0, 1, 1], [], []>} : vector<256x128xbf16>, vector<128x128xbf16>, vector<256x128xf32> -> vector<256x128xf32>
    %c0_29 = arith.constant 0 : index
    %c0_30 = arith.constant 0 : index
    %34 = vector.load %arg7[%c0_29, %c0_30] : memref<1x128xf32, #tpu.memory_space<vmem>>, vector<1x128xf32>
    %35 = vector.broadcast %34 : vector<1x128xf32> to vector<256x128xf32>
    %36 = arith.addf %33, %35 : vector<256x128xf32>
    %cst_31 = arith.constant 0.000000e+00 : f32
    %37 = vector.broadcast %cst_31 : f32 to vector<256x128xf32>
    %38 = arith.maximumf %36, %37 : vector<256x128xf32>
    %39 = arith.truncf %38 : vector<256x128xf32> to vector<256x128xbf16>
    %c0_32 = arith.constant 0 : index
    %c0_33 = arith.constant 0 : index
    %40 = vector.load %arg8[%c0_32, %c0_33] : memref<128x128xbf16, #tpu.memory_space<vmem>>, vector<128x128xbf16>
    %cst_34 = arith.constant dense<0.000000e+00> : vector<256x128xf32>
    %41 = tpu.matmul %39, %40, %cst_34 {dimension_numbers = #tpu.dot_dimension_numbers<[1], [0], [0], [1], [0, 0, 1, 1], [], []>} : vector<256x128xbf16>, vector<128x128xbf16>, vector<256x128xf32> -> vector<256x128xf32>
    %c0_35 = arith.constant 0 : index
    %c0_36 = arith.constant 0 : index
    %42 = vector.load %arg9[%c0_35, %c0_36] : memref<1x128xf32, #tpu.memory_space<vmem>>, vector<1x128xf32>
    %43 = vector.broadcast %42 : vector<1x128xf32> to vector<256x128xf32>
    %44 = arith.addf %41, %43 : vector<256x128xf32>
    %cst_37 = arith.constant 0.000000e+00 : f32
    %45 = vector.broadcast %cst_37 : f32 to vector<256x128xf32>
    %46 = arith.maximumf %44, %45 : vector<256x128xf32>
    %c0_38 = arith.constant 0 : index
    %c0_39 = arith.constant 0 : index
    %47 = vector.load %arg10[%c0_38, %c0_39] : memref<1x128xf32, #tpu.memory_space<vmem>>, vector<1x128xf32>
    %48 = vector.broadcast %47 : vector<1x128xf32> to vector<256x128xf32>
    %49 = arith.mulf %46, %48 : vector<256x128xf32>
    %c0_40 = arith.constant 0 : index
    %c0_41 = arith.constant 0 : index
    %50 = vector.load %arg11[%c0_40, %c0_41] : memref<1x128xf32, #tpu.memory_space<vmem>>, vector<1x128xf32>
    %51 = vector.broadcast %50 : vector<1x128xf32> to vector<256x128xf32>
    %52 = arith.addf %49, %51 : vector<256x128xf32>
    %cst_42 = arith.constant 0.000000e+00 : f32
    %53 = vector.broadcast %cst_42 : f32 to vector<256x128xf32>
    %54 = arith.maximumf %52, %53 : vector<256x128xf32>
    %c0_43 = arith.constant 0 : index
    %c0_44 = arith.constant 0 : index
    %55 = vector.load %arg12[%c0_43, %c0_44] : memref<256x128xf32, #tpu.memory_space<vmem>>, vector<256x128xf32>
    tpu.vector_store %arg12[%c0_43, %c0_44], %54 {strides = array<i32>} : memref<256x128xf32, #tpu.memory_space<vmem>>, vector<256x128xf32>,
    return
  }
  func.func @transform_0(%arg0: i32) -> (i32, i32) {
    %c0_i32 = arith.constant 0 : i32
    %c0_i32_0 = arith.constant 0 : i32
    return %arg0, %c0_i32 : i32, i32
  }
  func.func @transform_1(%arg0: i32) -> (i32, i32, i32) {
    %c0_i32 = arith.constant 0 : i32
    %c0_i32_0 = arith.constant 0 : i32
    %c0_i32_1 = arith.constant 0 : i32
    return %arg0, %c0_i32, %c0_i32_0 : i32, i32, i32
  }
  func.func @transform_2(%arg0: i32) -> (i32, i32, i32) {
    %c0_i32 = arith.constant 0 : i32
    %c0_i32_0 = arith.constant 0 : i32
    %c0_i32_1 = arith.constant 0 : i32
    return %arg0, %c0_i32, %c0_i32_0 : i32, i32, i32
  }
  func.func @transform_3(%arg0: i32) -> (i32, i32, i32) {
    %c0_i32 = arith.constant 0 : i32
    %c0_i32_0 = arith.constant 0 : i32
    %c0_i32_1 = arith.constant 0 : i32
    %c0_i32_2 = arith.constant 0 : i32
    return %c0_i32, %c0_i32_0, %c0_i32_1 : i32, i32, i32
  }
  func.func @transform_4(%arg0: i32) -> (i32, i32, i32) {
    %c0_i32 = arith.constant 0 : i32
    %c0_i32_0 = arith.constant 0 : i32
    %c0_i32_1 = arith.constant 0 : i32
    return %c0_i32, %arg0, %c0_i32_0 : i32, i32, i32
  }
  func.func @transform_5(%arg0: i32) -> (i32, i32) {
    %c0_i32 = arith.constant 0 : i32
    %c0_i32_0 = arith.constant 0 : i32
    %c0_i32_1 = arith.constant 0 : i32
    return %c0_i32, %c0_i32_0 : i32, i32
  }
  func.func @transform_6(%arg0: i32) -> (i32, i32) {
    %c0_i32 = arith.constant 0 : i32
    %c0_i32_0 = arith.constant 0 : i32
    %c0_i32_1 = arith.constant 0 : i32
    return %c0_i32, %c0_i32_0 : i32, i32
  }
  func.func @transform_7(%arg0: i32) -> (i32, i32) {
    %c0_i32 = arith.constant 0 : i32
    %c0_i32_0 = arith.constant 0 : i32
    %c0_i32_1 = arith.constant 0 : i32
    return %c0_i32, %c0_i32_0 : i32, i32
  }
  func.func @transform_8(%arg0: i32) -> (i32, i32) {
    %c0_i32 = arith.constant 0 : i32
    %c0_i32_0 = arith.constant 0 : i32
    %c0_i32_1 = arith.constant 0 : i32
    return %c0_i32, %c0_i32_0 : i32, i32
  }
  func.func @transform_9(%arg0: i32) -> (i32, i32) {
    %c0_i32 = arith.constant 0 : i32
    %c0_i32_0 = arith.constant 0 : i32
    %c0_i32_1 = arith.constant 0 : i32
    return %c0_i32, %c0_i32_0 : i32, i32
  }
  func.func @transform_10(%arg0: i32) -> (i32, i32) {
    %c0_i32 = arith.constant 0 : i32
    %c0_i32_0 = arith.constant 0 : i32
    %c0_i32_1 = arith.constant 0 : i32
    return %c0_i32, %c0_i32_0 : i32, i32
  }
  func.func @transform_11(%arg0: i32) -> (i32, i32) {
    %c0_i32 = arith.constant 0 : i32
    %c0_i32_0 = arith.constant 0 : i32
    return %arg0, %c0_i32 : i32, i32
  }
}

</mosaic_0001>

<bundles_post_ra>
// kernel: tpu_custom_call.1
= control target key start
LH: loop header
LB: loop body
LE: loop exit
PB: predicated region body
PF: predicated region fallthrough
CT: control target
= control target key end

     0   :  { %s11716_s0 = inlined_call_operand.hbm [shape: f32[512,128], index: 0, kind: input, shape index: {}]   ;;  %s11717_s1 = inlined_call_operand.hbm [shape: s32[2,1,640], index: 1, kind: input, shape index: {}]   ;;  %s11718_s2 = inlined_call_operand.hbm [shape: bf16[2,640,128], index: 2, kind: input, shape index: {}]   ;;  %s11719_s3 = inlined_call_operand.hbm [shape: bf16[3,512,128], index: 3, kind: input, shape index: {}]   ;;  %s11720_s4 = inlined_call_operand.hbm [shape: bf16[3,512,512], index: 4, kind: input, shape index: {}]   ;;  %s11721_s5 = inlined_call_operand.hbm [shape: bf16[128,128], index: 5, kind: input, shape index: {}]   ;;  %s11722_s6 = inlined_call_operand.hbm [shape: f32[1,128], index: 6, kind: input, shape index: {}]   ;;  %s11723_s7 = inlined_call_operand.hbm [shape: bf16[128,128], index: 7, kind: input, shape index: {}]   ;;  %s11724_s8 = inlined_call_operand.hbm [shape: f32[1,128], index: 8, kind: input, shape index: {}]   ;;  %s11725_s9 = inlined_call_operand.hbm [shape: f32[1,128], index: 9, kind: input, shape index: {}]   ;;  %s11726_s10 = inlined_call_operand.hbm [shape: f32[1,128], index: 10, kind: input, shape index: {}]   ;;  %s11727_s11 = inlined_call_operand.hbm [shape: f32[512,128], index: 11, kind: output, shape index: {}]  }
   0x1   :  { %11746 = sst [smem:[#allocation40_spill]] %s11719_s3 }
   0x2   :  { %11747 = sst [smem:[#allocation41_spill]] %s11727_s11 }
   0x3   :  { %16 = vsyncpa [#allocation3], 0 }
   0x4   :  { %18 = vsyncpa [#allocation3 + $0x1], 0 }
   0x5   :  { %19 = vsyncpa [#allocation6], 0 }
   0x6   :  { %21 = vsyncpa [#allocation6 + $0x1], 0 }
   0x7   :  { %22 = vsyncpa [#allocation9], 0 }
   0x8   :  { %23 = vsyncpa [#allocation14], 0 }
   0x9   :  { %24 = vsyncpa [#allocation17], 0 }
   0xa   :  { %25 = vsyncpa [#allocation4], 0 }
   0xb   :  { %27 = vsyncpa [#allocation4 + $0x1], 0  ;;  %s9038_s17 = smov 0   ;;  %s9040_s18 = smov 0  }
   0xc   :  { %s9042_s19 = smov 0   ;;  %s9044_s20 = smov 0  }
   0xd LB: > { %11748 = sst [smem:[#allocation32_spill]] %s8938_s17  ;;  %s9059_s21 = sadd.s32 4294967295, %s8950_s20   ;;  %s8950_s20 = sphi %s9044_s20, %s12071_s20   ;;  %s8946_s19 = sphi %s9042_s19, %s12075_s19   ;;  %s8942_s18 = sphi %s9040_s18, %s12074_s18   ;;  %s8938_s17 = sphi %s9038_s17, %s12072_s17  }
   0xe   : > { %11749 = sst [smem:[#allocation33_spill]] %s8942_s18  ;;  %s6025_s22 = sadd.s32 4294967294, %s8950_s20  }
   0xf   : > { %11750 = sst [smem:[#allocation34_spill]] %s9059_s21  ;;  %s9063_s23 = sadd.s32 1, %s8950_s20  }
  0x10   : > { %11751 = sst [smem:[#allocation35_spill]] %s9063_s23  ;;  %s40_s24 = sadd.s32 1, %s8946_s19 }
  0x11   : > { %s37_s25 = ssub.s32 %s8950_s20, %s9063_s23  ;;  %p47_p0 = scmp.ne.s32.totalorder %s8946_s19, %s8942_s18 }
  0x12   : > { %p38_p1 = scmp.eq.s32.totalorder %s37_s25, 0  ;;  %p48_p2 = scmp.eq.s32.totalorder %s8950_s20, 0 }
  0x13   : > { %p53_p3 = scmp.ne.s32.totalorder %s8942_s18, %s8938_s17  ;;  %p11732_p4 = scmp.eq.s32.totalorder %s9059_s21, 0 }
  0x14   : > { %s9075_s26 = scalar_select %p38_p1, %s8946_s19, %s40_s24  }
  0x15   : > { %p9077_p5 = por %p48_p2, %p47_p0  ;;  %p9083_p6 = por %p11732_p4, %p53_p3 }
  0x16   : > { %11752 = sst [smem:[#allocation36_spill]] %s9075_s26  ;;  %p302_p7 = scmp.eq.s32.totalorder %s9059_s21, 1 }
  0x17   : > { %s11753_s27 = scalar_select %p9077_p5, 1, 0 }
  0x18   : > { %s11754_s28 = scalar_select %p9083_p6, 1, 0 }
  0x19   : > { %p308_p8 = scmp.eq.s32.totalorder %s6025_s22, 1  ;;  %p6026_p9 = scmp.ge.s32.totalorder %s8950_s20, 1 }
  0x1a   : > { %11755 = sst [smem:[#allocation37_spill]] %s11754_s28  ;;  %p315_p10 = scmp.lt.s32.totalorder %s8950_s20, 3 }
  0x1b   : > { %p9090_p11 = por %p302_p7, %p47_p0  ;;  %p9094_p12 = por %p308_p8, %p53_p3 }
  0x1c   : > { %p9098_p13 = pnand %p6026_p9, %p315_p10  ;;  %s8952_s13 = smov [#allocation8]  }
  0x1d   : > { %s11756_s29 = scalar_select %p9090_p11, 1, 0 }
  0x1e   : > { %s11758_s30 = scalar_select %p9094_p12, 1, 0 }
  0x1f   : > { %11757 = sst [smem:[#allocation38_spill]] %s11756_s29  ;;  %p8041_p1 = pneg %p9098_p13 }
  0x20   : > { %11759 = sst [smem:[#allocation39_spill]] %s11758_s30  ;;  %s327_s14 = sshll.u32 %s8952_s13, 4  ;;  %s328_s14 = int_to_ptr.vmem [resolvable:$true] %s327_s14 }
  0x21   : > { %s11760_s12 = scalar_select %p9098_p13, 1, 0 }
  0x22   : > { %p9106_p2 = pnand %p8041_p1, %p11732_p4  ;;  %s8953_s16 = smov [#allocation13]  }
  0x23   : > { %s364_s22 = sshll.u32 %s8953_s16, 4  ;;  %s11762_s3 = sld [smem:[#allocation40_spill]]  ;;  %s9110_s22 = int_to_ptr.vmem [resolvable:$true] %s364_s22 }
  0x24   : > { %p9120_p3 = pneg %p9106_p2 }
  0x29   : > { %s8576_s26 = scalar_lea.hbm %s11762_s3, 12288 }
  0x2a   : > { %p8577_p0 = scmp.ne.s32.totalorder %s11762_s3, %s8576_s26  ;;  %p8583_p9 = scmp.lt.u32.totalorder %s8576_s26, %s11762_s3 }
  0x2c   : > { %p8579_p7 = pnand %p9120_p3, %p8577_p0 }
  0x2e   : > { %p8580_p8 = pneg %p8579_p7 }
  0x30   : > { %p8585_p10 = pnand %p8583_p9, %p8580_p8 }
  0x32   : > { %8588 = shalt.err (!%p8585_p10)
}
  0x33   : > { %s8589_s24 = scalar_lea.vmem %s328_s14, 12288  ;;  %p8597_p11 = scmp.lt.s32.totalorder %s328_s14, %s328_s14 }
  0x34   : > { %p8590_p1 = scmp.ne.s32.totalorder %s328_s14, %s8589_s24  ;;  %p8598_p6 = scmp.lt.s32.totalorder %s8589_s24, %s8589_s24 }
  0x36   : > { %p8592_p4 = pnand %p8590_p1, %p9120_p3  ;;  %p8599_p13 = por %p8598_p6, %p8597_p11 }
  0x38   : > { %p8593_p12 = pneg %p8592_p4 }
  0x3a   : > { %p8600_p5 = pnand %p8599_p13, %p8593_p12 }
  0x3c   : > { %8603 = shalt.err (!%p8600_p5)
}
  0x3d   : > { %s8954_s23 = smov 64   ;;  %s8955_s30 = smov 4  }
  0x3e   : > { %8044 = dma.hbm_to_vmem [thread:$0]  (!%p9106_p2), %s11762_s3, 12288, %s328_s14, [#allocation9], %s8954_s23, %s8954_s23, %s8955_s30  }
  0x3f   : > { %s8604_s11 = scalar_lea.hbm %s11723_s7, 1024 }
  0x40   : > { %p8605_p4 = scmp.ne.s32.totalorder %s11723_s7, %s8604_s11  ;;  %p8611_p11 = scmp.lt.u32.totalorder %s8604_s11, %s11723_s7 }
  0x42   : > { %p8607_p5 = pnand %p8605_p4, %p9120_p3 }
  0x44   : > { %p8608_p6 = pneg %p8607_p5 }
  0x46   : > { %p8613_p12 = pnand %p8611_p11, %p8608_p6 }
  0x48   : > { %8616 = shalt.err (!%p8613_p12)
}
  0x49   : > { %s8617_s14 = scalar_lea.vmem %s9110_s22, 1024  ;;  %p8625_p8 = scmp.lt.s32.totalorder %s9110_s22, %s9110_s22 }
  0x4a   : > { %p8618_p13 = scmp.ne.s32.totalorder %s9110_s22, %s8617_s14  ;;  %p8626_p9 = scmp.lt.s32.totalorder %s8617_s14, %s8617_s14 }
  0x4c   : > { %p8620_p0 = pnand %p8618_p13, %p9120_p3  ;;  %p8627_p10 = por %p8626_p9, %p8625_p8 }
  0x4e   : > { %p8621_p7 = pneg %p8620_p0 }
  0x50   : > { %p8628_p1 = pnand %p8627_p10, %p8621_p7 }
  0x52   : > { %8631 = shalt.err (!%p8628_p1)
}
  0x53   : > { %8053 = dma.hbm_to_vmem [thread:$0]  (!%p9106_p2), %s11723_s7, 1024, %s9110_s22, [#allocation14], %s8954_s23, %s8954_s23, %s8955_s30  }
  0x54   : > { %s8956_s28 = smov [#allocation16]   ;;  %s8957_s17 = smov [#allocation11]  }
  0x55   : > { %s389_s29 = sshll.u32 %s8956_s28, 4  ;;  %s340_s26 = sshll.u32 %s8957_s17, 4  ;;  %s390_s29 = int_to_ptr.vmem [resolvable:$true] %s389_s29  ;;  %s341_s26 = int_to_ptr.vmem [resolvable:$true] %s340_s26 }
  0x56   : > { %s8632_s24 = scalar_lea.hbm %s11725_s9, 16 }
  0x57   : > { %p8633_p4 = scmp.ne.s32.totalorder %s11725_s9, %s8632_s24  ;;  %p8639_p11 = scmp.lt.u32.totalorder %s8632_s24, %s11725_s9 }
  0x59   : > { %p8635_p5 = pnand %p8633_p4, %p9120_p3 }
  0x5b   : > { %p8636_p6 = pneg %p8635_p5 }
  0x5d   : > { %p8641_p12 = pnand %p8639_p11, %p8636_p6 }
  0x5f   : > { %8644 = shalt.err (!%p8641_p12)
}
  0x60   : > { %s8645_s22 = scalar_lea.vmem %s390_s29, 16  ;;  %s8652_s18 = scalar_lea.vmem %s390_s29, 32 }
  0x61   : > { %p8646_p13 = scmp.ne.s32.totalorder %s390_s29, %s8645_s22  ;;  %p8653_p8 = scmp.lt.s32.totalorder %s390_s29, %s390_s29 }
  0x62   : > { %p8654_p9 = scmp.lt.s32.totalorder %s8652_s18, %s8645_s22 }
  0x63   : > { %p8648_p0 = pnand %p8646_p13, %p9120_p3 }
  0x64   : > { %p8655_p10 = por %p8654_p9, %p8653_p8 }
  0x65   : > { %p8649_p7 = pneg %p8648_p0 }
  0x67   : > { %p8656_p1 = pnand %p8655_p10, %p8649_p7 }
  0x69   : > { %8659 = shalt.err (!%p8656_p1)
}
  0x6a   : > { %8059 = dma.hbm_to_vmem [thread:$0]  (!%p9106_p2), %s11725_s9, 16, %s390_s29, [#allocation17]  }
  0x6b   : > { %s8660_s25 = scalar_lea.hbm %s11721_s5, 1024 }
  0x6c   : > { %p8661_p4 = scmp.ne.s32.totalorder %s11721_s5, %s8660_s25  ;;  %p8667_p11 = scmp.lt.u32.totalorder %s8660_s25, %s11721_s5 }
  0x6e   : > { %p8663_p5 = pnand %p8661_p4, %p9120_p3 }
  0x70   : > { %p8664_p6 = pneg %p8663_p5 }
  0x72   : > { %p8669_p12 = pnand %p8667_p11, %p8664_p6 }
  0x74   : > { %8672 = shalt.err (!%p8669_p12)
}
  0x75   : > { %s8673_s22 = scalar_lea.vmem %s341_s26, 1024  ;;  %p8681_p8 = scmp.lt.s32.totalorder %s341_s26, %s341_s26 }
  0x76   : > { %p8674_p13 = scmp.ne.s32.totalorder %s341_s26, %s8673_s22  ;;  %p8682_p9 = scmp.lt.s32.totalorder %s8673_s22, %s8673_s22 }
  0x78   : > { %p8676_p0 = pnand %p8674_p13, %p9120_p3  ;;  %p8683_p10 = por %p8682_p9, %p8681_p8 }
  0x7a   : > { %p8677_p7 = pneg %p8676_p0 }
  0x7c   : > { %p8684_p1 = pnand %p8683_p10, %p8677_p7 }
  0x7e   : > { %8687 = shalt.err (!%p8684_p1)
}
  0x7f   : > { %8047 = dma.hbm_to_vmem [thread:$0]  (!%p9106_p2), %s11721_s5, 1024, %s341_s26, [#allocation6], %s8954_s23, %s8954_s23, %s8955_s30  }
  0x80   : > { %s8958_s3 = smov [#allocation12]   ;;  %s8959_s21 = smov [#allocation15]  }
  0x81   : > { %s354_s28 = sshll.u32 %s8958_s3, 4  ;;  %s378_s17 = sshll.u32 %s8959_s21, 4  ;;  %s355_s28 = int_to_ptr.vmem [resolvable:$true] %s354_s28  ;;  %s379_s17 = int_to_ptr.vmem [resolvable:$true] %s378_s17 }
  0x82   : > { %s8688_s24 = scalar_lea.hbm %s11722_s6, 16 }
  0x83   : > { %p8689_p4 = scmp.ne.s32.totalorder %s11722_s6, %s8688_s24  ;;  %p8695_p11 = scmp.lt.u32.totalorder %s8688_s24, %s11722_s6 }
  0x85   : > { %p8691_p5 = pnand %p8689_p4, %p9120_p3 }
  0x87   : > { %p8692_p6 = pneg %p8691_p5 }
  0x89   : > { %p8697_p12 = pnand %p8695_p11, %p8692_p6 }
  0x8b   : > { %8700 = shalt.err (!%p8697_p12)
}
  0x8c   : > { %s8701_s23 = scalar_lea.vmem %s355_s28, 16  ;;  %s8708_s30 = scalar_lea.vmem %s355_s28, 32 }
  0x8d   : > { %p8702_p13 = scmp.ne.s32.totalorder %s355_s28, %s8701_s23  ;;  %p8709_p8 = scmp.lt.s32.totalorder %s355_s28, %s355_s28 }
  0x8e   : > { %p8710_p9 = scmp.lt.s32.totalorder %s8708_s30, %s8701_s23 }
  0x8f   : > { %p8704_p0 = pnand %p8702_p13, %p9120_p3 }
  0x90   : > { %p8711_p10 = por %p8710_p9, %p8709_p8 }
  0x91   : > { %p8705_p7 = pneg %p8704_p0 }
  0x93   : > { %p8712_p1 = pnand %p8711_p10, %p8705_p7 }
  0x95   : > { %8715 = shalt.err (!%p8712_p1)
}
  0x96   : > { %8050 = dma.hbm_to_vmem [thread:$0]  (!%p9106_p2), %s11722_s6, 16, %s355_s28, [#allocation9]  }
  0x97   : > { %s8716_s25 = scalar_lea.hbm %s11724_s8, 16 }
  0x98   : > { %p8717_p4 = scmp.ne.s32.totalorder %s11724_s8, %s8716_s25  ;;  %p8723_p11 = scmp.lt.u32.totalorder %s8716_s25, %s11724_s8 }
  0x9a   : > { %p8719_p5 = pnand %p8717_p4, %p9120_p3 }
  0x9c   : > { %p8720_p6 = pneg %p8719_p5 }
  0x9e   : > { %p8725_p12 = pnand %p8723_p11, %p8720_p6 }
  0xa0   : > { %8728 = shalt.err (!%p8725_p12)
}
  0xa1   : > { %s8729_s22 = scalar_lea.vmem %s379_s17, 16  ;;  %s8736_s28 = scalar_lea.vmem %s379_s17, 32 }
  0xa2   : > { %p8730_p13 = scmp.ne.s32.totalorder %s379_s17, %s8729_s22  ;;  %p8737_p8 = scmp.lt.s32.totalorder %s379_s17, %s379_s17 }
  0xa3   : > { %p8738_p9 = scmp.lt.s32.totalorder %s8736_s28, %s8729_s22 }
  0xa4   : > { %p8732_p0 = pnand %p8730_p13, %p9120_p3 }
  0xa5   : > { %p8739_p10 = por %p8738_p9, %p8737_p8 }
  0xa6   : > { %p8733_p7 = pneg %p8732_p0 }
  0xa8   : > { %p8740_p1 = pnand %p8739_p10, %p8733_p7 }
  0xaa   : > { %8743 = shalt.err (!%p8740_p1)
}
  0xab   : > { %8056 = dma.hbm_to_vmem [thread:$0]  (!%p9106_p2), %s11724_s8, 16, %s379_s17, [#allocation14]  }
  0xac   : > { %s8960_s30 = smov [#allocation18]   ;;  %s8744_s21 = scalar_lea.hbm %s11726_s10, 16 }
  0xad   : > { %s400_s26 = sshll.u32 %s8960_s30, 4  ;;  %p8745_p4 = scmp.ne.s32.totalorder %s11726_s10, %s8744_s21  ;;  %s401_s26 = int_to_ptr.vmem [resolvable:$true] %s400_s26 }
  0xae   : > { %p8751_p11 = scmp.lt.u32.totalorder %s8744_s21, %s11726_s10 }
  0xaf   : > { %p8747_p5 = pnand %p8745_p4, %p9120_p3 }
  0xb1   : > { %p8748_p6 = pneg %p8747_p5 }
  0xb3   : > { %p8753_p12 = pnand %p8751_p11, %p8748_p6 }
  0xb5   : > { %8756 = shalt.err (!%p8753_p12)
}
  0xb6   : > { %s8757_s17 = scalar_lea.vmem %s401_s26, 16  ;;  %s8764_s11 = scalar_lea.vmem %s401_s26, 32 }
  0xb7   : > { %p8758_p13 = scmp.ne.s32.totalorder %s401_s26, %s8757_s17  ;;  %p8765_p8 = scmp.lt.s32.totalorder %s401_s26, %s401_s26 }
  0xb8   : > { %p8766_p9 = scmp.lt.s32.totalorder %s8764_s11, %s8757_s17 }
  0xb9   : > { %p8760_p0 = pnand %p8758_p13, %p9120_p3 }
  0xba   : > { %p8767_p10 = por %p8766_p9, %p8765_p8 }
  0xbb   : > { %p8761_p7 = pneg %p8760_p0 }
  0xbd   : > { %p8768_p1 = pnand %p8767_p10, %p8761_p7 }
  0xbf   : > { %8771 = shalt.err (!%p8768_p1)
}
  0xc0   : > { %8062 = dma.hbm_to_vmem [thread:$0]  (!%p9106_p2), %s11726_s10, 16, %s401_s26, [#allocation17]  }
  0xc1   : > { %p11745_p4 = scmp.ge.s32.totalorder %s8950_s20, 2 }
  0xc2   : > { %s411_s13 = sand.u32 (!%p11745_p4), 1, %s8950_s20   ;;  %s9263_s29 = sand.u32 (!%p11745_p4), 1, %s8946_s19  }
  0xc3   : > { %407 = sbr.rel (%p11745_p4) target bundleno = 287 (0x11f), region = 44  ;;  %s6035_s23 = sshll.u32 (!%p11745_p4), %s9263_s29, 8 }
  0xc4   : > { %s7988_s15 = smul.u32 (!%p11745_p4), 5, %s9263_s29  ;;  %s9276_s24 = scalar_lea.sflag (!%p11745_p4), [#allocation6], %s411_s13 }
  0xc5   : > { %s7989_s30 = smul.u32 (!%p11745_p4), 80, %s8950_s20  ;;  %p11764_p3 = scmp.ne.s32.totalorder (!%p11745_p4), %s11753_s27, 0 }
  0xc6   : > { %s7990_s26 = smul.u32 (!%p11745_p4), 320, %s9263_s29  ;;  %s436_s25 = scalar_lea.vmem (!%p11745_p4), [#allocation5], %s7988_s15 }
  0xc7   : > { %s9272_s21 = scalar_lea.hbm (!%p11745_p4), %s11717_s1, %s7989_s30  ;;  %s444_s16 = sshll.u32 (!%p11745_p4), %s436_s25, 4  ;;  %s445_s16 = int_to_ptr.vmem [resolvable:$true] %s444_s16 }
  0xc8   : > { %s8772_s14 = scalar_lea.hbm (!%p11745_p4), %s9272_s21, 80  ;;  %s8776_s22 = scalar_lea.hbm (!%p11745_p4), %s11717_s1, 160 }
  0xc9   : > { %p8773_p2 = scmp.ne.s32.totalorder (!%p11745_p4), %s9272_s21, %s8772_s14  ;;  %p8777_p11 = scmp.lt.u32.totalorder (!%p11745_p4), %s9272_s21, %s11717_s1 }
  0xca   : > { %p8778_p12 = scmp.lt.u32.totalorder %s8776_s22, %s8772_s14  ;;  %p8780_p0 = scmp.lt.u32.totalorder %s8772_s14, %s9272_s21 }
  0xcb   : > { %p8774_p5 = pnand %p8773_p2, %p11764_p3 }
  0xcc   : > { %p8779_p13 = por %p8778_p12, %p8777_p11 }
  0xcd   : > { %p8775_p6 = pneg %p8774_p5 }
  0xce   : > { %p8781_p7 = por %p8780_p0, %p8779_p13 }
  0xd0   : > { %p8782_p8 = pnand %p8781_p7, %p8775_p6 }
  0xd2   : > { %8785 = shalt.err (!%p8782_p8)
}
  0xd3   : > { %s8786_s15 = scalar_lea.vmem %s445_s16, 80  ;;  %s8961_s18 = smov [#allocation5]  }
  0xd4   : > { %p8787_p9 = scmp.ne.s32.totalorder %s445_s16, %s8786_s15  ;;  %s8790_s3 = sshll.u32 %s8961_s18, 4  ;;  %s8791_s3 = int_to_ptr.vmem [resolvable:$false] %s8790_s3 }
  0xd5   : > { %s8792_s25 = scalar_lea.vmem %s8791_s3, 160  ;;  %p8793_p2 = scmp.lt.s32.totalorder %s445_s16, %s8791_s3 }
  0xd6   : > { %p8788_p10 = pnand %p8787_p9, %p11764_p3  ;;  %p8794_p5 = scmp.lt.s32.totalorder %s8792_s25, %s8786_s15 }
  0xd8   : > { %p8789_p1 = pneg %p8788_p10  ;;  %p8795_p4 = por %p8794_p5, %p8793_p2 }
  0xda   : > { %p8796_p11 = pnand %p8795_p4, %p8789_p1 }
  0xdc   : > { %8799 = shalt.err (!%p8796_p11)
}
  0xdd   : > { %8011 = dma.hbm_to_vmem [thread:$0]  (%p11764_p3), %s9272_s21, 80, %s445_s16, %s9276_s24  }
  0xde   : > { %s455_s14 = scalar_lea.vmem [#allocation7], %s7990_s26  ;;  %s6856_s11 = sshll.u32 %s8950_s20, 12 }
  0xdf   : > { %s462_s17 = sshll.u32 %s455_s14, 4  ;;  %s9304_s30 = scalar_lea.hbm %s11716_s0, %s6856_s11  ;;  %s9299_s17 = int_to_ptr.vmem [resolvable:$true] %s462_s17 }
  0xe0   : > { %s415_s15 = scalar_lea.vmem [#allocation2], %s6035_s23  ;;  %s9312_s26 = scalar_lea.sflag [#allocation3], %s411_s13 }
  0xe1   : > { %s422_s18 = sshll.u32 %s415_s15, 4  ;;  %s8800_s21 = scalar_lea.hbm %s9304_s30, 4096  ;;  %s9308_s18 = int_to_ptr.vmem [resolvable:$true] %s422_s18 }
  0xe2   : > { %p8801_p4 = scmp.ne.s32.totalorder %s9304_s30, %s8800_s21  ;;  %s8804_s25 = scalar_lea.hbm %s11716_s0, 8192 }
  0xe3   : > { %p8805_p13 = scmp.lt.u32.totalorder %s9304_s30, %s11716_s0  ;;  %p8806_p0 = scmp.lt.u32.totalorder %s8804_s25, %s8800_s21 }
  0xe4   : > { %p8802_p6 = pnand %p8801_p4, %p11764_p3  ;;  %p8808_p8 = scmp.lt.u32.totalorder %s8800_s21, %s9304_s30 }
  0xe5   : > { %p8807_p7 = por %p8806_p0, %p8805_p13 }
  0xe6   : > { %p8803_p12 = pneg %p8802_p6 }
  0xe7   : > { %p8809_p9 = por %p8808_p8, %p8807_p7 }
  0xe9   : > { %p8810_p10 = pnand %p8809_p9, %p8803_p12 }
  0xeb   : > { %8813 = shalt.err (!%p8810_p10)
}
  0xec   : > { %s8814_s13 = scalar_lea.vmem %s9308_s18, 4096  ;;  %s8962_s23 = smov [#allocation2]  }
  0xed   : > { %p8815_p1 = scmp.ne.s32.totalorder %s9308_s18, %s8814_s13  ;;  %s8818_s22 = sshll.u32 %s8962_s23, 4  ;;  %s8819_s22 = int_to_ptr.vmem [resolvable:$false] %s8818_s22 }
  0xee   : > { %s8820_s28 = scalar_lea.vmem %s8819_s22, 8192  ;;  %p8821_p11 = scmp.lt.s32.totalorder %s9308_s18, %s8819_s22 }
  0xef   : > { %p8816_p2 = pnand %p8815_p1, %p11764_p3  ;;  %p8822_p4 = scmp.lt.s32.totalorder %s8820_s28, %s8814_s13 }
  0xf1   : > { %p8817_p5 = pneg %p8816_p2  ;;  %p8823_p6 = por %p8822_p4, %p8821_p11 }
  0xf3   : > { %p8824_p13 = pnand %p8823_p6, %p8817_p5 }
  0xf5   : > { %8827 = shalt.err (!%p8824_p13)
}
  0xf6   : > { %s8963_s15 = smov 128   ;;  %s8964_s21 = smov 8  }
  0xf7   : > { %8010 = dma.hbm_to_vmem [thread:$0]  (%p11764_p3), %s9304_s30, 4096, %s9308_s18, %s9312_s26, %s8963_s15, %s8963_s15, %s8964_s21  }
  0xf8   : > { %s7991_s16 = smul.u32 5120, %s8950_s20  ;;  %s8832_s22 = scalar_lea.hbm %s11718_s2, 10240 }
  0xfa   : > { %s9340_s14 = scalar_lea.hbm %s11718_s2, %s7991_s16 }
  0xfb   : > { %s8828_s11 = scalar_lea.hbm %s9340_s14, 5120  ;;  %p8833_p8 = scmp.lt.u32.totalorder %s9340_s14, %s11718_s2 }
  0xfc   : > { %p8829_p12 = scmp.ne.s32.totalorder %s9340_s14, %s8828_s11  ;;  %p8834_p9 = scmp.lt.u32.totalorder %s8832_s22, %s8828_s11 }
  0xfd   : > { %p8836_p1 = scmp.lt.u32.totalorder %s8828_s11, %s9340_s14 }
  0xfe   : > { %p8830_p0 = pnand %p8829_p12, %p11764_p3  ;;  %p8835_p10 = por %p8834_p9, %p8833_p8 }
 0x100   : > { %p8831_p7 = pneg %p8830_p0  ;;  %p8837_p2 = por %p8836_p1, %p8835_p10 }
 0x102   : > { %p8838_p5 = pnand %p8837_p2, %p8831_p7 }
 0x104   : > { %8841 = shalt.err (!%p8838_p5)
}
 0x105   : > { %s8842_s28 = scalar_lea.vmem %s9299_s17, 5120  ;;  %s8965_s15 = smov [#allocation7]  }
 0x106   : > { %p8843_p11 = scmp.ne.s32.totalorder %s9299_s17, %s8842_s28  ;;  %s8846_s21 = sshll.u32 %s8965_s15, 4  ;;  %s8847_s21 = int_to_ptr.vmem [resolvable:$false] %s8846_s21 }
 0x107   : > { %s8848_s16 = scalar_lea.vmem %s8847_s21, 10240  ;;  %p8849_p13 = scmp.lt.s32.totalorder %s9299_s17, %s8847_s21 }
 0x108   : > { %p8844_p4 = pnand %p8843_p11, %p11764_p3  ;;  %p8850_p12 = scmp.lt.s32.totalorder %s8848_s16, %s8842_s28 }
 0x10a   : > { %p8845_p6 = pneg %p8844_p4  ;;  %p8851_p0 = por %p8850_p12, %p8849_p13 }
 0x10c   : > { %p8852_p8 = pnand %p8851_p0, %p8845_p6 }
 0x10e   : > { %8855 = shalt.err (!%p8852_p8)
}
 0x10f   : > { %s8966_s3 = smov 64   ;;  %s8967_s25 = smov 4  }
 0x110   : > { %8012 = dma.hbm_to_vmem [thread:$0]  (%p11764_p3), %s9340_s14, 5120, %s9299_s17, %s9276_s24, %s8966_s3, %s8966_s3, %s8967_s25  }
 0x111   : > { %s7992_s11 = smul.u32 1536, %s9263_s29  ;;  %s6858_s13 = sshll.u32 %s8950_s20, 13 }
 0x112   : > { %s8968_s23 = smov 16384   ;;  %s483_s24 = scalar_lea.hbm %s11720_s4, %s6858_s13 }
 0x113   : > { %8014 = sst [smem:[#allocation21]] (%p11764_p3), %s8968_s23  ;;  %s476_s14 = scalar_lea.vmem [#allocation10], %s7992_s11 }
 0x114   : > { %s8013_s22 = scalar_select %p11764_p3, [#allocation0], [#allocation22] }
 0x115   : > { %s496_s28 = sshll.u32 %s476_s14, 4  ;;  %s8969_s15 = smov 8192   ;;  %s497_s28 = int_to_ptr.vmem [resolvable:$true] %s496_s28 }
 0x116   : > { %s488_s17 = sld [smem:[%s8013_s22]]   ;;  %s8970_s29 = smov 32  }
 0x117   : > { %8015 = sst [smem:[#allocation21 + $0x1]] (%p11764_p3), %s8969_s15  ;;  %s8971_s21 = smov 256  }
 0x118   : > { %8016 = sst [smem:[#allocation21 + $0x2]] (%p11764_p3), %s8970_s29  ;;  %s8972_s16 = smov 16  }
 0x119   : > { %8017 = sst [smem:[#allocation21 + $0x3]] (%p11764_p3), %s8971_s21  ;;  %s8973_s13 = smov [#allocation20]  }
 0x11a   : > { %8018 = sst [smem:[#allocation21 + $0x4]] (%p11764_p3), %s8971_s21 }
 0x11b   : > { %8019 = sst [smem:[#allocation21 + $0x5]] (%p11764_p3), %s8972_s16 }
 0x11c   : > { %s6043_s3 = sshll.u32 %s488_s17, 26 }
 0x11d   : > { %s6044_s25 = sadd.s32 134217728, %s6043_s3 }
 0x11e   : > { %8020 = dma.general (%p11764_p3), %s483_s24, 24576, %s497_s28, %s9312_s26, %s8973_s13, [#allocation21], %s6044_s25, 0  }
 0x11f PF: > { %p11765_p7 = scmp.ne.s32.totalorder %s11760_s12, 0 }
 0x120   : > { %s11766_s11 = sld [smem:[#allocation34_spill]] (!%p11765_p7)  ;;  %s11767_s23 = sld [smem:[#allocation33_spill]] (!%p11765_p7) }
 0x121   : > { %521 = sbr.rel (%p11765_p7) target bundleno = 1585 (0x631), region = 64  ;;  %s11768_s22 = sld [smem:[#allocation37_spill]] (!%p11765_p7) }
 0x126   : > { %s523_s30 = sand.u32 (!%p11765_p7), 1, %s11766_s11   ;;  %s9390_s18 = sand.u32 (!%p11765_p7), 1, %s11767_s23  }
 0x127   : > { %s6046_s14 = sshll.u32 (!%p11765_p7), %s9390_s18, 8  ;;  %s524_s15 = scalar_lea.sflag (!%p11765_p7), [#allocation3], %s523_s30 }
 0x128   : > { %s9395_s17 = scalar_lea.vmem [#allocation2], %s6046_s14  ;;  %p11769_p9 = scmp.ne.s32.totalorder %s11768_s22, 0 }
 0x12a   : > { %8901 = dma.done.wait (%p11769_p9), %s524_s15, 4096  }
 0x12b   : > { %8903 = vsyncadd (%p11769_p9), %s524_s15, 4294963200  ;;  %s7993_s27 = smul.u32 5, %s9390_s18  ;;  %s533_s12 = scalar_lea.sflag [#allocation6], %s523_s30 }
 0x12d   : > { %s9402_s26 = scalar_lea.vmem [#allocation5], %s7993_s27 }
 0x12e   : > { %8905 = dma.done.wait (%p11769_p9), %s533_s12, 5200  }
 0x12f   : > { %8907 = vsyncadd (%p11769_p9), %s533_s12, 4294962096  ;;  %s7994_s24 = smul.u32 320, %s9390_s18  ;;  %p11770_p3 = scmp.eq.s32.totalorder %s11766_s11, 0 }
 0x131   : > { %s9409_s28 = scalar_lea.vmem [#allocation7], %s7994_s24 }
 0x132   : > { %8909 = dma.done.wait (%p11770_p3), [#allocation9], 12288   ;;  %p11771_p10 = pmov %p11770_p3 }
 0x133   : > { %s7995_s29 = smul.u32 1536, %s9390_s18 }
 0x134   : > { %8911 = vsyncadd (%p11771_p10), [#allocation9], 4294955008 }
 0x135   : > { %s9416_s21 = scalar_lea.vmem [#allocation10], %s7995_s29 }
 0x136   : > { %8913 = dma.done.wait (%p11769_p9), %s524_s15, 24576  }
 0x137   : > { %8915 = vsyncadd (%p11769_p9), %s524_s15, 4294942720  ;;  %p11772_p1 = pmov %p11770_p3 }
 0x139   : > { %8917 = dma.done.wait (%p11772_p1), [#allocation6], 1024   ;;  %p11773_p2 = pmov %p11772_p1 }
 0x13a   : > { %p11774_p5 = pmov %p11772_p1 }
 0x13b   : > { %8919 = vsyncadd (%p11773_p2), [#allocation6], 4294966272 }
 0x13c   : > { %8921 = dma.done.wait (%p11774_p5), [#allocation9], 16   ;;  %p11775_p11 = pmov %p11772_p1 }
 0x13d   : > { %p11776_p4 = pmov %p11772_p1 }
 0x13e   : > { %8923 = vsyncadd (%p11775_p11), [#allocation9], 4294967280 }
 0x13f   : > { %8925 = dma.done.wait (%p11776_p4), [#allocation14], 1040   ;;  %p11777_p6 = pmov %p11772_p1 }
 0x140   : > { %p11778_p13 = pmov %p11772_p1 }
 0x141   : > { %8927 = vsyncadd (%p11777_p6), [#allocation14], 4294966256 }
 0x142   : > { %8929 = dma.done.wait (%p11778_p13), [#allocation17], 32   ;;  %p11779_p12 = pmov %p11772_p1 }
 0x143   : > { %v8136_v0 = vld [vmem:[%s9409_s28 + $0x40] sm:$0xff]   ;;  %v8138_v2 = vld [vmem:[%s9409_s28 + $0x48] sm:$0xff]   ;;  %v8140_v4 = vld [vmem:[%s9409_s28 + $0x50] sm:$0xff]   ;;  %v672_v5 = vlaneseq  ;;  %v8974_v22 = vmov 1.0|1.0   ;;  %v11865_v54 = vmov 0 }
 0x144   : > { %8931 = vsyncadd (%p11779_p12), [#allocation17], 4294967264  ;;  %v8137_v1 = vld [vmem:[%s9409_s28] sm:$0xff]   ;;  %6860 = vmatprep.subr.bf16.mxu0 %v8136_v0  ;;  %7972 = vmatprep.subr.bf16.mxu1 %v8136_v0  ;;  %v8139_v3 = vld [vmem:[%s9409_s28 + $0x8] sm:$0xff]   ;;  %v11823_v0 = vmov 0  ;;  %s11547_s16 = scalar_lea.vmem [#allocation19], %s6046_s14 }
 0x145   : > { %6861 = vmatpush3.bf16.msra.mxu0 %v8137_v1  ;;  %7980 = vmatpush3.bf16.msra.mxu1 %v8137_v1  ;;  %v8141_v6 = vld [vmem:[%s9409_s28 + $0x10] sm:$0xff]   ;;  %v8142_v7 = vld [vmem:[%s9409_s28 + $0x58] sm:$0xff]   ;;  %v9445_v8 = vshrl.u32 %v672_v5, 7  ;;  %v8144_v10 = vld [vmem:[%s9409_s28 + $0x60] sm:$0xff]   ;;  %s6859_s3 = sshll.u32 %s11766_s11, 12  ;;  %s5823_s25 = sshll.u32 %s11547_s16, 4  ;;  %s11669_s25 = int_to_ptr.vmem [resolvable:$true] %s5823_s25 }
 0x146   : > { %6862 = vmatprep.subr.bf16.mxu0 %v8138_v2  ;;  %7973 = vmatprep.subr.bf16.mxu1 %v8138_v2  ;;  %v8143_v9 = vld [vmem:[%s9409_s28 + $0x18] sm:$0xff]   ;;  %v8145_v13 = vld [vmem:[%s9409_s28 + $0x20] sm:$0xff]   ;;  %v8146_v15 = vld [vmem:[%s9409_s28 + $0x68] sm:$0xff]   ;;  %s12064_s13 = sld [smem:[#allocation38_spill]]  ;;  %s12065_s30 = sld [smem:[#allocation41_spill]] }
 0x147   : > { %v9450_v11 = vadd.s32 8, %v9445_v8  ;;  %v712_v12 = vsub.s32 1, %v9445_v8  ;;  %v9455_v14 = vadd.s32 192, %v9445_v8  ;;  %v9459_v16 = vadd.s32 200, %v9445_v8  ;;  %v9462_v17 = vld [vmem:[%s9402_s26] sm:$0x1f] }
 0x148   : > { %v8147_v19 = vld [vmem:[%s9409_s28 + $0x28] sm:$0xff]   ;;  %v708_v20 = vsub.s32 0, %v9445_v8  ;;  %v8148_v21 = vld [vmem:[%s9409_s28 + $0x70] sm:$0xff]   ;;  %v8150_v25 = vld [vmem:[%s9409_s28 + $0x78] sm:$0xff]   ;;  %v9486_v26 = vadd.s32 16, %v9445_v8  ;;  %v9489_v27 = vadd.s32 24, %v9445_v8 }
 0x149   : > { %6863 = vmatpush3.bf16.msra.mxu0 %v8139_v3  ;;  %7981 = vmatpush3.bf16.msra.mxu1 %v8139_v3  ;;  %v9465_v18 = vrot.slane %v9462_v17, %v712_v12  ;;  %v8149_v23 = vld [vmem:[%s9409_s28 + $0x30] sm:$0xff]   ;;  %v9492_v28 = vadd.s32 208, %v9445_v8  ;;  %v9495_v29 = vadd.s32 216, %v9445_v8  ;;  %v8151_v30 = vld [vmem:[%s9409_s28 + $0x38] sm:$0xff]   ;;  %v8152_v31 = vld [vmem:[%s9409_s28 + $0xc0] sm:$0xff]   ;;  %v9504_v32 = vadd.s32 32, %v9445_v8 }
 0x14a   : > { %6864 = vmatprep.subr.bf16.mxu0 %v8140_v4  ;;  %7974 = vmatprep.subr.bf16.mxu1 %v8140_v4  ;;  %v9482_v24 = vrot.slane %v9462_v17, %v708_v20  ;;  %v9507_v33 = vadd.s32 40, %v9445_v8  ;;  %v8153_v34 = vld [vmem:[%s9409_s28 + $0x100] sm:$0xff]   ;;  %v9515_v35 = vadd.s32 224, %v9445_v8  ;;  %v720_v36 = vsub.s32 3, %v9445_v8  ;;  %v8155_v44 = vld [vmem:[%s9409_s28 + $0xc8] sm:$0xff]   ;;  %v8157_v58 = vld [vmem:[%s9409_s28 + $0xd0] sm:$0xff]  }
 0x14b   : > { %vm727_vm0 = vcmp.eq.s32.totalorder %v9465_v18, %v9445_v8  ;;  %vm732_vm1 = vcmp.eq.s32.totalorder %v9465_v18, %v9450_v11  ;;  %vm847_vm2 = vcmp.eq.s32.totalorder %v9465_v18, %v9455_v14  ;;  %vm852_vm4 = vcmp.eq.s32.totalorder %v9465_v18, %v9459_v16  ;;  %v8154_v39 = vld [vmem:[%s9409_s28 + $0x80] sm:$0xff]   ;;  %v8160_v50 = vld [vmem:[%s9409_s28 + $0x108] sm:$0xff]   ;;  %v8158_v60 = vld [vmem:[%s9409_s28 + $0x90] sm:$0xff]   ;;  %s5810_s11 = scalar_lea.sflag [#allocation4], %s9390_s18  ;;  %s8856_s15 = scalar_lea.vmem %s11669_s25, 4096 }
 0x14c   : > { %vm6255_vm3 = vmpackc.low %vm732_vm1, %vm727_vm0  ;;  %vm726_vm6 = vcmp.eq.s32.totalorder %v9482_v24, %v9445_v8  ;;  %vm731_vm7 = vcmp.eq.s32.totalorder %v9482_v24, %v9450_v11  ;;  %vm846_vm8 = vcmp.eq.s32.totalorder %v9482_v24, %v9455_v14  ;;  %vm851_vm9 = vcmp.eq.s32.totalorder %v9482_v24, %v9459_v16  ;;  %v8156_v56 = vld [vmem:[%s9409_s28 + $0x88] sm:$0xff]   ;;  %v8167_v61 = vld [vmem:[%s9409_s28 + $0x110] sm:$0xff]   ;;  %s11667_s14 = scalar_lea.hbm %s12065_s30, %s6859_s3  ;;  %p8857_p0 = scmp.ne.s32.totalorder %s11669_s25, %s8856_s15 }
 0x14d   : > { %6865 = vmatpush3.bf16.msra.mxu0 %v8141_v6  ;;  %7982 = vmatpush3.bf16.msra.mxu1 %v8141_v6  ;;  %vm6303_vm5 = vmpackc.low %vm852_vm4, %vm847_vm2  ;;  %vm737_vm10 = vcmp.eq.s32.totalorder %v9465_v18, %v9486_v26  ;;  %vm742_vm11 = vcmp.eq.s32.totalorder %v9465_v18, %v9489_v27  ;;  %v716_v37 = vsub.s32 2, %v9445_v8  ;;  %v9532_v40 = vadd.s32 232, %v9445_v8  ;;  %v8159_v2 = vld [vmem:[%s9409_s28 + $0xd8] sm:$0xff]   ;;  %v8162_v12 = vld [vmem:[%s9409_s28 + $0xe0] sm:$0xff]   ;;  %p12066_p8 = scmp.ne.s32.totalorder %s12064_s13, 0 }
 0x14e   : > { %6866 = vmatprep.subr.bf16.mxu0 %v8142_v7  ;;  %7975 = vmatprep.subr.bf16.mxu1 %v8142_v7  ;;  %vm9526_vm12 = vmpackc.low %vm731_vm7, %vm726_vm6  ;;  %v9535_v41 = vadd.s32 48, %v9445_v8  ;;  %v9538_v42 = vadd.s32 56, %v9445_v8  ;;  %vm857_vm14 = vcmp.eq.s32.totalorder %v9465_v18, %v9492_v28  ;;  %vm862_vm15 = vcmp.eq.s32.totalorder %v9465_v18, %v9495_v29  ;;  %v8170_v63 = vld [vmem:[%s9409_s28 + $0xb8] sm:$0xff]   ;;  %v8180_v3 = vld [vmem:[%s9409_s28 + $0x130] sm:$0xff]  }
 0x14f   : > { %6256 = vmatprep.mubr.msk.bf16.mxu0 %vm6255_vm3, %v8974_v22  ;;  %6304 = vmatprep.mubr.msk.bf16.mxu1 %vm6303_vm5, %v8974_v22  ;;  %vm9543_vm13 = vmpackc.low %vm851_vm9, %vm846_vm8  ;;  %v9553_v45 = vadd.s32 240, %v9445_v8  ;;  %v9556_v46 = vadd.s32 248, %v9445_v8  ;;  %v9569_v48 = vadd.s32 64, %v9445_v8  ;;  %v9572_v49 = vadd.s32 72, %v9445_v8  ;;  %v8171_v5 = vld [vmem:[#allocation8 + $0x40] sm:$0xff]   ;;  %p8858_p7 = pnand %p8857_p0, %p12066_p8 }
 0x150   : > { %vm9564_vm0 = vmpackc.low %vm742_vm11, %vm737_vm10  ;;  %v9576_v51 = vrot.slane %v9462_v17, %v720_v36  ;;  %v9579_v52 = vrot.slane %v9462_v17, %v716_v37  ;;  %v9582_v53 = vadd.s32 128, %v9445_v8  ;;  %vm736_vm2 = vcmp.eq.s32.totalorder %v9482_v24, %v9486_v26  ;;  %v8165_v36 = vld [vmem:[%s9409_s28 + $0xa8] sm:$0xff]   ;;  %v8185_v43 = vld [vmem:[#allocation8 + $0xc0] sm:$0xff]  }
 0x151   : > { %6867 = vmatpush3.bf16.msra.mxu0 %v8143_v9  ;;  %7983 = vmatpush3.bf16.msra.mxu1 %v8143_v9  ;;  %vm9593_vm1 = vmpackc.low %vm862_vm15, %vm857_vm14  ;;  %vm741_vm3 = vcmp.eq.s32.totalorder %v9482_v24, %v9489_v27  ;;  %vm856_vm4 = vcmp.eq.s32.totalorder %v9482_v24, %v9492_v28  ;;  %v9604_v55 = vadd.s32 136, %v9445_v8  ;;  %vm861_vm5 = vcmp.eq.s32.totalorder %v9482_v24, %v9495_v29  ;;  %v8218_v20 = vld [vmem:[%s9416_s21 + $0x24] ss:$16 sps:$4 sm:$0xff]   ;;  %p8859_p9 = pneg %p8858_p7 }
 0x152   : > { %6868 = vmatprep.subr.bf16.mxu0 %v8144_v10  ;;  %7976 = vmatprep.subr.bf16.mxu1 %v8144_v10  ;;  %vm747_vm6 = vcmp.eq.s32.totalorder %v9465_v18, %v9504_v32  ;;  %vm752_vm7 = vcmp.eq.s32.totalorder %v9465_v18, %v9507_v33  ;;  %v9614_v57 = vadd.s32 144, %v9445_v8  ;;  %vm867_vm8 = vcmp.eq.s32.totalorder %v9465_v18, %v9515_v35  ;;  %vm9649_vm14 = vmpackc.low %vm741_vm3, %vm736_vm2  ;;  %v8161_v10 = vld [vmem:[%s9409_s28 + $0x98] sm:$0xff]  }
 0x153   : > { %vm872_vm9 = vcmp.eq.s32.totalorder %v9465_v18, %v9532_v40  ;;  %vm746_vm10 = vcmp.eq.s32.totalorder %v9482_v24, %v9504_v32  ;;  %v9627_v59 = vadd.s32 152, %v9445_v8  ;;  %vm751_vm11 = vcmp.eq.s32.totalorder %v9482_v24, %v9507_v33  ;;  %vm9667_vm2 = vmpackc.low %vm861_vm5, %vm856_vm4 }
 0x154   : > { %v9641_v62 = vadd.s32 160, %v9445_v8  ;;  %vm757_vm15 = vcmp.eq.s32.totalorder %v9465_v18, %v9535_v41  ;;  %vm877_vm3 = vcmp.eq.s32.totalorder %v9465_v18, %v9553_v45  ;;  %v9678_v1 = vadd.s32 168, %v9445_v8  ;;  %vm9687_vm4 = vmpackc.low %vm752_vm7, %vm747_vm6 }
 0x155   : > { %6869 = vmatpush3.bf16.msra.mxu0 %v8145_v13  ;;  %7984 = vmatpush3.bf16.msra.mxu1 %v8145_v13  ;;  %vm882_vm5 = vcmp.eq.s32.totalorder %v9465_v18, %v9556_v46  ;;  %v9694_v4 = vadd.s32 80, %v9445_v8  ;;  %vm9706_vm6 = vmpackc.low %vm872_vm9, %vm867_vm8  ;;  %vm756_vm7 = vcmp.eq.s32.totalorder %v9482_v24, %v9535_v41  ;;  %v9717_v6 = vadd.s32 176, %v9445_v8 }
 0x156   : > { %6870 = vmatprep.subr.bf16.mxu0 %v8146_v15  ;;  %7977 = vmatprep.subr.bf16.mxu1 %v8146_v15  ;;  %v9720_v7 = vadd.s32 184, %v9445_v8  ;;  %vm761_vm8 = vcmp.eq.s32.totalorder %v9482_v24, %v9538_v42  ;;  %vm876_vm9 = vcmp.eq.s32.totalorder %v9482_v24, %v9553_v45  ;;  %v9733_v9 = vadd.s32 88, %v9445_v8  ;;  %v8173_v15 = vld [vmem:[%s9409_s28 + $0x118] sm:$0xff]  }
 0x157   : > { %v724_v13 = vsub.s32 4, %v9445_v8  ;;  %v9860_v37 = vadd.s32 104, %v9445_v8  ;;  %v9876_v38 = vadd.s32 112, %v9445_v8  ;;  %v9906_v47 = vadd.s32 120, %v9445_v8 }
 0x159   : > { %6871 = vmatpush3.bf16.msra.mxu0 %v8147_v19  ;;  %7985 = vmatpush3.bf16.msra.mxu1 %v8147_v19  ;;  %v9756_v19 = vadd.s32 96, %v9445_v8 }
 0x15a   : > { %6872 = vmatprep.subr.bf16.mxu0 %v8148_v21  ;;  %7978 = vmatprep.subr.bf16.mxu1 %v8148_v21  ;;  %v8163_v21 = vld [vmem:[%s9409_s28 + $0xa0] sm:$0xff]  }
 0x15d   : > { %6873 = vmatpush3.bf16.msra.mxu0 %v8149_v23  ;;  %7986 = vmatpush3.bf16.msra.mxu1 %v8149_v23  ;;  %v11847_v23 = vmov 0 }
 0x15e   : > { %6874 = vmatprep.subr.bf16.mxu0 %v8150_v25  ;;  %7979 = vmatprep.subr.bf16.mxu1 %v8150_v25  ;;  %v8164_v25 = vld [vmem:[%s9409_s28 + $0xe8] sm:$0xff]  }
 0x161   : > { %6875 = vmatpush3.bf16.msra.mxu0 %v8151_v30  ;;  %7987 = vmatpush3.bf16.msra.mxu1 %v8151_v30  ;;  %v9809_v30 = vrot.slane %v9462_v17, %v724_v13  ;;  %v11836_v13 = vmov 0  ;;  %v11855_v17 = vmov 0 }
 0x162   : > { %6972 = vmatprep.subr.bf16.mxu1 %v8152_v31  ;;  %7828 = vmatprep.subr.bf16.mxu0 %v8153_v34  ;;  %v8175_v31 = vld [vmem:[#allocation8 + $0x48] sm:$0xff]  }
 0x164   : > { %6258 = vmatmul.mubr.msk.bf16.vlgmr.msra.gmra.mrb[0].mxu0 %vm9526_vm12, %v8974_v22  ;;  %6306 = vmatmul.mubr.msk.bf16.vlgmr.msra.gmra.mrb[0].mxu1 %vm9543_vm13, %v8974_v22  ;;  %vm866_vm12 = vcmp.eq.s32.totalorder %v9482_v24, %v9515_v35  ;;  %vm9776_vm13 = vmpackc.low %vm751_vm11, %vm746_vm10  ;;  %vm11798_vm10 = vcmp.eq.s32.totalorder %v9482_v24, %v9532_v40 }
 0x165   : > { %6973 = vmatpush3.bf16.msra.mxu1 %v8154_v39  ;;  %7829 = vmatpush3.bf16.msra.mxu0 %v8153_v34  ;;  %vm9795_vm11 = vmpackc.low %vm11798_vm10, %vm866_vm12  ;;  %v8174_v34 = vld [vmem:[%s9409_s28 + $0x120] sm:$0xff]   ;;  %v9879_v39 = vld [vmem:[%s9409_s28 + $0x128] sm:$0xff]  }
 0x166   : > { %6974 = vmatprep.subr.bf16.mxu1 %v8155_v44  ;;  %6260 = vmatprep.mubr.msk.bf16.mxu0 %vm9564_vm0, %v8974_v22  ;;  %vm762_vm0 = vcmp.eq.s32.totalorder %v9465_v18, %v9538_v42  ;;  %vm9896_vm10 = vmpackc.low %vm761_vm8, %vm756_vm7  ;;  %v8166_v44 = vld [vmem:[%s9409_s28 + $0xf0] sm:$0xff]   ;;  %vm11807_vm8 = vcmp.eq.s32.totalorder %v9482_v24, %v9556_v46 }
 0x167   : > { %6308 = vmatprep.mubr.msk.bf16.mxu1 %vm9593_vm1, %v8974_v22  ;;  %7830 = vmatprep.subr.bf16.mxu0 %v8160_v50  ;;  %vm9817_vm12 = vmpackc.low %vm762_vm0, %vm757_vm15  ;;  %vm777_vm0 = vcmp.eq.s32.totalorder %v9465_v18, %v9694_v4 }
 0x168   : > { %vm9835_vm15 = vmpackc.low %vm882_vm5, %vm877_vm3  ;;  %vm11811_vm3 = vcmp.eq.s32.totalorder %v9465_v18, %v9572_v49 }
 0x169   : > { %6975 = vmatpush3.bf16.msra.mxu1 %v8156_v56  ;;  %7831 = vmatpush3.bf16.msra.mxu0 %v8160_v50  ;;  %vm9920_vm1 = vmpackc.low %vm11807_vm8, %vm876_vm9  ;;  %vm11810_vm8 = vcmp.eq.s32.totalorder %v9465_v18, %v9569_v48  ;;  %v8168_v56 = vld [vmem:[%s9409_s28 + $0xb0] sm:$0xff]  }
 0x16a   : > { %6976 = vmatprep.subr.bf16.mxu1 %v8157_v58  ;;  %7832 = vmatprep.subr.bf16.mxu0 %v8167_v61  ;;  %v8178_v50 = vld [vmem:[#allocation8 + $0x50] sm:$0xff]   ;;  %v8278_v58 = vld [vmem:[#allocation8 + $0x160] sm:$0xff]  }
 0x16c   : > { %6262 = vmatmul.mubr.msk.bf16.gmra.mrb[4].mxu0 %vm9649_vm14, %v8974_v22  ;;  %6310 = vmatmul.mubr.msk.bf16.gmra.mrb[4].mxu1 %vm9667_vm2, %v8974_v22  ;;  %vm729_vm2 = vcmp.eq.s32.totalorder %v9576_v51, %v9445_v8 }
 0x16d   : > { %6977 = vmatpush3.bf16.msra.mxu1 %v8158_v60  ;;  %6264 = vmatprep.mubr.msk.bf16.mxu0 %vm9687_vm4, %v8974_v22  ;;  %vm728_vm4 = vcmp.eq.s32.totalorder %v9579_v52, %v9445_v8  ;;  %v8169_v60 = vld [vmem:[%s9409_s28 + $0xf8] sm:$0xff]  }
 0x16e   : > { %6978 = vmatprep.subr.bf16.mxu1 %v8159_v2  ;;  %6312 = vmatprep.mubr.msk.bf16.mxu1 %vm9706_vm6, %v8974_v22  ;;  %vm782_vm6 = vcmp.eq.s32.totalorder %v9465_v18, %v9733_v9  ;;  %v11882_v2 = vmov 0 }
 0x16f   : > { %7833 = vmatpush3.bf16.msra.mxu0 %v8167_v61  ;;  %v11878_v61 = vmov 0 }
 0x170   : > { %7834 = vmatprep.subr.bf16.mxu0 %v8173_v15 }
 0x171   : > { %6979 = vmatpush3.bf16.msra.mxu1 %v8161_v10  ;;  %v11830_v10 = vmov 0 }
 0x172   : > { %6980 = vmatprep.subr.bf16.mxu1 %v8162_v12  ;;  %v11891_v12 = vmov 0 }
 0x173   : > { %7835 = vmatpush3.bf16.msra.mxu0 %v8173_v15  ;;  %v8172_v15 = vld [vmem:[#allocation8] sm:$0xff]  }
 0x174   : > { %6266 = vmatmul.mubr.msk.bf16.gmra.mrb[8].mxu0 %vm9776_vm13, %v8974_v22  ;;  %6314 = vmatmul.mubr.msk.bf16.gmra.mrb[8].mxu1 %vm9795_vm11, %v8974_v22  ;;  %vm739_vm13 = vcmp.eq.s32.totalorder %v9576_v51, %v9486_v26  ;;  %vm11821_vm11 = vcmp.eq.s32.totalorder %v9465_v18, %v9582_v53 }
 0x175   : > { %6981 = vmatpush3.bf16.msra.mxu1 %v8163_v21  ;;  %6268 = vmatprep.mubr.msk.bf16.mxu0 %vm9817_vm12, %v8974_v22  ;;  %v8220_v21 = vld [vmem:[%s9416_s21 + $0x2c] ss:$16 sps:$4 sm:$0xff]  }
 0x176   : > { %6982 = vmatprep.subr.bf16.mxu1 %v8164_v25  ;;  %6316 = vmatprep.mubr.msk.bf16.mxu1 %vm9835_vm15, %v8974_v22  ;;  %vm9942_vm15 = vmpackc.low %vm11811_vm3, %vm11810_vm8  ;;  %vm11814_vm3 = vcmp.eq.s32.totalorder %v9576_v51, %v9450_v11  ;;  %v11851_v25 = vmov 0 }
 0x177   : > { %7836 = vmatprep.subr.bf16.mxu0 %v8174_v34  ;;  %vm9961_vm8 = vmpackc.low %vm11814_vm3, %vm729_vm2  ;;  %vm11817_vm2 = vcmp.eq.s32.totalorder %v9482_v24, %v9569_v48  ;;  %vm11818_vm3 = vcmp.eq.s32.totalorder %v9482_v24, %v9572_v49 }
 0x178   : > { %7837 = vmatpush3.bf16.msra.mxu0 %v8174_v34  ;;  %vm9979_vm14 = vmpackc.low %vm11818_vm3, %vm11817_vm2  ;;  %vm11822_vm2 = vcmp.eq.s32.totalorder %v9465_v18, %v9604_v55  ;;  %v8183_v34 = vld [vmem:[%s9409_s28 + $0x138] sm:$0xff]  }
 0x179   : > { %6983 = vmatpush3.bf16.msra.mxu1 %v8165_v36  ;;  %7838 = vmatprep.subr.bf16.mxu0 %v9879_v39  ;;  %vm9998_vm3 = vmpackc.low %vm11822_vm2, %vm11821_vm11  ;;  %vm11825_vm11 = vcmp.eq.s32.totalorder %v9579_v52, %v9450_v11  ;;  %v8176_v36 = vld [vmem:[#allocation8 + $0x8] sm:$0xff]  }
 0x17a   : > { %6984 = vmatprep.subr.bf16.mxu1 %v8166_v44  ;;  %v11824_v0 = vsel %vm9998_vm3, 4294967295, %v11823_v0  ;;  %vm10022_vm2 = vmpackc.low %vm11825_vm11, %vm728_vm4  ;;  %vm11828_vm4 = vcmp.eq.s32.totalorder %v9482_v24, %v9582_v53  ;;  %vm11829_vm11 = vcmp.eq.s32.totalorder %v9482_v24, %v9604_v55  ;;  %v11861_v44 = vmov 0 }
 0x17b   : > { %vm10042_vm5 = vmpackc.low %vm11829_vm11, %vm11828_vm4  ;;  %vm753_vm11 = vcmp.eq.s32.totalorder %v9579_v52, %v9507_v33 }
 0x17c   : > { %6270 = vmatmul.mubr.msk.bf16.gmra.mrb[12].mxu0 %vm9896_vm10, %v8974_v22  ;;  %6318 = vmatmul.mubr.msk.bf16.gmra.mrb[12].mxu1 %vm9920_vm1, %v8974_v22  ;;  %v11831_v10 = vsel %vm10042_vm5, 4294967295, %v11830_v10  ;;  %vm10061_vm4 = vmpackc.low %vm782_vm6, %vm777_vm0  ;;  %vm11835_vm6 = vcmp.eq.s32.totalorder %v9465_v18, %v9627_v59  ;;  %vm11845_vm1 = vcmp.eq.s32.totalorder %v9482_v24, %v9614_v57  ;;  %vm11846_vm10 = vcmp.eq.s32.totalorder %v9482_v24, %v9627_v59 }
 0x17d   : > { %6985 = vmatpush3.bf16.msra.mxu1 %v8168_v56  ;;  %6272 = vmatprep.mubr.msk.bf16.mxu0 %vm9942_vm15, %v8974_v22  ;;  %vm10124_vm15 = vmpackc.low %vm11846_vm10, %vm11845_vm1  ;;  %vm11849_vm10 = vcmp.eq.s32.totalorder %v9579_v52, %v9486_v26  ;;  %vm11850_vm1 = vcmp.eq.s32.totalorder %v9579_v52, %v9489_v27  ;;  %vm11868_vm5 = vcmp.eq.s32.totalorder %v9576_v51, %v9507_v33  ;;  %v8264_v56 = vld [vmem:[#allocation8 + $0x118] sm:$0xff]  }
 0x17e   : > { %6986 = vmatprep.subr.bf16.mxu1 %v8169_v60  ;;  %6320 = vmatprep.mubr.msk.bf16.mxu1 %vm9961_vm8, %v8974_v22  ;;  %vm11834_vm8 = vcmp.eq.s32.totalorder %v9465_v18, %v9614_v57  ;;  %v11848_v23 = vsel %vm10124_vm15, 4294967295, %v11847_v23  ;;  %vm10142_vm7 = vmpackc.low %vm11850_vm1, %vm11849_vm10  ;;  %vm787_vm15 = vcmp.eq.s32.totalorder %v9465_v18, %v9756_v19  ;;  %vm792_vm10 = vcmp.eq.s32.totalorder %v9465_v18, %v9860_v37  ;;  %v8179_v60 = vld [vmem:[#allocation8 + $0x10] sm:$0xff]  }
 0x17f   : > { %7839 = vmatpush3.bf16.msra.mxu0 %v9879_v39  ;;  %vm10078_vm0 = vmpackc.low %vm11835_vm6, %vm11834_vm8  ;;  %vm11838_vm8 = vcmp.eq.s32.totalorder %v9576_v51, %v9489_v27  ;;  %v11852_v25 = vsel %vm10142_vm7, 4294967295, %v11851_v25  ;;  %vm11853_vm1 = vcmp.eq.s32.totalorder %v9465_v18, %v9641_v62  ;;  %v11859_v39 = vmov 0 }
 0x180   : > { %v11837_v13 = vsel %vm10078_vm0, 4294967295, %v11836_v13  ;;  %vm10096_vm6 = vmpackc.low %vm11838_vm8, %vm739_vm13  ;;  %7840 = vmatprep.subr.bf16.mxu0 %v8180_v3  ;;  %vm11841_vm13 = vcmp.eq.s32.totalorder %v9482_v24, %v9694_v4  ;;  %vm11842_vm8 = vcmp.eq.s32.totalorder %v9482_v24, %v9733_v9  ;;  %vm11867_vm0 = vcmp.eq.s32.totalorder %v9576_v51, %v9504_v32 }
 0x181   : > { %6987 = vmatpush3.bf16.msra.mxu1 %v8170_v63  ;;  %vm10114_vm9 = vmpackc.low %vm11842_vm8, %vm11841_vm13  ;;  %vm11854_vm13 = vcmp.eq.s32.totalorder %v9465_v18, %v9678_v1  ;;  %v11880_v63 = vmov 0 }
 0x182   : > { %7108 = vmatprep.subr.bf16.mxu1 %v8171_v5  ;;  %vm10164_vm8 = vmpackc.low %vm11854_vm13, %vm11853_vm1  ;;  %vm764_vm1 = vcmp.eq.s32.totalorder %v9576_v51, %v9538_v42  ;;  %vm11863_vm13 = vcmp.eq.s32.totalorder %v9465_v18, %v9717_v6  ;;  %v11886_v5 = vmov 0 }
 0x183   : > { %7841 = vmatpush3.bf16.msra.mxu0 %v8180_v3  ;;  %v11856_v17 = vsel %vm10164_vm8, 4294967295, %v11855_v17  ;;  %vm10239_vm3 = vmpackc.low %vm11868_vm5, %vm11867_vm0  ;;  %vm11876_vm5 = vcmp.eq.s32.totalorder %v9482_v24, %v9717_v6  ;;  %vm11877_vm0 = vcmp.eq.s32.totalorder %v9482_v24, %v9720_v7  ;;  %v8181_v3 = vld [vmem:[#allocation8 + $0x58] sm:$0xff]  }
 0x184   : > { %6274 = vmatmul.mubr.msk.bf16.gmra.mrb[16].mxu0 %vm9979_vm14, %v8974_v22  ;;  %6322 = vmatmul.mubr.msk.bf16.vlgmr.msra.gmra.mrb[16].mxu1 %vm10022_vm2, %v8974_v22  ;;  %vm11857_vm14 = vcmp.eq.s32.totalorder %v9482_v24, %v9641_v62  ;;  %vm11858_vm2 = vcmp.eq.s32.totalorder %v9482_v24, %v9678_v1 }
 0x185   : > { %7109 = vmatpush3.bf16.msra.mxu1 %v8172_v15  ;;  %6276 = vmatprep.mubr.msk.bf16.mxu0 %vm10061_vm4, %v8974_v22  ;;  %vm10192_vm12 = vmpackc.low %vm11858_vm2, %vm11857_vm14  ;;  %vm791_vm14 = vcmp.eq.s32.totalorder %v9482_v24, %v9860_v37  ;;  %vm748_vm2 = vcmp.eq.s32.totalorder %v9579_v52, %v9504_v32  ;;  %v11900_v15 = vmov 0 }
 0x186   : > { %v11860_v39 = vsel %vm10192_vm12, 4294967295, %v11859_v39  ;;  %6324 = vmatprep.mubr.msk.bf16.mxu1 %vm10096_vm6, %v8974_v22  ;;  %vm10205_vm4 = vmpackc.low %vm792_vm10, %vm787_vm15  ;;  %7110 = vmatprep.subr.bf16.mxu1 %v8175_v31  ;;  %vm797_vm6 = vcmp.eq.s32.totalorder %v9465_v18, %v9876_v38  ;;  %vm802_vm15 = vcmp.eq.s32.totalorder %v9465_v18, %v9906_v47  ;;  %vm759_vm10 = vcmp.eq.s32.totalorder %v9576_v51, %v9535_v41 }
 0x187   : > { %v11862_v44 = vsel %vm10205_vm4, 4294967295, %v11861_v44  ;;  %7842 = vmatprep.subr.bf16.mxu0 %v8183_v34  ;;  %vm11864_vm12 = vcmp.eq.s32.totalorder %v9465_v18, %v9720_v7  ;;  %vm11871_vm4 = vcmp.eq.s32.totalorder %v9482_v24, %v9756_v19  ;;  %v11922_v31 = vmov 0 }
 0x188   : > { %vm10229_vm8 = vmpackc.low %vm11864_vm12, %vm11863_vm13  ;;  %7843 = vmatpush3.bf16.msra.mxu0 %v8183_v34  ;;  %v8190_v34 = vld [vmem:[#allocation8 + $0x68] sm:$0xff]   ;;  %v11954_v18 = vmov 0 }
 0x189   : > { %v11866_v54 = vsel %vm10229_vm8, 4294967295, %v11865_v54  ;;  %vm10246_vm7 = vmpackc.low %vm791_vm14, %vm11871_vm4  ;;  %7111 = vmatpush3.bf16.msra.mxu1 %v8176_v36  ;;  %7220 = vmatprep.subr.bf16.mxu0 %v8185_v43  ;;  %vm11884_vm14 = vcmp.eq.s32.totalorder %v9576_v51, %v9582_v53  ;;  %v11926_v36 = vmov 0  ;;  %v8192_v43 = vld [vmem:[#allocation8 + $0x28] sm:$0xff]  }
 0x18a   : > { %vm10250_vm12 = vmpackc.low %vm753_vm11, %vm748_vm2  ;;  %7112 = vmatprep.subr.bf16.mxu1 %v8178_v50  ;;  %vm11885_vm2 = vcmp.eq.s32.totalorder %v9576_v51, %v9604_v55  ;;  %v8263_v50 = vld [vmem:[#allocation8 + $0x1d8] sm:$0xff]  }
 0x18b   : > { %vm10260_vm13 = vmpackc.low %vm11877_vm0, %vm11876_vm5  ;;  %vm11893_vm0 = vnez %v11862_v44  ;;  %v11940_v44 = vmov 0 }
 0x18c   : > { %v11879_v61 = vsel %vm10260_vm13, 4294967295, %v11878_v61  ;;  %vm10264_vm4 = vmpackc.low %vm802_vm15, %vm797_vm6  ;;  %6278 = vmatmul.mubr.msk.bf16.gmra.mrb[20].mxu0 %vm10114_vm9, %v8974_v22  ;;  %vm11889_vm6 = vcmp.eq.s32.totalorder %v9809_v30, %v9445_v8  ;;  %vm11890_vm15 = vcmp.eq.s32.totalorder %v9809_v30, %v9450_v11  ;;  %vm11894_vm9 = vcmp.eq.s32.totalorder %v9579_v52, %v9582_v53  ;;  %v8182_v11 = vld [vmem:[#allocation8 + $0x18] sm:$0xff]  }
 0x18d   : > { %v11881_v63 = vsel %vm10264_vm4, 4294967295, %v11880_v63  ;;  %vm10268_vm11 = vmpackc.low %vm764_vm1, %vm759_vm10  ;;  %vm11888_vm1 = vnez %v11852_v25  ;;  %6280 = vmatprep.mubr.msk.bf16.mxu0 %vm11893_vm0, %v8974_v22  ;;  %v11896_v8 = vmov 0  ;;  %7113 = vmatpush3.bf16.msra.mxu1 %v8179_v60  ;;  %vm11898_vm0 = vcmp.eq.s32.totalorder %v9809_v30, %v9486_v26  ;;  %v8186_v25 = vld [vmem:[#allocation8 + $0x20] sm:$0xff]  }
 0x18e   : > { %v11883_v2 = vsel %vm10268_vm11, 4294967295, %v11882_v2  ;;  %vm10278_vm5 = vmpackc.low %vm11885_vm2, %vm11884_vm14  ;;  %6326 = vmatmul.mubr.msk.bf16.gmra.mrb[20].mxu1 %vm11888_vm1, %v8974_v22  ;;  %vm11895_vm14 = vcmp.eq.s32.totalorder %v9579_v52, %v9604_v55  ;;  %vm796_vm1 = vcmp.eq.s32.totalorder %v9482_v24, %v9876_v38  ;;  %7114 = vmatprep.subr.bf16.mxu1 %v8181_v3  ;;  %vm11903_vm13 = vcmp.eq.s32.totalorder %v9576_v51, %v9627_v59  ;;  %v8202_v3 = vld [vmem:[#allocation8 + $0x78] sm:$0xff]  }
 0x18f   : > { %v11887_v5 = vsel %vm10278_vm5, 4294967295, %v11886_v5  ;;  %vm10294_vm10 = vmpackc.low %vm11890_vm15, %vm11889_vm6  ;;  %6328 = vmatprep.mubr.msk.bf16.mxu1 %vm10239_vm3, %v8974_v22  ;;  %vm801_vm6 = vcmp.eq.s32.totalorder %v9482_v24, %v9906_v47  ;;  %vm758_vm15 = vcmp.eq.s32.totalorder %v9579_v52, %v9535_v41  ;;  %vm763_vm3 = vcmp.eq.s32.totalorder %v9579_v52, %v9538_v42  ;;  %v8184_v24 = vld [vmem:[#allocation8 + $0x60] sm:$0xff]  }
 0x190   : > { %v11892_v12 = vsel %vm10294_vm10, 4294967295, %v11891_v12  ;;  %vm10310_vm2 = vmpackc.low %vm11895_vm14, %vm11894_vm9  ;;  %vm11899_vm9 = vcmp.eq.s32.totalorder %v9809_v30, %v9489_v27  ;;  %vm774_vm10 = vcmp.eq.s32.totalorder %v9576_v51, %v9572_v49  ;;  %vm11902_vm5 = vcmp.eq.s32.totalorder %v9576_v51, %v9614_v57  ;;  %v8217_v27 = vld [vmem:[#allocation8 + $0x180] sm:$0xff]  }
 0x191   : > { %v11897_v8 = vsel %vm10310_vm2, 4294967295, %v11896_v8  ;;  %vm10328_vm14 = vmpackc.low %vm11899_vm9, %vm11898_vm0  ;;  %vm769_vm2 = vcmp.eq.s32.totalorder %v9576_v51, %v9569_v48  ;;  %v11904_v26 = vmov 0  ;;  %vm11906_vm0 = vcmp.eq.s32.totalorder %v9809_v30, %v9504_v32  ;;  %7115 = vmatpush3.bf16.msra.mxu1 %v8182_v11 }
 0x192   : > { %v11901_v15 = vsel %vm10328_vm14, 4294967295, %v11900_v15  ;;  %vm10342_vm8 = vmpackc.low %vm11903_vm13, %vm11902_vm5  ;;  %vm11907_vm9 = vcmp.eq.s32.totalorder %v9809_v30, %v9507_v33  ;;  %vm11914_vm13 = vcmp.eq.s32.totalorder %v9579_v52, %v9614_v57  ;;  %vm11915_vm5 = vcmp.eq.s32.totalorder %v9579_v52, %v9627_v59  ;;  %7116 = vmatprep.subr.bf16.mxu1 %v8184_v24  ;;  %v8232_v33 = vld [vmem:[#allocation8 + $0x108] sm:$0xff]   ;;  %v8311_v24 = vld [vmem:[#allocation8 + $0x1f0] sm:$0xff]  }
 0x193   : > { %v11905_v26 = vsel %vm10342_vm8, 4294967295, %v11904_v26  ;;  %vm10352_vm14 = vmpackc.low %vm11907_vm9, %vm11906_vm0  ;;  %v11916_v32 = vmov 0  ;;  %vm11928_vm9 = vcmp.eq.s32.totalorder %v9809_v30, %v9569_v48  ;;  %v11960_v60 = vmov 0 }
 0x194   : > { %vm10356_vm11 = vmpackc.low %vm801_vm6, %vm796_vm1  ;;  %vm11920_vm1 = vcmp.eq.s32.totalorder %v9809_v30, %v9535_v41  ;;  %vm11921_vm6 = vcmp.eq.s32.totalorder %v9809_v30, %v9538_v42  ;;  %6282 = vmatmul.mubr.msk.bf16.gmra.mrb[24].mxu0 %vm10246_vm7, %v8974_v22  ;;  %v11930_v41 = vmov 0  ;;  %vm11933_vm7 = vnez %v11883_v2 }
 0x195   : > { %vm10360_vm4 = vmpackc.low %vm763_vm3, %vm758_vm15  ;;  %vm11924_vm3 = vcmp.eq.s32.totalorder %v9576_v51, %v9641_v62  ;;  %v11936_v42 = vmov 0  ;;  %7117 = vmatpush3.bf16.msra.mxu1 %v8186_v25  ;;  %v11964_v2 = vmov 0  ;;  %v11968_v11 = vmov 0  ;;  %v8230_v25 = vld [vmem:[#allocation8 + $0x148] sm:$0xff]  }
 0x196   : > { %vm10370_vm8 = vmpackc.low %vm11915_vm5, %vm11914_vm13  ;;  %6330 = vmatmul.mubr.msk.bf16.gmra.mrb[24].mxu1 %vm10250_vm12, %v8974_v22  ;;  %vm11929_vm13 = vcmp.eq.s32.totalorder %v9809_v30, %v9572_v49  ;;  %vm11934_vm12 = vcmp.eq.s32.totalorder %v9579_v52, %v9641_v62  ;;  %7118 = vmatprep.subr.bf16.mxu1 %v8190_v34  ;;  %v8246_v34 = vld [vmem:[#allocation8 + $0x150] sm:$0xff]  }
 0x197   : > { %v11917_v32 = vsel %vm10370_vm8, 4294967295, %v11916_v32  ;;  %vm10374_vm0 = vmpackc.low %vm774_vm10, %vm769_vm2  ;;  %vm11925_vm10 = vcmp.eq.s32.totalorder %v9576_v51, %v9678_v1  ;;  %6332 = vmatprep.mubr.msk.bf16.mxu1 %vm11933_vm7, %v8974_v22 }
 0x198   : > { %vm10384_vm15 = vmpackc.low %vm11921_vm6, %vm11920_vm1  ;;  %vm11932_vm1 = vnez %v11881_v63  ;;  %vm11935_vm6 = vcmp.eq.s32.totalorder %v9579_v52, %v9678_v1  ;;  %v8198_v63 = vld [vmem:[#allocation8 + $0x30] sm:$0xff]  }
 0x199   : > { %v11923_v31 = vsel %vm10384_vm15, 4294967295, %v11922_v31  ;;  %vm10394_vm2 = vmpackc.low %vm11925_vm10, %vm11924_vm3  ;;  %6284 = vmatprep.mubr.msk.bf16.mxu0 %vm11932_vm1, %v8974_v22  ;;  %vm768_vm10 = vcmp.eq.s32.totalorder %v9579_v52, %v9569_v48  ;;  %vm11939_vm1 = vcmp.eq.s32.totalorder %v9809_v30, %v9733_v9  ;;  %v11944_v48 = vmov 0  ;;  %7119 = vmatpush3.bf16.msra.mxu1 %v8192_v43  ;;  %v8226_v43 = vld [vmem:[%s9416_s21 + $0x4c] ss:$16 sps:$4 sm:$0xff]  }
 0x19a   : > { %v11927_v36 = vsel %vm10394_vm2, 4294967295, %v11926_v36  ;;  %vm10410_vm5 = vmpackc.low %vm11929_vm13, %vm11928_vm9  ;;  %vm773_vm9 = vcmp.eq.s32.totalorder %v9579_v52, %v9572_v49  ;;  %vm11938_vm13 = vcmp.eq.s32.totalorder %v9809_v30, %v9694_v4  ;;  %v8196_v49 = vld [vmem:[#allocation8 + $0x70] sm:$0xff]  }
 0x19b   : > { %v11931_v41 = vsel %vm10410_vm5, 4294967295, %v11930_v41  ;;  %vm10426_vm3 = vmpackc.low %vm11935_vm6, %vm11934_vm12  ;;  %vm779_vm12 = vcmp.eq.s32.totalorder %v9576_v51, %v9694_v4  ;;  %vm784_vm6 = vcmp.eq.s32.totalorder %v9576_v51, %v9733_v9  ;;  %vm11943_vm5 = vcmp.eq.s32.totalorder %v9576_v51, %v9720_v7  ;;  %7120 = vmatprep.subr.bf16.mxu1 %v8196_v49  ;;  %v8262_v49 = vld [vmem:[#allocation8 + $0x158] sm:$0xff]  }
 0x19c   : > { %v11937_v42 = vsel %vm10426_vm3, 4294967295, %v11936_v42  ;;  %vm10440_vm7 = vmpackc.low %vm11939_vm1, %vm11938_vm13  ;;  %vm11942_vm3 = vcmp.eq.s32.totalorder %v9576_v51, %v9717_v6  ;;  %vm11946_vm13 = vcmp.eq.s32.totalorder %v9809_v30, %v9756_v19  ;;  %vm11947_vm1 = vcmp.eq.s32.totalorder %v9809_v30, %v9860_v37  ;;  %6286 = vmatmul.mubr.msk.bf16.gmra.mrb[28].mxu0 %vm10356_vm11, %v8974_v22 }
 0x19d   : > { %v11941_v44 = vsel %vm10440_vm7, 4294967295, %v11940_v44  ;;  %vm10454_vm2 = vmpackc.low %vm11943_vm5, %vm11942_vm3  ;;  %vm11952_vm5 = vcmp.eq.s32.totalorder %v9579_v52, %v9717_v6  ;;  %vm11953_vm3 = vcmp.eq.s32.totalorder %v9579_v52, %v9720_v7  ;;  %vm11972_vm11 = vcmp.eq.s32.totalorder %v9579_v52, %v9459_v16  ;;  %7121 = vmatpush3.bf16.msra.mxu1 %v8198_v63  ;;  %v8228_v63 = vld [vmem:[%s9416_s21 + $0x40] ss:$16 sps:$4 sm:$0xff]  }
 0x19e   : > { %v11945_v48 = vsel %vm10454_vm2, 4294967295, %v11944_v48  ;;  %vm10464_vm7 = vmpackc.low %vm11947_vm1, %vm11946_vm13  ;;  %vm11962_vm1 = vcmp.eq.s32.totalorder %v9576_v51, %v9455_v14  ;;  %6334 = vmatmul.mubr.msk.bf16.gmra.mrb[28].mxu1 %vm10360_vm4, %v8974_v22  ;;  %vm11971_vm4 = vcmp.eq.s32.totalorder %v9579_v52, %v9455_v14  ;;  %7122 = vmatprep.subr.bf16.mxu1 %v8202_v3  ;;  %v8234_v3 = vld [vmem:[%s9416_s21 + $0x64] ss:$16 sps:$4 sm:$0xff]  }
 0x19f   : > { %vm10468_vm15 = vmpackc.low %vm773_vm9, %vm768_vm10  ;;  %vm11958_vm10 = vcmp.eq.s32.totalorder %v9809_v30, %v9876_v38  ;;  %vm11959_vm9 = vcmp.eq.s32.totalorder %v9809_v30, %v9906_v47  ;;  %6336 = vmatprep.mubr.msk.bf16.mxu1 %vm10374_vm0, %v8974_v22  ;;  %vm11976_vm0 = vcmp.eq.s32.totalorder %v9809_v30, %v9627_v59  ;;  %v8296_v59 = vld [vmem:[#allocation8 + $0x128] sm:$0xff]  }
 0x1a0   : > { %vm10478_vm2 = vmpackc.low %vm11953_vm3, %vm11952_vm5  ;;  %vm11966_vm5 = vcmp.eq.s32.totalorder %v9809_v30, %v9582_v53  ;;  %vm11967_vm3 = vcmp.eq.s32.totalorder %v9809_v30, %v9604_v55  ;;  %v11973_v53 = vmov 0  ;;  %v11977_v55 = vmov 0 }
 0x1a1   : > { %v11955_v18 = vsel %vm10478_vm2, 4294967295, %v11954_v18  ;;  %vm10482_vm8 = vmpackc.low %vm784_vm6, %vm779_vm12  ;;  %vm11963_vm12 = vcmp.eq.s32.totalorder %v9576_v51, %v9459_v16 }
 0x1a2   : > { %vm10492_vm13 = vmpackc.low %vm11959_vm9, %vm11958_vm10  ;;  %vm11970_vm9 = vnez %v11824_v0  ;;  %v8204_v0 = vld [vmem:[#allocation8 + $0x38] sm:$0xff]  }
 0x1a3   : > { %v11961_v60 = vsel %vm10492_vm13, 4294967295, %v11960_v60  ;;  %vm10502_vm6 = vmpackc.low %vm11963_vm12, %vm11962_vm1  ;;  %6288 = vmatprep.mubr.msk.bf16.mxu0 %vm11970_vm9, %v8974_v22  ;;  %vm778_vm12 = vcmp.eq.s32.totalorder %v9579_v52, %v9694_v4  ;;  %7123 = vmatpush3.bf16.msra.mxu1 %v8204_v0  ;;  %v8294_v0 = vld [vmem:[#allocation8 + $0x168] sm:$0xff]  }
 0x1a4   : > { %v11965_v2 = vsel %vm10502_vm6, 4294967295, %v11964_v2  ;;  %vm10518_vm10 = vmpackc.low %vm11967_vm3, %vm11966_vm5  ;;  %vm783_vm5 = vcmp.eq.s32.totalorder %v9579_v52, %v9733_v9  ;;  %vm11975_vm3 = vcmp.eq.s32.totalorder %v9809_v30, %v9614_v57  ;;  %v11981_v57 = vmov 0  ;;  %v8297_v4 = vld [vmem:[#allocation8 + $0x1a8] sm:$0xff]   ;;  %v8310_v9 = vld [vmem:[#allocation8 + $0x170] sm:$0xff]  }
 0x1a5   : > { %v11969_v11 = vsel %vm10518_vm10, 4294967295, %v11968_v11  ;;  %vm10534_vm1 = vmpackc.low %vm11972_vm11, %vm11971_vm4  ;;  %vm789_vm4 = vcmp.eq.s32.totalorder %v9576_v51, %v9756_v19  ;;  %vm794_vm11 = vcmp.eq.s32.totalorder %v9576_v51, %v9860_v37  ;;  %vm11980_vm10 = vcmp.eq.s32.totalorder %v9576_v51, %v9495_v29 }
 0x1a6   : > { %v11974_v53 = vsel %vm10534_vm1, 4294967295, %v11973_v53  ;;  %vm10548_vm9 = vmpackc.low %vm11976_vm0, %vm11975_vm3  ;;  %vm11979_vm1 = vcmp.eq.s32.totalorder %v9576_v51, %v9492_v28  ;;  %vm11983_vm3 = vcmp.eq.s32.totalorder %v9809_v30, %v9641_v62  ;;  %vm11984_vm0 = vcmp.eq.s32.totalorder %v9809_v30, %v9678_v1  ;;  %6338 = vmatmul.mubr.msk.bf16.gmra.mrb[32].mxu1 %vm10468_vm15, %v8974_v22  ;;  %v8238_v62 = vld [vmem:[%s9416_s21 + $0x60] ss:$16 sps:$4 sm:$0xff]   ;;  %v8239_v1 = vld [vmem:[%s9416_s21 + $0x68] ss:$16 sps:$4 sm:$0xff]  }
 0x1a7   : > { %v11978_v55 = vsel %vm10548_vm9, 4294967295, %v11977_v55  ;;  %vm10562_vm6 = vmpackc.low %vm11980_vm10, %vm11979_vm1  ;;  %vm11989_vm10 = vcmp.eq.s32.totalorder %v9579_v52, %v9492_v28  ;;  %vm11990_vm1 = vcmp.eq.s32.totalorder %v9579_v52, %v9495_v29  ;;  %6340 = vmatprep.mubr.msk.bf16.mxu1 %vm10482_vm8, %v8974_v22  ;;  %vm12009_vm15 = vcmp.eq.s32.totalorder %v9579_v52, %v9515_v35 }
 0x1a8   : > { %v11982_v57 = vsel %vm10562_vm6, 4294967295, %v11981_v57  ;;  %vm10572_vm9 = vmpackc.low %vm11984_vm0, %vm11983_vm3  ;;  %vm11999_vm0 = vcmp.eq.s32.totalorder %v9576_v51, %v9515_v35  ;;  %vm12017_vm8 = vcmp.eq.s32.totalorder %v9576_v51, %v9553_v45 }
 0x1a9   : > { %vm10576_vm13 = vmpackc.low %vm783_vm5, %vm778_vm12  ;;  %vm11995_vm12 = vcmp.eq.s32.totalorder %v9809_v30, %v9717_v6  ;;  %vm11996_vm5 = vcmp.eq.s32.totalorder %v9809_v30, %v9720_v7  ;;  %v12006_v6 = vmov 0  ;;  %v12019_v7 = vmov 0 }
 0x1aa   : > { %vm10586_vm6 = vmpackc.low %vm11990_vm1, %vm11989_vm10  ;;  %vm12003_vm10 = vnez %v11831_v10  ;;  %vm12004_vm1 = vcmp.eq.s32.totalorder %v9809_v30, %v9455_v14  ;;  %v12011_v14 = vmov 0  ;;  %v8214_v10 = vld [vmem:[#allocation8 + $0x140] sm:$0xff]  }
 0x1ab   : > { %vm10590_vm2 = vmpackc.low %vm794_vm11, %vm789_vm4  ;;  %vm12000_vm4 = vcmp.eq.s32.totalorder %v9576_v51, %v9532_v40  ;;  %6290 = vmatmul.mubr.msk.bf16.gmra.mrb[32].mxu0 %vm12003_vm10, %v8974_v22  ;;  %7332 = vmatprep.subr.bf16.mxu1 %v8214_v10  ;;  %v8326_v10 = vld [vmem:[#allocation8 + $0x178] sm:$0xff]  }
 0x1ac   : > { %vm10600_vm3 = vmpackc.low %vm11996_vm5, %vm11995_vm12  ;;  %vm12005_vm12 = vcmp.eq.s32.totalorder %v9809_v30, %v9459_v16  ;;  %v12015_v16 = vmov 0 }
 0x1ad   : > { %vm10610_vm11 = vmpackc.low %vm12000_vm4, %vm11999_vm0  ;;  %vm12008_vm0 = vnez %v11837_v13  ;;  %vm12010_vm4 = vcmp.eq.s32.totalorder %v9579_v52, %v9532_v40  ;;  %v8201_v13 = vld [vmem:[#allocation8 + $0xa8] sm:$0xff]  }
 0x1ae   : > { %vm10626_vm5 = vmpackc.low %vm12005_vm12, %vm12004_vm1  ;;  %6292 = vmatprep.mubr.msk.bf16.mxu0 %vm12008_vm0, %v8974_v22  ;;  %vm12013_vm1 = vcmp.eq.s32.totalorder %v9809_v30, %v9492_v28  ;;  %vm12014_vm12 = vcmp.eq.s32.totalorder %v9809_v30, %v9495_v29  ;;  %v12023_v28 = vmov 0  ;;  %v12027_v29 = vmov 0  ;;  %6342 = vmatmul.mubr.msk.bf16.gmra.mrb[36].mxu1 %vm10576_vm13, %v8974_v22 }
 0x1af   : > { %v12007_v6 = vsel %vm10626_vm5, 4294967295, %v12006_v6  ;;  %vm10642_vm10 = vmpackc.low %vm12010_vm4, %vm12009_vm15  ;;  %vm12018_vm5 = vcmp.eq.s32.totalorder %v9576_v51, %v9556_v46  ;;  %vm12021_vm4 = vcmp.eq.s32.totalorder %v9809_v30, %v9515_v35  ;;  %v12031_v35 = vmov 0  ;;  %6344 = vmatprep.mubr.msk.bf16.mxu1 %vm10590_vm2, %v8974_v22 }
 0x1b0   : > { %v12012_v14 = vsel %vm10642_vm10, 4294967295, %v12011_v14  ;;  %vm10652_vm0 = vmpackc.low %vm12014_vm12, %vm12013_vm1  ;;  %vm12022_vm1 = vcmp.eq.s32.totalorder %v9809_v30, %v9532_v40  ;;  %vm804_vm13 = vcmp.eq.s32.totalorder %v9576_v51, %v9906_v47  ;;  %vm12036_vm2 = vnez %v11866_v54  ;;  %v8187_v40 = vld [vmem:[#allocation8 + $0x80] sm:$0xff]   ;;  %v8207_v54 = vld [vmem:[#allocation8 + $0xb8] sm:$0xff]  }
 0x1b1   : > { %v12016_v16 = vsel %vm10652_vm0, 4294967295, %v12015_v16  ;;  %vm10662_vm15 = vmpackc.low %vm12018_vm5, %vm12017_vm8  ;;  %vm12025_vm0 = vcmp.eq.s32.totalorder %v9579_v52, %v9553_v45  ;;  %vm12026_vm5 = vcmp.eq.s32.totalorder %v9579_v52, %v9556_v46  ;;  %vm803_vm10 = vcmp.eq.s32.totalorder %v9579_v52, %v9906_v47  ;;  %v8200_v47 = vld [vmem:[#allocation8 + $0xe8] sm:$0xff]  }
 0x1b2   : > { %v12020_v7 = vsel %vm10662_vm15, 4294967295, %v12019_v7  ;;  %vm10672_vm12 = vmpackc.low %vm12022_vm1, %vm12021_vm4  ;;  %vm12029_vm15 = vcmp.eq.s32.totalorder %v9809_v30, %v9553_v45  ;;  %vm12030_vm4 = vcmp.eq.s32.totalorder %v9809_v30, %v9556_v46  ;;  %v8188_v45 = vld [vmem:[#allocation8 + $0xc8] sm:$0xff]   ;;  %v8195_v30 = vld [vmem:[#allocation8 + $0x98] sm:$0xff]  }
 0x1b3   : > { %v12024_v28 = vsel %vm10672_vm12, 4294967295, %v12023_v28  ;;  %vm10682_vm8 = vmpackc.low %vm12026_vm5, %vm12025_vm0  ;;  %vm12033_vm12 = vnez %v11848_v23  ;;  %vm12034_vm0 = vnez %v11856_v17  ;;  %vm793_vm5 = vcmp.eq.s32.totalorder %v9579_v52, %v9860_v37  ;;  %v8189_v46 = vld [vmem:[#allocation8 + $0x88] sm:$0xff]   ;;  %v8197_v37 = vld [vmem:[#allocation8 + $0xe0] sm:$0xff]  }
 0x1b4   : > { %v12028_v29 = vsel %vm10682_vm8, 4294967295, %v12027_v29  ;;  %vm10692_vm1 = vmpackc.low %vm12030_vm4, %vm12029_vm15  ;;  %6294 = vmatmul.mubr.msk.bf16.gmra.mrb[36].mxu0 %vm12033_vm12, %v8974_v22  ;;  %vm788_vm15 = vcmp.eq.s32.totalorder %v9579_v52, %v9756_v19  ;;  %vm799_vm12 = vcmp.eq.s32.totalorder %v9576_v51, %v9876_v38  ;;  %vm798_vm8 = vcmp.eq.s32.totalorder %v9579_v52, %v9876_v38  ;;  %v8191_v51 = vld [vmem:[#allocation8 + $0xd0] sm:$0xff]   ;;  %v8194_v19 = vld [vmem:[#allocation8 + $0xd8] sm:$0xff]  }
 0x1b5   : > { %v12032_v35 = vsel %vm10692_vm1, 4294967295, %v12031_v35  ;;  %6296 = vmatprep.mubr.msk.bf16.mxu0 %vm12034_vm0, %v8974_v22  ;;  %vm6345_vm4 = vmpackc.low %vm793_vm5, %vm788_vm15  ;;  %vm12035_vm0 = vnez %v11860_v39  ;;  %vm12037_vm5 = vnez %v11879_v61  ;;  %v8193_v52 = vld [vmem:[#allocation8 + $0x90] sm:$0xff]   ;;  %v8199_v38 = vld [vmem:[#allocation8 + $0xa0] sm:$0xff]  }
 0x1b6   : > { %vm6347_vm1 = vmpackc.low %vm804_vm13, %vm799_vm12  ;;  %6346 = vmatmul.mubr.msk.bf16.gmra.mrb[40].mxu1 %vm6345_vm4, %v8974_v22  ;;  %vm12038_vm12 = vnez %v11887_v5  ;;  %vm12040_vm13 = vnez %v11897_v8  ;;  %vm12043_vm4 = vnez %v11917_v32  ;;  %v8203_v23 = vld [vmem:[#allocation8 + $0xf0] sm:$0xff]   ;;  %v8206_v39 = vld [vmem:[#allocation8 + $0xf8] sm:$0xff]  }
 0x1b7   : > { %6348 = vmatprep.mubr.msk.bf16.mxu1 %vm6347_vm1, %v8974_v22  ;;  %vm6349_vm15 = vmpackc.low %vm803_vm10, %vm798_vm8  ;;  %vm12039_vm1 = vnez %v11892_v12  ;;  %vm12041_vm10 = vnez %v11901_v15  ;;  %vm12042_vm8 = vnez %v11905_v26  ;;  %v8205_v17 = vld [vmem:[#allocation8 + $0xb0] sm:$0xff]   ;;  %v8215_v61 = vld [vmem:[#allocation8 + $0x1c0] sm:$0xff]  }
 0x1b8   : > { %v8210_v5 = vld [vmem:[%s9416_s21 + $0x4] ss:$16 sps:$4 sm:$0xff]   ;;  %v8213_v12 = vld [vmem:[%s9416_s21 + $0xc] ss:$16 sps:$4 sm:$0xff]   ;;  %v8208_v8 = vld [vmem:[%s9416_s21] ss:$16 sps:$4 sm:$0xff]  }
 0x1b9   : > { %v8211_v15 = vld [vmem:[%s9416_s21 + $0x8] ss:$16 sps:$4 sm:$0xff]   ;;  %v8216_v26 = vld [vmem:[#allocation8 + $0x100] sm:$0xff]  }
 0x1ba   : > { %v8231_v32 = vld [vmem:[#allocation8 + $0x1c8] sm:$0xff]  }
 0x1bc   : > { %6298 = vmatmul.mubr.msk.bf16.gmra.mrb[40].mxu0 %vm12035_vm0, %v8974_v22  ;;  %vm12044_vm0 = vnez %v11923_v31  ;;  %v8233_v31 = vld [vmem:[#allocation8 + $0x188] sm:$0xff]  }
 0x1bd   : > { %6300 = vmatprep.mubr.msk.bf16.mxu0 %vm12036_vm2, %v8974_v22  ;;  %vm12045_vm2 = vnez %v11927_v36  ;;  %v8222_v36 = vld [vmem:[%s9416_s21 + $0x20] ss:$16 sps:$4 sm:$0xff]  }
 0x1be   : > { %6350 = vmatmul.mubr.msk.bf16.gmra.mrb[44].mxu1 %vm6349_vm15, %v8974_v22  ;;  %vm12047_vm15 = vnez %v11937_v42  ;;  %v8224_v42 = vld [vmem:[%s9416_s21 + $0x44] ss:$16 sps:$4 sm:$0xff]  }
 0x1bf   : > { %6352 = vmatprep.mubr.msk.bf16.mxu1 %vm12038_vm12, %v8974_v22  ;;  %vm12049_vm12 = vnez %v11945_v48  ;;  %v8249_v48 = vld [vmem:[#allocation8 + $0x190] sm:$0xff]  }
 0x1c4   : > { %6302 = vmatmul.mubr.msk.bf16.gmra.mrb[44].mxu0 %vm12037_vm5, %v8974_v22  ;;  %vm12048_vm5 = vnez %v11941_v44  ;;  %v8248_v44 = vld [vmem:[#allocation8 + $0x110] sm:$0xff]  }
 0x1c5   : > { %7844 = vmatprep.mubr.msk.bf16.mxu0 %vm12039_vm1, %v8974_v22  ;;  %vm12050_vm1 = vnez %v11955_v18  ;;  %v8265_v18 = vld [vmem:[#allocation8 + $0x198] sm:$0xff]  }
 0x1c6   : > { %6354 = vmatmul.mubr.msk.bf16.gmra.mrb[48].mxu1 %vm12040_vm13, %v8974_v22  ;;  %vm12051_vm13 = vnez %v11961_v60  ;;  %v8279_v60 = vld [vmem:[#allocation8 + $0x1e0] sm:$0xff]  }
 0x1c7   : > { %6356 = vmatprep.mubr.msk.bf16.mxu1 %vm12042_vm8, %v8974_v22  ;;  %vm12054_vm8 = vnez %v11974_v53  ;;  %v8280_v53 = vld [vmem:[#allocation8 + $0x120] sm:$0xff]  }
 0x1cc   : > { %7845 = vmatmul.mubr.msk.bf16.vlgmr.msra.gmra.mrb[48].mxu0 %vm12041_vm10, %v8974_v22  ;;  %vm12053_vm10 = vnez %v11969_v11  ;;  %v8236_v11 = vld [vmem:[%s9416_s21 + $0x6c] ss:$16 sps:$4 sm:$0xff]  }
 0x1cd   : > { %7221 = vmatpush3.bf16.msra.mxu0 %v8187_v40  ;;  %7848 = vmatprep.mubr.msk.bf16.mxu0 %vm10352_vm14, %v8974_v22  ;;  %vm12046_vm14 = vnez %v11931_v41  ;;  %v8223_v41 = vld [vmem:[%s9416_s21 + $0x28] ss:$16 sps:$4 sm:$0xff]   ;;  %v8342_v40 = vld [vmem:[#allocation8 + $0x240] sm:$0xff]  }
 0x1ce   : > { %7222 = vmatprep.subr.bf16.mxu0 %v8188_v45  ;;  %6358 = vmatmul.mubr.msk.bf16.gmra.mrb[52].mxu1 %vm12043_vm4, %v8974_v22  ;;  %vm12055_vm4 = vnez %v11978_v55  ;;  %v8281_v55 = vld [vmem:[#allocation8 + $0x1a0] sm:$0xff]  }
 0x1cf   : > { %6360 = vmatprep.mubr.msk.bf16.mxu1 %vm12045_vm2, %v8974_v22  ;;  %vm12057_vm2 = vnez %v12007_v6  ;;  %v8240_v6 = vld [vmem:[%s9416_s21 + $0x84] ss:$16 sps:$4 sm:$0xff]   ;;  %v8244_v45 = vld [vmem:[%s9416_s21 + $0x80] ss:$16 sps:$4 sm:$0xff]  }
 0x1d1   : > { %7223 = vmatpush3.bf16.msra.mxu0 %v8189_v46  ;;  %v8245_v46 = vld [vmem:[%s9416_s21 + $0x88] ss:$16 sps:$4 sm:$0xff]  }
 0x1d2   : > { %7224 = vmatprep.subr.bf16.mxu0 %v8191_v51  ;;  %v8343_v51 = vld [vmem:[#allocation8 + $0x2c0] sm:$0xff]  }
 0x1d4   : > { %7849 = vmatmul.mubr.msk.bf16.gmra.mrb[52].mxu0 %vm12044_vm0, %v8974_v22  ;;  %vm12056_vm0 = vnez %v11982_v57  ;;  %v8295_v57 = vld [vmem:[#allocation8 + $0x1e8] sm:$0xff]  }
 0x1d5   : > { %7852 = vmatprep.mubr.msk.bf16.mxu0 %vm12046_vm14, %v8974_v22  ;;  %7225 = vmatpush3.bf16.msra.mxu0 %v8193_v52  ;;  %vm12062_vm14 = vnez %v12028_v29  ;;  %v8328_v29 = vld [vmem:[#allocation8 + $0x138] sm:$0xff]   ;;  %v8250_v52 = vld [vmem:[%s9416_s21 + $0xa4] ss:$16 sps:$4 sm:$0xff]  }
 0x1d6   : > { %7226 = vmatprep.subr.bf16.mxu0 %v8194_v19  ;;  %6362 = vmatmul.mubr.msk.bf16.gmra.mrb[56].mxu1 %vm12047_vm15, %v8974_v22  ;;  %vm12063_vm15 = vnez %v12032_v35  ;;  %v8329_v35 = vld [vmem:[#allocation8 + $0x1b8] sm:$0xff]  }
 0x1d7   : > { %6364 = vmatprep.mubr.msk.bf16.mxu1 %vm12049_vm12, %v8974_v22  ;;  %v8252_v19 = vld [vmem:[%s9416_s21 + $0xac] ss:$16 sps:$4 sm:$0xff]  }
 0x1d9   : > { %7227 = vmatpush3.bf16.msra.mxu0 %v8195_v30  ;;  %v8254_v30 = vld [vmem:[%s9416_s21 + $0xa0] ss:$16 sps:$4 sm:$0xff]  }
 0x1da   : > { %7228 = vmatprep.subr.bf16.mxu0 %v8197_v37  ;;  %v8255_v37 = vld [vmem:[%s9416_s21 + $0xa8] ss:$16 sps:$4 sm:$0xff]  }
 0x1dc   : > { %7853 = vmatmul.mubr.msk.bf16.gmra.mrb[56].mxu0 %vm12048_vm5, %v8974_v22 }
 0x1dd   : > { %7856 = vmatprep.mubr.msk.bf16.mxu0 %vm10464_vm7, %v8974_v22  ;;  %7229 = vmatpush3.bf16.msra.mxu0 %v8199_v38  ;;  %vm12052_vm7 = vnez %v11965_v2  ;;  %v8229_v2 = vld [vmem:[%s9416_s21 + $0x48] ss:$16 sps:$4 sm:$0xff]   ;;  %v8256_v38 = vld [vmem:[%s9416_s21 + $0xc4] ss:$16 sps:$4 sm:$0xff]  }
 0x1de   : > { %7230 = vmatprep.subr.bf16.mxu0 %v8200_v47  ;;  %6366 = vmatmul.mubr.msk.bf16.gmra.mrb[60].mxu1 %vm12050_vm1, %v8974_v22  ;;  %v8258_v47 = vld [vmem:[%s9416_s21 + $0xcc] ss:$16 sps:$4 sm:$0xff]  }
 0x1df   : > { %6368 = vmatprep.mubr.msk.bf16.mxu1 %vm12052_vm7, %v8974_v22 }
 0x1e1   : > { %7231 = vmatpush3.bf16.msra.mxu0 %v8201_v13  ;;  %v8260_v13 = vld [vmem:[%s9416_s21 + $0xc0] ss:$16 sps:$4 sm:$0xff]  }
 0x1e2   : > { %7232 = vmatprep.subr.bf16.mxu0 %v8203_v23  ;;  %v8261_v23 = vld [vmem:[%s9416_s21 + $0xc8] ss:$16 sps:$4 sm:$0xff]  }
 0x1e4   : > { %7857 = vmatmul.mubr.msk.bf16.gmra.mrb[60].mxu0 %vm12051_vm13, %v8974_v22 }
 0x1e5   : > { %7860 = vmatprep.mubr.msk.bf16.mxu0 %vm12053_vm10, %v8974_v22  ;;  %7233 = vmatpush3.bf16.msra.mxu0 %v8205_v17  ;;  %v8266_v17 = vld [vmem:[%s9416_s21 + $0xe4] ss:$16 sps:$4 sm:$0xff]  }
 0x1e6   : > { %7234 = vmatprep.subr.bf16.mxu0 %v8206_v39  ;;  %6370 = vmatmul.mubr.msk.bf16.gmra.mrb[64].mxu1 %vm12054_vm8, %v8974_v22  ;;  %v8268_v39 = vld [vmem:[%s9416_s21 + $0xec] ss:$16 sps:$4 sm:$0xff]  }
 0x1e7   : > { %6372 = vmatprep.mubr.msk.bf16.mxu1 %vm12056_vm0, %v8974_v22 }
 0x1e9   : > { %7235 = vmatpush3.bf16.msra.mxu0 %v8207_v54  ;;  %v8270_v54 = vld [vmem:[%s9416_s21 + $0xe0] ss:$16 sps:$4 sm:$0xff]  }
 0x1ea   : > { %7444 = vmatprep.subr.bf16.mxu0 %v8215_v61 }
 0x1ec   : > { %7861 = vmatmul.mubr.msk.bf16.gmra.mrb[64].mxu0 %vm12055_vm4, %v8974_v22 }
 0x1ed   : > { %7864 = vmatprep.mubr.msk.bf16.mxu0 %vm10572_vm9, %v8974_v22  ;;  %vm12058_vm9 = vnez %v12012_v14  ;;  %v8242_v14 = vld [vmem:[%s9416_s21 + $0x8c] ss:$16 sps:$4 sm:$0xff]  }
 0x1ee   : > { %6374 = vmatmul.mubr.msk.bf16.gmra.mrb[68].mxu1 %vm10586_vm6, %v8974_v22  ;;  %vm12059_vm6 = vnez %v12016_v16  ;;  %v8312_v16 = vld [vmem:[#allocation8 + $0x130] sm:$0xff]  }
 0x1ef   : > { %6376 = vmatprep.mubr.msk.bf16.mxu1 %vm10610_vm11, %v8974_v22  ;;  %vm12061_vm11 = vnez %v12024_v28  ;;  %v8327_v28 = vld [vmem:[#allocation8 + $0x1f8] sm:$0xff]  }
 0x1f4   : > { %7865 = vmatmul.mubr.msk.bf16.gmra.mrb[68].mxu0 %vm10600_vm3, %v8974_v22  ;;  %vm12060_vm3 = vnez %v12020_v7  ;;  %v8313_v7 = vld [vmem:[#allocation8 + $0x1b0] sm:$0xff]  }
 0x1f5   : > { %7868 = vmatprep.mubr.msk.bf16.mxu0 %vm12057_vm2, %v8974_v22 }
 0x1f6   : > { %6378 = vmatmul.mubr.msk.bf16.gmra.mrb[72].mxu1 %vm12058_vm9, %v8974_v22 }
 0x1f7   : > { %6380 = vmatprep.mubr.msk.bf16.mxu1 %vm12060_vm3, %v8974_v22 }
 0x1fc   : > { %7869 = vmatmul.mubr.msk.bf16.gmra.mrb[72].mxu0 %vm12059_vm6, %v8974_v22 }
 0x1fd   : > { %7872 = vmatprep.mubr.msk.bf16.mxu0 %vm12061_vm11, %v8974_v22 }
 0x1fe   : > { %6382 = vmatmul.mubr.msk.bf16.gmra.mrb[76].mxu1 %vm12062_vm14, %v8974_v22 }
 0x1ff   : > { %2793 = vmatprep.mubr.bf16.mxu1 %v8210_v5 }
 0x204   : > { %7873 = vmatmul.mubr.msk.bf16.gmra.mrb[76].mxu0 %vm12063_vm15, %v8974_v22  ;;  %v8247_v22 = vld [vmem:[#allocation8 + $0x1d0] sm:$0xff]  }
 0x205   : > { %2954 = vmatprep.mubr.bf16.mxu0 %v8213_v12  ;;  %v8271_v12 = vld [vmem:[%s9416_s21 + $0xe8] ss:$16 sps:$4 sm:$0xff]  }
 0x206   : > { %2794 = vmatmul.mubr.bf16.vlgmr.msra.gmra.mrb[80].mxu1 %v8208_v8 }
 0x207   : > { %7333 = vmatpush3.bf16.msra.mxu1 %v8216_v26  ;;  %2801 = vmatprep.mubr.bf16.mxu1 %v8218_v20 }
 0x208   : > { %7334 = vmatprep.subr.bf16.mxu1 %v8230_v25  ;;  %v8272_v25 = vld [vmem:[%s9416_s21 + $0x104] ss:$16 sps:$4 sm:$0xff]  }
 0x20b   : > { %7335 = vmatpush3.bf16.msra.mxu1 %v8232_v33 }
 0x20c   : > { %2955 = vmatmul.mubr.bf16.vlgmr.msra.gmra.mrb[80].mxu0 %v8211_v15  ;;  %7336 = vmatprep.subr.bf16.mxu1 %v8246_v34 }
 0x20d   : > { %7445 = vmatpush3.bf16.msra.mxu0 %v8217_v27  ;;  %2962 = vmatprep.mubr.bf16.mxu0 %v8220_v21 }
 0x20e   : > { %7446 = vmatprep.subr.bf16.mxu0 %v8231_v32  ;;  %2802 = vmatmul.mubr.bf16.gmra.mrb[84].mxu1 %v8222_v36  ;;  %v8274_v32 = vld [vmem:[%s9416_s21 + $0x10c] ss:$16 sps:$4 sm:$0xff]   ;;  %v8276_v36 = vld [vmem:[%s9416_s21 + $0x100] ss:$16 sps:$4 sm:$0xff]  }
 0x20f   : > { %2809 = vmatprep.mubr.bf16.mxu1 %v8224_v42  ;;  %7337 = vmatpush3.bf16.msra.mxu1 %v8248_v44 }
 0x210   : > { %7338 = vmatprep.subr.bf16.mxu1 %v8262_v49 }
 0x211   : > { %7447 = vmatpush3.bf16.msra.mxu0 %v8233_v31 }
 0x212   : > { %7448 = vmatprep.subr.bf16.mxu0 %v8247_v22 }
 0x213   : > { %7339 = vmatpush3.bf16.msra.mxu1 %v8264_v56 }
 0x214   : > { %2963 = vmatmul.mubr.bf16.gmra.mrb[84].mxu0 %v8223_v41  ;;  %7340 = vmatprep.subr.bf16.mxu1 %v8278_v58  ;;  %v8282_v58 = vld [vmem:[%s9416_s21 + $0x124] ss:$16 sps:$4 sm:$0xff]  }
 0x215   : > { %2970 = vmatprep.mubr.bf16.mxu0 %v8226_v43  ;;  %7449 = vmatpush3.bf16.msra.mxu0 %v8249_v48  ;;  %v8277_v43 = vld [vmem:[%s9416_s21 + $0x108] ss:$16 sps:$4 sm:$0xff]  }
 0x216   : > { %7450 = vmatprep.subr.bf16.mxu0 %v8263_v50  ;;  %2810 = vmatmul.mubr.bf16.gmra.mrb[88].mxu1 %v8228_v63 }
 0x217   : > { %2817 = vmatprep.mubr.bf16.mxu1 %v8234_v3  ;;  %7341 = vmatpush3.bf16.msra.mxu1 %v8280_v53  ;;  %v8286_v53 = vld [vmem:[%s9416_s21 + $0x120] ss:$16 sps:$4 sm:$0xff]  }
 0x218   : > { %7342 = vmatprep.subr.bf16.mxu1 %v8294_v0 }
 0x219   : > { %7451 = vmatpush3.bf16.msra.mxu0 %v8265_v18 }
 0x21a   : > { %7452 = vmatprep.subr.bf16.mxu0 %v8279_v60  ;;  %v8284_v60 = vld [vmem:[%s9416_s21 + $0x12c] ss:$16 sps:$4 sm:$0xff]  }
 0x21b   : > { %7343 = vmatpush3.bf16.msra.mxu1 %v8296_v59 }
 0x21c   : > { %2971 = vmatmul.mubr.bf16.gmra.mrb[88].mxu0 %v8229_v2  ;;  %7344 = vmatprep.subr.bf16.mxu1 %v8310_v9 }
 0x21d   : > { %2978 = vmatprep.mubr.bf16.mxu0 %v8236_v11  ;;  %7453 = vmatpush3.bf16.msra.mxu0 %v8281_v55 }
 0x21e   : > { %7454 = vmatprep.subr.bf16.mxu0 %v8295_v57  ;;  %2818 = vmatmul.mubr.bf16.gmra.mrb[92].mxu1 %v8238_v62  ;;  %v8287_v57 = vld [vmem:[%s9416_s21 + $0x128] ss:$16 sps:$4 sm:$0xff]  }
 0x21f   : > { %2825 = vmatprep.mubr.bf16.mxu1 %v8240_v6  ;;  %7345 = vmatpush3.bf16.msra.mxu1 %v8312_v16  ;;  %v8288_v6 = vld [vmem:[%s9416_s21 + $0x144] ss:$16 sps:$4 sm:$0xff]  }
 0x220   : > { %7346 = vmatprep.subr.bf16.mxu1 %v8326_v10 }
 0x221   : > { %7455 = vmatpush3.bf16.msra.mxu0 %v8297_v4 }
 0x222   : > { %7456 = vmatprep.subr.bf16.mxu0 %v8311_v24 }
 0x223   : > { %7347 = vmatpush3.bf16.msra.mxu1 %v8328_v29  ;;  %v8292_v29 = vld [vmem:[%s9416_s21 + $0x140] ss:$16 sps:$4 sm:$0xff]  }
 0x224   : > { %2979 = vmatmul.mubr.bf16.gmra.mrb[92].mxu0 %v8239_v1  ;;  %7556 = vmatprep.subr.bf16.mxu1 %v8342_v40 }
 0x225   : > { %2986 = vmatprep.mubr.bf16.mxu0 %v8242_v14  ;;  %7457 = vmatpush3.bf16.msra.mxu0 %v8313_v7  ;;  %v8290_v14 = vld [vmem:[%s9416_s21 + $0x14c] ss:$16 sps:$4 sm:$0xff]  }
 0x226   : > { %7458 = vmatprep.subr.bf16.mxu0 %v8327_v28  ;;  %2826 = vmatmul.mubr.bf16.gmra.mrb[96].mxu1 %v8244_v45 }
 0x227   : > { %2833 = vmatprep.mubr.bf16.mxu1 %v8250_v52 }
 0x229   : > { %7459 = vmatpush3.bf16.msra.mxu0 %v8329_v35  ;;  %v8293_v35 = vld [vmem:[%s9416_s21 + $0x148] ss:$16 sps:$4 sm:$0xff]  }
 0x22a   : > { %7668 = vmatprep.subr.bf16.mxu0 %v8343_v51 }
 0x22c   : > { %2987 = vmatmul.mubr.bf16.gmra.mrb[96].mxu0 %v8245_v46 }
 0x22d   : > { %2994 = vmatprep.mubr.bf16.mxu0 %v8252_v19 }
 0x22e   : > { %2834 = vmatmul.mubr.bf16.gmra.mrb[100].mxu1 %v8254_v30 }
 0x22f   : > { %2841 = vmatprep.mubr.bf16.mxu1 %v8256_v38  ;;  %v8298_v38 = vld [vmem:[%s9416_s21 + $0x164] ss:$16 sps:$4 sm:$0xff]  }
 0x234   : > { %2995 = vmatmul.mubr.bf16.gmra.mrb[100].mxu0 %v8255_v37 }
 0x235   : > { %3002 = vmatprep.mubr.bf16.mxu0 %v8258_v47  ;;  %v8300_v47 = vld [vmem:[%s9416_s21 + $0x16c] ss:$16 sps:$4 sm:$0xff]  }
 0x236   : > { %2842 = vmatmul.mubr.bf16.gmra.mrb[104].mxu1 %v8260_v13 }
 0x237   : > { %2849 = vmatprep.mubr.bf16.mxu1 %v8266_v17  ;;  %v6876_v61 = vpop.f32.mrb[0].mxu0  ;;  %v6948_v5 = vpop.f32.mrb[0].mxu1 }
 0x238   : > { %v6877_v8 = vpop.f32.mrb[1].mxu0  ;;  %v6949_v15 = vpop.f32.mrb[1].mxu1 }
 0x239   : > { %v10860_v26 = vadd.f32 %v6877_v8, %v6876_v61  ;;  %v10862_v27 = vadd.f32 %v6949_v15, %v6948_v5  ;;  %v6879_v20 = vpop.f32.mrb[2].mxu0  ;;  %v6951_v21 = vpop.f32.mrb[2].mxu1  ;;  %v8302_v5 = vld [vmem:[%s9416_s21 + $0x160] ss:$16 sps:$4 sm:$0xff]   ;;  %v8303_v15 = vld [vmem:[%s9416_s21 + $0x168] ss:$16 sps:$4 sm:$0xff]  }
 0x23a   : > { %v6880_v33 = vpop.f32.mrb[3].mxu0  ;;  %v6952_v31 = vpop.f32.mrb[3].mxu1 }
 0x23b   : > { %v10866_v34 = vadd.f32 %v6880_v33, %v6879_v20  ;;  %v10868_v22 = vadd.f32 %v6952_v31, %v6951_v21  ;;  %v8304_v33 = vld [vmem:[%s9416_s21 + $0x184] ss:$16 sps:$4 sm:$0xff]   ;;  %v8306_v31 = vld [vmem:[%s9416_s21 + $0x18c] ss:$16 sps:$4 sm:$0xff]  }
 0x23c   : > { %3003 = vmatmul.mubr.bf16.gmra.mrb[104].mxu0 %v8261_v23 }
 0x23d   : > { %3010 = vmatprep.mubr.bf16.mxu0 %v8268_v39 }
 0x23e   : > { %2850 = vmatmul.mubr.bf16.gmra.mrb[108].mxu1 %v8270_v54 }
 0x23f   : > { %2857 = vmatprep.mubr.bf16.mxu1 %v8272_v25  ;;  %v6882_v41 = vpop.f32.mrb[4].mxu0  ;;  %v6954_v42 = vpop.f32.mrb[4].mxu1 }
 0x240   : > { %v6883_v44 = vpop.f32.mrb[5].mxu0  ;;  %v6955_v48 = vpop.f32.mrb[5].mxu1 }
 0x241   : > { %v10872_v49 = vadd.f32 %v6883_v44, %v6882_v41  ;;  %v10874_v50 = vadd.f32 %v6955_v48, %v6954_v42  ;;  %v6885_v56 = vpop.f32.mrb[6].mxu0  ;;  %v6957_v18 = vpop.f32.mrb[6].mxu1 }
 0x242   : > { %v6886_v63 = vpop.f32.mrb[7].mxu0  ;;  %v6958_v2 = vpop.f32.mrb[7].mxu1 }
 0x243   : > { %v10878_v3 = vadd.f32 %v6886_v63, %v6885_v56  ;;  %v10880_v11 = vadd.f32 %v6958_v2, %v6957_v18  ;;  %v8308_v56 = vld [vmem:[%s9416_s21 + $0x180] ss:$16 sps:$4 sm:$0xff]   ;;  %v8309_v2 = vld [vmem:[%s9416_s21 + $0x188] ss:$16 sps:$4 sm:$0xff]  }
 0x244   : > { %3011 = vmatmul.mubr.bf16.gmra.mrb[108].mxu0 %v8271_v12 }
 0x245   : > { %3018 = vmatprep.mubr.bf16.mxu0 %v8274_v32 }
 0x246   : > { %2858 = vmatmul.mubr.bf16.gmra.mrb[112].mxu1 %v8276_v36 }
 0x247   : > { %2865 = vmatprep.mubr.bf16.mxu1 %v8282_v58  ;;  %v6888_v55 = vpop.f32.mrb[8].mxu0  ;;  %v6960_v0 = vpop.f32.mrb[8].mxu1 }
 0x248   : > { %v6889_v59 = vpop.f32.mrb[9].mxu0  ;;  %v6961_v4 = vpop.f32.mrb[9].mxu1 }
 0x249   : > { %v10884_v9 = vadd.f32 %v6889_v59, %v6888_v55  ;;  %v10886_v62 = vadd.f32 %v6961_v4, %v6960_v0  ;;  %v6891_v1 = vpop.f32.mrb[10].mxu0  ;;  %v6963_v24 = vpop.f32.mrb[10].mxu1  ;;  %v8316_v59 = vld [vmem:[%s9416_s21 + $0x1ac] ss:$16 sps:$4 sm:$0xff]  }
 0x24a   : > { %v6892_v16 = vpop.f32.mrb[11].mxu0  ;;  %v6964_v7 = vpop.f32.mrb[11].mxu1 }
 0x24b   : > { %v10890_v10 = vadd.f32 %v6892_v16, %v6891_v1  ;;  %v10892_v28 = vadd.f32 %v6964_v7, %v6963_v24 }
 0x24c   : > { %3019 = vmatmul.mubr.bf16.gmra.mrb[112].mxu0 %v8277_v43 }
 0x24d   : > { %3026 = vmatprep.mubr.bf16.mxu0 %v8284_v60 }
 0x24e   : > { %2866 = vmatmul.mubr.bf16.gmra.mrb[116].mxu1 %v8286_v53 }
 0x24f   : > { %2873 = vmatprep.mubr.bf16.mxu1 %v8288_v6  ;;  %v6894_v40 = vpop.f32.mrb[12].mxu0  ;;  %v6966_v45 = vpop.f32.mrb[12].mxu1 }
 0x250   : > { %v6895_v46 = vpop.f32.mrb[13].mxu0  ;;  %v6967_v51 = vpop.f32.mrb[13].mxu1 }
 0x251   : > { %v10896_v52 = vadd.f32 %v6895_v46, %v6894_v40  ;;  %v10898_v19 = vadd.f32 %v6967_v51, %v6966_v45  ;;  %v6897_v30 = vpop.f32.mrb[14].mxu0  ;;  %v6969_v37 = vpop.f32.mrb[14].mxu1  ;;  %v8318_v40 = vld [vmem:[%s9416_s21 + $0x1a0] ss:$16 sps:$4 sm:$0xff]   ;;  %v8319_v45 = vld [vmem:[%s9416_s21 + $0x1a8] ss:$16 sps:$4 sm:$0xff]  }
 0x252   : > { %v6898_v13 = vpop.f32.mrb[15].mxu0  ;;  %v6970_v23 = vpop.f32.mrb[15].mxu1 }
 0x253   : > { %v10902_v17 = vadd.f32 %v6898_v13, %v6897_v30  ;;  %v10904_v39 = vadd.f32 %v6970_v23, %v6969_v37  ;;  %v8320_v37 = vld [vmem:[%s9416_s21 + $0x1c4] ss:$16 sps:$4 sm:$0xff]  }
 0x254   : > { %3027 = vmatmul.mubr.bf16.gmra.mrb[116].mxu0 %v8287_v57  ;;  %v8314_v57 = vld [vmem:[%s9416_s21 + $0x1a4] ss:$16 sps:$4 sm:$0xff]  }
 0x255   : > { %3034 = vmatprep.mubr.bf16.mxu0 %v8290_v14 }
 0x256   : > { %2874 = vmatmul.mubr.bf16.gmra.mrb[120].mxu1 %v8292_v29 }
 0x257   : > { %2881 = vmatprep.mubr.bf16.mxu1 %v8298_v38  ;;  %v6900_v54 = vpop.f32.mrb[16].mxu0  ;;  %v6988_v61 = vpop.f32.mrb[16].mxu1  ;;  %v8322_v38 = vld [vmem:[%s9416_s21 + $0x1cc] ss:$16 sps:$4 sm:$0xff]  }
 0x258   : > { %v6901_v12 = vpop.f32.mrb[17].mxu0  ;;  %v6989_v8 = vpop.f32.mrb[17].mxu1 }
 0x259   : > { %v10908_v20 = vadd.f32 %v6901_v12, %v6900_v54  ;;  %v6990_v21 = vadd.f32 %v6989_v8, %v6988_v61  ;;  %v6903_v25 = vpop.f32.mrb[18].mxu0  ;;  %v6991_v32 = vpop.f32.mrb[18].mxu1 }
 0x25a   : > { %v6904_v36 = vpop.f32.mrb[19].mxu0  ;;  %v6992_v41 = vpop.f32.mrb[19].mxu1 }
 0x25b   : > { %v10912_v42 = vadd.f32 %v6904_v36, %v6903_v25  ;;  %v6993_v43 = vadd.f32 %v6992_v41, %v6991_v32  ;;  %v10915_v44 = vadd.f32 %v6990_v21, %v10860_v26  ;;  %v8324_v21 = vld [vmem:[%s9416_s21 + $0x1c0] ss:$16 sps:$4 sm:$0xff]   ;;  %v8325_v25 = vld [vmem:[%s9416_s21 + $0x1c8] ss:$16 sps:$4 sm:$0xff]   ;;  %v8330_v36 = vld [vmem:[%s9416_s21 + $0x1e4] ss:$16 sps:$4 sm:$0xff]  }
 0x25c   : > { %3035 = vmatmul.mubr.bf16.gmra.mrb[120].mxu0 %v8293_v35  ;;  %v8332_v41 = vld [vmem:[%s9416_s21 + $0x1ec] ss:$16 sps:$4 sm:$0xff]  }
 0x25d   : > { %3042 = vmatprep.mubr.bf16.mxu0 %v8300_v47  ;;  %v10918_v48 = vadd.f32 %v6993_v43, %v10866_v34 }
 0x25e   : > { %2882 = vmatmul.mubr.bf16.gmra.mrb[124].mxu1 %v8302_v5 }
 0x25f   : > { %2889 = vmatprep.mubr.bf16.mxu1 %v8304_v33  ;;  %v6906_v18 = vpop.f32.mrb[20].mxu0 }
 0x260   : > { %v6907_v60 = vpop.f32.mrb[21].mxu0 }
 0x261   : > { %v6994_v58 = vpop.f32.mrb[20].mxu1  ;;  %v10922_v53 = vadd.f32 %v6907_v60, %v6906_v18  ;;  %v6909_v26 = vpop.f32.mrb[22].mxu0 }
 0x262   : > { %v6995_v63 = vpop.f32.mrb[21].mxu1  ;;  %v6910_v4 = vpop.f32.mrb[23].mxu0 }
 0x263   : > { %v6996_v55 = vadd.f32 %v6995_v63, %v6994_v58  ;;  %v6997_v0 = vpop.f32.mrb[22].mxu1  ;;  %v10926_v24 = vadd.f32 %v6910_v4, %v6909_v26 }
 0x264   : > { %3043 = vmatmul.mubr.bf16.gmra.mrb[124].mxu0 %v8303_v15  ;;  %v6998_v1 = vpop.f32.mrb[23].mxu1 }
 0x265   : > { %3050 = vmatprep.mubr.bf16.mxu0 %v8306_v31  ;;  %v6999_v34 = vadd.f32 %v6998_v1, %v6997_v0  ;;  %v10929_v6 = vadd.f32 %v6996_v55, %v10872_v49  ;;  %v8334_v0 = vld [vmem:[%s9416_s21 + $0x1e0] ss:$16 sps:$4 sm:$0xff]  }
 0x266   : > { %2890 = vmatmul.mubr.bf16.gmra.mrb[128].mxu1 %v8308_v56 }
 0x267   : > { %2897 = vmatprep.mubr.bf16.mxu1 %v8314_v57  ;;  %v10932_v14 = vadd.f32 %v6999_v34, %v10878_v3  ;;  %v6912_v16 = vpop.f32.mrb[24].mxu0  ;;  %v8335_v57 = vld [vmem:[%s9416_s21 + $0x1e8] ss:$16 sps:$4 sm:$0xff]   ;;  %v8338_v34 = vld [vmem:[%s9416_s21 + $0x204] ss:$16 sps:$4 sm:$0xff]  }
 0x268   : > { %v6913_v29 = vpop.f32.mrb[25].mxu0 }
 0x269   : > { %v7000_v7 = vpop.f32.mrb[24].mxu1  ;;  %v10936_v46 = vadd.f32 %v6913_v29, %v6912_v16  ;;  %v6915_v49 = vpop.f32.mrb[26].mxu0  ;;  %v8341_v16 = vld [vmem:[%s9416_s21 + $0x20c] ss:$16 sps:$4 sm:$0xff]  }
 0x26a   : > { %v7001_v35 = vpop.f32.mrb[25].mxu1  ;;  %v6916_v47 = vpop.f32.mrb[27].mxu0 }
 0x26b   : > { %v7002_v51 = vadd.f32 %v7001_v35, %v7000_v7  ;;  %v7003_v30 = vpop.f32.mrb[26].mxu1  ;;  %v10940_v23 = vadd.f32 %v6916_v47, %v6915_v49  ;;  %v8339_v47 = vld [vmem:[%s9416_s21 + $0x208] ss:$16 sps:$4 sm:$0xff]  }
 0x26c   : > { %3051 = vmatmul.mubr.bf16.gmra.mrb[128].mxu0 %v8309_v2  ;;  %v7004_v13 = vpop.f32.mrb[27].mxu1 }
 0x26d   : > { %3058 = vmatprep.mubr.bf16.mxu0 %v8316_v59  ;;  %v7005_v3 = vadd.f32 %v7004_v13, %v7003_v30  ;;  %v10943_v54 = vadd.f32 %v7002_v51, %v10884_v9 }
 0x26e   : > { %2898 = vmatmul.mubr.bf16.gmra.mrb[132].mxu1 %v8318_v40 }
 0x26f   : > { %2905 = vmatprep.mubr.bf16.mxu1 %v8320_v37  ;;  %v10946_v61 = vadd.f32 %v7005_v3, %v10890_v10  ;;  %v6918_v5 = vpop.f32.mrb[28].mxu0 }
 0x270   : > { %v6919_v8 = vpop.f32.mrb[29].mxu0 }
 0x271   : > { %v7006_v12 = vpop.f32.mrb[28].mxu1  ;;  %v10950_v32 = vadd.f32 %v6919_v8, %v6918_v5  ;;  %v6921_v9 = vpop.f32.mrb[30].mxu0  ;;  %v8345_v8 = vld [vmem:[#allocation8 + $0x280] sm:$0xff]  }
 0x272   : > { %v7007_v15 = vpop.f32.mrb[29].mxu1  ;;  %v6922_v43 = vpop.f32.mrb[31].mxu0 }
 0x273   : > { %v7008_v33 = vadd.f32 %v7007_v15, %v7006_v12  ;;  %v7009_v31 = vpop.f32.mrb[30].mxu1  ;;  %v10954_v18 = vadd.f32 %v6922_v43, %v6921_v9  ;;  %v8344_v12 = vld [vmem:[#allocation8 + $0x200] sm:$0xff]   ;;  %v8360_v43 = vld [vmem:[#allocation8 + $0x208] sm:$0xff]  }
 0x274   : > { %3059 = vmatmul.mubr.bf16.gmra.mrb[132].mxu0 %v8319_v45  ;;  %v7010_v56 = vpop.f32.mrb[31].mxu1 }
 0x275   : > { %3066 = vmatprep.mubr.bf16.mxu0 %v8322_v38  ;;  %v7011_v10 = vadd.f32 %v7010_v56, %v7009_v31  ;;  %v10957_v58 = vadd.f32 %v7008_v33, %v10896_v52  ;;  %v8336_v38 = vld [vmem:[%s9416_s21 + $0x200] ss:$16 sps:$4 sm:$0xff]   ;;  %v8348_v33 = vld [vmem:[%s9416_s21 + $0x22c] ss:$16 sps:$4 sm:$0xff]  }
 0x276   : > { %2906 = vmatmul.mubr.bf16.gmra.mrb[136].mxu1 %v8324_v21  ;;  %v8358_v31 = vld [vmem:[#allocation8 + $0x248] sm:$0xff]  }
 0x277   : > { %2913 = vmatprep.mubr.bf16.mxu1 %v8330_v36  ;;  %v10960_v60 = vadd.f32 %v7011_v10, %v10902_v17  ;;  %v8359_v36 = vld [vmem:[#allocation8 + $0x2c8] sm:$0xff]  }
 0x278   : > { %v8361_v56 = vld [vmem:[#allocation8 + $0x288] sm:$0xff]  }
 0x279   : > { %v7012_v2 = vpop.f32.mrb[32].mxu1 }
 0x27a   : > { %v7013_v26 = vpop.f32.mrb[33].mxu1 }
 0x27b   : > { %v7014_v4 = vadd.f32 %v7013_v26, %v7012_v2  ;;  %v7015_v1 = vpop.f32.mrb[34].mxu1  ;;  %v8375_v2 = vld [vmem:[#allocation8 + $0x2d0] sm:$0xff]  }
 0x27c   : > { %3067 = vmatmul.mubr.bf16.gmra.mrb[136].mxu0 %v8325_v25  ;;  %v7016_v29 = vpop.f32.mrb[35].mxu1  ;;  %v8346_v25 = vld [vmem:[%s9416_s21 + $0x224] ss:$16 sps:$4 sm:$0xff]  }
 0x27d   : > { %3074 = vmatprep.mubr.bf16.mxu0 %v8332_v41  ;;  %v7017_v17 = vadd.f32 %v7016_v29, %v7015_v1  ;;  %v10971_v40 = vadd.f32 %v7014_v4, %v10908_v20  ;;  %v8351_v4 = vld [vmem:[%s9416_s21 + $0x228] ss:$16 sps:$4 sm:$0xff]  }
 0x27e   : > { %v6924_v63 = vpop.f32.mrb[32].mxu0  ;;  %2914 = vmatmul.mubr.bf16.gmra.mrb[140].mxu1 %v8334_v0 }
 0x27f   : > { %v6925_v55 = vpop.f32.mrb[33].mxu0  ;;  %3789 = vmatprep.mubr.bf16.mxu1 %v8338_v34  ;;  %v10974_v45 = vadd.f32 %v7017_v17, %v10912_v42 }
 0x280   : > { %v10964_v59 = vadd.f32 %v6925_v55, %v6924_v63  ;;  %v6927_v52 = vpop.f32.mrb[34].mxu0  ;;  %v8374_v63 = vld [vmem:[#allocation8 + $0x250] sm:$0xff]  }
 0x281   : > { %v6928_v7 = vpop.f32.mrb[35].mxu0  ;;  %v7018_v49 = vpop.f32.mrb[36].mxu1 }
 0x282   : > { %v10968_v35 = vadd.f32 %v6928_v7, %v6927_v52  ;;  %v7019_v37 = vpop.f32.mrb[37].mxu1  ;;  %v8354_v7 = vld [vmem:[%s9416_s21 + $0x24c] ss:$16 sps:$4 sm:$0xff]  }
 0x283   : > { %v7020_v3 = vadd.f32 %v7019_v37, %v7018_v49  ;;  %v7021_v5 = vpop.f32.mrb[38].mxu1  ;;  %v8377_v49 = vld [vmem:[#allocation8 + $0x290] sm:$0xff]  }
 0x284   : > { %3075 = vmatmul.mubr.bf16.gmra.mrb[140].mxu0 %v8335_v57  ;;  %v7022_v21 = vpop.f32.mrb[39].mxu1  ;;  %v8350_v57 = vld [vmem:[%s9416_s21 + $0x220] ss:$16 sps:$4 sm:$0xff]  }
 0x285   : > { %3950 = vmatprep.mubr.bf16.mxu0 %v8341_v16  ;;  %v7023_v9 = vadd.f32 %v7022_v21, %v7021_v5  ;;  %v10985_v41 = vadd.f32 %v7020_v3, %v10922_v53  ;;  %v8352_v16 = vld [vmem:[%s9416_s21 + $0x244] ss:$16 sps:$4 sm:$0xff]   ;;  %v8391_v3 = vld [vmem:[#allocation8 + $0x2d8] sm:$0xff]  }
 0x286   : > { %3790 = vmatmul.mubr.bf16.vlgmr.msra.gmra.mrb[144].mxu1 %v8336_v38  ;;  %v8392_v5 = vld [vmem:[#allocation8 + $0x218] sm:$0xff]   ;;  %v8407_v21 = vld [vmem:[#allocation8 + $0x2e0] sm:$0xff]  }
 0x287   : > { %v6930_v51 = vpop.f32.mrb[36].mxu0  ;;  %7557 = vmatpush3.bf16.msra.mxu1 %v8344_v12  ;;  %v10988_v10 = vadd.f32 %v7023_v9, %v10926_v24  ;;  %3797 = vmatprep.mubr.bf16.mxu1 %v8346_v25  ;;  %v8393_v12 = vld [vmem:[#allocation8 + $0x298] sm:$0xff]   ;;  %v8356_v9 = vld [vmem:[%s9416_s21 + $0x240] ss:$16 sps:$4 sm:$0xff]  }
 0x288   : > { %v6931_v30 = vpop.f32.mrb[37].mxu0  ;;  %7558 = vmatprep.subr.bf16.mxu1 %v8358_v31  ;;  %v8357_v31 = vld [vmem:[%s9416_s21 + $0x248] ss:$16 sps:$4 sm:$0xff]  }
 0x289   : > { %v10978_v13 = vadd.f32 %v6931_v30, %v6930_v51  ;;  %v6933_v20 = vpop.f32.mrb[38].mxu0  ;;  %v7024_v53 = vpop.f32.mrb[40].mxu1  ;;  %v8376_v51 = vld [vmem:[#allocation8 + $0x210] sm:$0xff]  }
 0x28a   : > { %v6934_v15 = vpop.f32.mrb[39].mxu0  ;;  %v7025_v0 = vpop.f32.mrb[41].mxu1 }
 0x28b   : > { %v10982_v42 = vadd.f32 %v6934_v15, %v6933_v20  ;;  %v7026_v1 = vadd.f32 %v7025_v0, %v7024_v53  ;;  %v7027_v24 = vpop.f32.mrb[42].mxu1  ;;  %7559 = vmatpush3.bf16.msra.mxu1 %v8360_v43  ;;  %v8406_v15 = vld [vmem:[#allocation8 + $0x260] sm:$0xff]  }
 0x28c   : > { %3951 = vmatmul.mubr.bf16.vlgmr.msra.gmra.mrb[144].mxu0 %v8339_v47  ;;  %v7028_v17 = vpop.f32.mrb[43].mxu1  ;;  %7560 = vmatprep.subr.bf16.mxu1 %v8374_v63  ;;  %v8390_v47 = vld [vmem:[#allocation8 + $0x258] sm:$0xff]   ;;  %v8362_v63 = vld [vmem:[%s9416_s21 + $0x264] ss:$16 sps:$4 sm:$0xff]  }
 0x28d   : > { %7669 = vmatpush3.bf16.msra.mxu0 %v8345_v8  ;;  %3958 = vmatprep.mubr.bf16.mxu0 %v8348_v33  ;;  %v7029_v37 = vadd.f32 %v7028_v17, %v7027_v24  ;;  %v10999_v38 = vadd.f32 %v7026_v1, %v10936_v46  ;;  %v8409_v0 = vld [vmem:[#allocation8 + $0x2a0] sm:$0xff]   ;;  %v8423_v24 = vld [vmem:[#allocation8 + $0x2e8] sm:$0xff]  }
 0x28e   : > { %7670 = vmatprep.subr.bf16.mxu0 %v8359_v36  ;;  %3798 = vmatmul.mubr.bf16.gmra.mrb[148].mxu1 %v8350_v57 }
 0x28f   : > { %v6936_v55 = vpop.f32.mrb[40].mxu0  ;;  %3805 = vmatprep.mubr.bf16.mxu1 %v8352_v16  ;;  %v11002_v20 = vadd.f32 %v7029_v37, %v10940_v23  ;;  %7561 = vmatpush3.bf16.msra.mxu1 %v8376_v51  ;;  %v8438_v51 = vld [vmem:[#allocation8 + $0x270] sm:$0xff]  }
 0x290   : > { %v6937_v26 = vpop.f32.mrb[41].mxu0  ;;  %7562 = vmatprep.subr.bf16.mxu1 %v8390_v47 }
 0x291   : > { %v10992_v52 = vadd.f32 %v6937_v26, %v6936_v55  ;;  %v6939_v34 = vpop.f32.mrb[42].mxu0  ;;  %7671 = vmatpush3.bf16.msra.mxu0 %v8361_v56  ;;  %v7030_v46 = vpop.f32.mrb[44].mxu1  ;;  %v8408_v26 = vld [vmem:[#allocation8 + $0x220] sm:$0xff]  }
 0x292   : > { %v6940_v29 = vpop.f32.mrb[43].mxu0  ;;  %7672 = vmatprep.subr.bf16.mxu0 %v8375_v2  ;;  %v7031_v33 = vpop.f32.mrb[45].mxu1  ;;  %v8364_v2 = vld [vmem:[%s9416_s21 + $0x26c] ss:$16 sps:$4 sm:$0xff]  }
 0x293   : > { %v10996_v30 = vadd.f32 %v6940_v29, %v6939_v34  ;;  %v7032_v23 = vadd.f32 %v7031_v33, %v7030_v46  ;;  %v7033_v56 = vpop.f32.mrb[46].mxu1  ;;  %7563 = vmatpush3.bf16.msra.mxu1 %v8392_v5  ;;  %v8422_v34 = vld [vmem:[#allocation8 + $0x268] sm:$0xff]  }
 0x294   : > { %3959 = vmatmul.mubr.bf16.gmra.mrb[148].mxu0 %v8351_v4  ;;  %v7034_v53 = vpop.f32.mrb[47].mxu1  ;;  %7564 = vmatprep.subr.bf16.mxu1 %v8406_v15  ;;  %v8425_v29 = vld [vmem:[#allocation8 + $0x2a8] sm:$0xff]   ;;  %v8368_v15 = vld [vmem:[%s9416_s21 + $0x284] ss:$16 sps:$4 sm:$0xff]  }
 0x295   : > { %3966 = vmatprep.mubr.bf16.mxu0 %v8354_v7  ;;  %7673 = vmatpush3.bf16.msra.mxu0 %v8377_v49  ;;  %v7035_v4 = vadd.f32 %v7034_v53, %v7033_v56  ;;  %v11013_v1 = vadd.f32 %v7032_v23, %v10950_v32  ;;  %v8424_v7 = vld [vmem:[#allocation8 + $0x228] sm:$0xff]   ;;  %v8441_v56 = vld [vmem:[#allocation8 + $0x2b0] sm:$0xff]   ;;  %v8457_v53 = vld [vmem:[#allocation8 + $0x2b8] sm:$0xff]  }
 0x296   : > { %7674 = vmatprep.subr.bf16.mxu0 %v8391_v3  ;;  %3806 = vmatmul.mubr.bf16.gmra.mrb[152].mxu1 %v8356_v9  ;;  %v8366_v3 = vld [vmem:[%s9416_s21 + $0x260] ss:$16 sps:$4 sm:$0xff]   ;;  %v8367_v5 = vld [vmem:[%s9416_s21 + $0x268] ss:$16 sps:$4 sm:$0xff]  }
 0x297   : > { %v6942_v8 = vpop.f32.mrb[44].mxu0  ;;  %3813 = vmatprep.mubr.bf16.mxu1 %v8362_v63  ;;  %v11016_v16 = vadd.f32 %v7035_v4, %v10954_v18  ;;  %7565 = vmatpush3.bf16.msra.mxu1 %v8408_v26  ;;  %v8454_v63 = vld [vmem:[#allocation8 + $0x278] sm:$0xff]  }
 0x298   : > { %v6943_v25 = vpop.f32.mrb[45].mxu0  ;;  %7566 = vmatprep.subr.bf16.mxu1 %v8422_v34  ;;  %v8372_v34 = vld [vmem:[%s9416_s21 + $0x280] ss:$16 sps:$4 sm:$0xff]  }
 0x299   : > { %v11006_v36 = vadd.f32 %v6943_v25, %v6942_v8  ;;  %v6945_v43 = vpop.f32.mrb[46].mxu0  ;;  %7675 = vmatpush3.bf16.msra.mxu0 %v8393_v12  ;;  %v7036_v32 = vpop.f32.mrb[48].mxu1 }
 0x29a   : > { %v6946_v55 = vpop.f32.mrb[47].mxu0  ;;  %7676 = vmatprep.subr.bf16.mxu0 %v8407_v21  ;;  %v7037_v37 = vpop.f32.mrb[49].mxu1  ;;  %v8370_v21 = vld [vmem:[%s9416_s21 + $0x28c] ss:$16 sps:$4 sm:$0xff]  }
 0x29b   : > { %v11010_v57 = vadd.f32 %v6946_v55, %v6945_v43  ;;  %v7038_v18 = vadd.f32 %v7037_v37, %v7036_v32  ;;  %v7039_v8 = vpop.f32.mrb[50].mxu1  ;;  %7567 = vmatpush3.bf16.msra.mxu1 %v8424_v7 }
 0x29c   : > { %3967 = vmatmul.mubr.bf16.gmra.mrb[152].mxu0 %v8357_v31  ;;  %v7040_v33 = vpop.f32.mrb[51].mxu1  ;;  %v8440_v31 = vld [vmem:[#allocation8 + $0x230] sm:$0xff]   ;;  %7568 = vmatprep.subr.bf16.mxu1 %v8438_v51  ;;  %v8380_v51 = vld [vmem:[%s9416_s21 + $0x2ac] ss:$16 sps:$4 sm:$0xff]  }
 0x29d   : > { %3974 = vmatprep.mubr.bf16.mxu0 %v8364_v2  ;;  %7677 = vmatpush3.bf16.msra.mxu0 %v8409_v0  ;;  %v7041_v23 = vadd.f32 %v7040_v33, %v7039_v8  ;;  %v8383_v33 = vld [vmem:[%s9416_s21 + $0x2a8] ss:$16 sps:$4 sm:$0xff]  }
 0x29e   : > { %7678 = vmatprep.subr.bf16.mxu0 %v8423_v24  ;;  %3814 = vmatmul.mubr.bf16.gmra.mrb[156].mxu1 %v8366_v3  ;;  %v8373_v24 = vld [vmem:[%s9416_s21 + $0x288] ss:$16 sps:$4 sm:$0xff]  }
 0x29f   : > { %v7846_v17 = vpop.f32.mrb[48].mxu0  ;;  %3821 = vmatprep.mubr.bf16.mxu1 %v8368_v15  ;;  %v11038_v2 = vadd.f32 %v7041_v23, %v10968_v35  ;;  %7569 = vmatpush3.bf16.msra.mxu1 %v8440_v31  ;;  %v8384_v23 = vld [vmem:[%s9416_s21 + $0x2c4] ss:$16 sps:$4 sm:$0xff]  }
 0x2a0   : > { %v11019_v49 = vadd.f32 %v7846_v17, %v10929_v6  ;;  %v1962_v47 = vpop.f32.mrb[49].mxu0  ;;  %v8439_v6 = vld [vmem:[#allocation8 + $0x2f0] sm:$0xff]   ;;  %7570 = vmatprep.subr.bf16.mxu1 %v8454_v63 }
 0x2a1   : > { %v11024_v12 = vadd.f32 %v1962_v47, %v10915_v44  ;;  %v7847_v46 = vpop.f32.mrb[50].mxu0  ;;  %7679 = vmatpush3.bf16.msra.mxu0 %v8425_v29  ;;  %v11035_v44 = vadd.f32 %v7038_v18, %v10964_v59  ;;  %v7042_v55 = vpop.f32.mrb[52].mxu1  ;;  %v8378_v17 = vld [vmem:[%s9416_s21 + $0x2a4] ss:$16 sps:$4 sm:$0xff]  }
 0x2a2   : > { %v11029_v25 = vadd.f32 %v7847_v46, %v10932_v14  ;;  %v1965_v9 = vpop.f32.mrb[51].mxu0  ;;  %v8455_v14 = vld [vmem:[#allocation8 + $0x2f8] sm:$0xff]   ;;  %7680 = vmatprep.subr.bf16.mxu0 %v8439_v6  ;;  %v7043_v0 = vpop.f32.mrb[53].mxu1 }
 0x2a3   : > { %v11032_v43 = vadd.f32 %v1965_v9, %v10918_v48  ;;  %v8456_v48 = vld [vmem:[#allocation8 + $0x238] sm:$0xff]   ;;  %v7044_v35 = vadd.f32 %v7043_v0, %v7042_v55  ;;  %v7045_v29 = vpop.f32.mrb[54].mxu1 }
 0x2a4   : > { %3975 = vmatmul.mubr.bf16.gmra.mrb[156].mxu0 %v8367_v5  ;;  %v7046_v47 = vpop.f32.mrb[55].mxu1  ;;  %7571 = vmatpush3.bf16.msra.mxu1 %v8456_v48 }
 0x2a5   : > { %3982 = vmatprep.mubr.bf16.mxu0 %v8370_v21  ;;  %7681 = vmatpush3.bf16.msra.mxu0 %v8441_v56  ;;  %v1874_v18 = vadd.f32 %v7044_v35, %v10978_v13  ;;  %v8386_v56 = vld [vmem:[%s9416_s21 + $0x2cc] ss:$16 sps:$4 sm:$0xff]  }
 0x2a6   : > { %7682 = vmatprep.subr.bf16.mxu0 %v8455_v14  ;;  %3822 = vmatmul.mubr.bf16.gmra.mrb[160].mxu1 %v8372_v34  ;;  %v8389_v34 = vld [vmem:[%s9416_s21 + $0x2c8] ss:$16 sps:$4 sm:$0xff]  }
 0x2a7   : > { %v7850_v59 = vpop.f32.mrb[52].mxu0  ;;  %3829 = vmatprep.mubr.bf16.mxu1 %v8378_v17  ;;  %v8396_v17 = vld [vmem:[%s9416_s21 + $0x2ec] ss:$16 sps:$4 sm:$0xff]  }
 0x2a8   : > { %v11041_v26 = vadd.f32 %v7850_v59, %v10957_v58  ;;  %v1978_v4 = vpop.f32.mrb[53].mxu0  ;;  %v7047_v58 = vadd.f32 %v7046_v47, %v7045_v29 }
 0x2a9   : > { %v11046_v7 = vadd.f32 %v1978_v4, %v10943_v54  ;;  %v7851_v32 = vpop.f32.mrb[54].mxu0  ;;  %7683 = vmatpush3.bf16.msra.mxu0 %v8457_v53 }
 0x2aa   : > { %v11051_v37 = vadd.f32 %v7851_v32, %v10960_v60  ;;  %v1981_v3 = vpop.f32.mrb[55].mxu0  ;;  %v1877_v54 = vadd.f32 %v7047_v58, %v10982_v42  ;;  %v7048_v60 = vpop.f32.mrb[56].mxu1  ;;  %v8394_v32 = vld [vmem:[%s9416_s21 + $0x2e4] ss:$16 sps:$4 sm:$0xff]  }
 0x2ab   : > { %v11054_v5 = vadd.f32 %v1981_v3, %v10946_v61  ;;  %v7049_v15 = vpop.f32.mrb[57].mxu1  ;;  %v8382_v61 = vld [vmem:[%s9416_s21 + $0x2a0] ss:$16 sps:$4 sm:$0xff]  }
 0x2ac   : > { %3983 = vmatmul.mubr.bf16.gmra.mrb[160].mxu0 %v8373_v24  ;;  %v7050_v9 = vadd.f32 %v7049_v15, %v7048_v60  ;;  %v7051_v6 = vpop.f32.mrb[58].mxu1 }
 0x2ad   : > { %3990 = vmatprep.mubr.bf16.mxu0 %v8380_v51  ;;  %v7052_v42 = vpop.f32.mrb[59].mxu1 }
 0x2ae   : > { %v7053_v14 = vadd.f32 %v7052_v42, %v7051_v6  ;;  %v1882_v55 = vadd.f32 %v7050_v9, %v10992_v52  ;;  %3830 = vmatmul.mubr.bf16.gmra.mrb[164].mxu1 %v8382_v61  ;;  %v8398_v61 = vld [vmem:[%s9416_s21 + $0x2e0] ss:$16 sps:$4 sm:$0xff]  }
 0x2af   : > { %v7854_v8 = vpop.f32.mrb[56].mxu0  ;;  %3837 = vmatprep.mubr.bf16.mxu1 %v8384_v23  ;;  %v8402_v23 = vld [vmem:[%s9416_s21 + $0x30c] ss:$16 sps:$4 sm:$0xff]  }
 0x2b0   : > { %v11059_v46 = vadd.f32 %v7854_v8, %v10985_v41  ;;  %v1994_v21 = vpop.f32.mrb[57].mxu0 }
 0x2b1   : > { %v11064_v13 = vadd.f32 %v1994_v21, %v10971_v40  ;;  %v7855_v31 = vpop.f32.mrb[58].mxu0  ;;  %v11076_v40 = vadd.f32 %v7053_v14, %v10996_v30 }
 0x2b2   : > { %v11069_v63 = vadd.f32 %v7855_v31, %v10988_v10  ;;  %v1997_v41 = vpop.f32.mrb[59].mxu0  ;;  %v7054_v10 = vpop.f32.mrb[60].mxu1  ;;  %v8400_v31 = vld [vmem:[%s9416_s21 + $0x304] ss:$16 sps:$4 sm:$0xff]  }
 0x2b3   : > { %v11072_v48 = vadd.f32 %v1997_v41, %v10974_v45  ;;  %v7055_v0 = vpop.f32.mrb[61].mxu1  ;;  %v8388_v45 = vld [vmem:[%s9416_s21 + $0x2c0] ss:$16 sps:$4 sm:$0xff]  }
 0x2b4   : > { %3991 = vmatmul.mubr.bf16.gmra.mrb[164].mxu0 %v8383_v33  ;;  %v7056_v24 = vadd.f32 %v7055_v0, %v7054_v10  ;;  %v7057_v35 = vpop.f32.mrb[62].mxu1  ;;  %v8399_v33 = vld [vmem:[%s9416_s21 + $0x2e8] ss:$16 sps:$4 sm:$0xff]  }
 0x2b5   : > { %3998 = vmatprep.mubr.bf16.mxu0 %v8386_v56  ;;  %v7058_v51 = vpop.f32.mrb[63].mxu1 }
 0x2b6   : > { %v7059_v47 = vadd.f32 %v7058_v51, %v7057_v35  ;;  %v1890_v58 = vadd.f32 %v7056_v24, %v11006_v36  ;;  %3838 = vmatmul.mubr.bf16.gmra.mrb[168].mxu1 %v8388_v45  ;;  %v8404_v45 = vld [vmem:[%s9416_s21 + $0x300] ss:$16 sps:$4 sm:$0xff]  }
 0x2b7   : > { %v7858_v59 = vpop.f32.mrb[60].mxu0  ;;  %3845 = vmatprep.mubr.bf16.mxu1 %v8394_v32  ;;  %v8412_v32 = vld [vmem:[%s9416_s21 + $0x32c] ss:$16 sps:$4 sm:$0xff]  }
 0x2b8   : > { %v11079_v53 = vadd.f32 %v7858_v59, %v11013_v1  ;;  %v2010_v4 = vpop.f32.mrb[61].mxu0 }
 0x2b9   : > { %v11084_v52 = vadd.f32 %v2010_v4, %v10999_v38  ;;  %v7859_v29 = vpop.f32.mrb[62].mxu0  ;;  %v1893_v38 = vadd.f32 %v7059_v47, %v11010_v57 }
 0x2ba   : > { %v11089_v30 = vadd.f32 %v7859_v29, %v11016_v16  ;;  %v2013_v1 = vpop.f32.mrb[63].mxu0  ;;  %v7060_v16 = vpop.f32.mrb[64].mxu1  ;;  %v8410_v29 = vld [vmem:[%s9416_s21 + $0x324] ss:$16 sps:$4 sm:$0xff]  }
 0x2bb   : > { %v11092_v3 = vadd.f32 %v2013_v1, %v11002_v20  ;;  %v7061_v15 = vpop.f32.mrb[65].mxu1 }
 0x2bc   : > { %3999 = vmatmul.mubr.bf16.gmra.mrb[168].mxu0 %v8389_v34  ;;  %v7062_v20 = vadd.f32 %v7061_v15, %v7060_v16  ;;  %v7063_v36 = vpop.f32.mrb[66].mxu1  ;;  %v8405_v34 = vld [vmem:[%s9416_s21 + $0x308] ss:$16 sps:$4 sm:$0xff]  }
 0x2bd   : > { %4006 = vmatprep.mubr.bf16.mxu0 %v8396_v17  ;;  %v7064_v57 = vpop.f32.mrb[67].mxu1 }
 0x2be   : > { %v1898_v14 = vadd.f32 %v7062_v20, %v10862_v27  ;;  %3846 = vmatmul.mubr.bf16.gmra.mrb[172].mxu1 %v8398_v61  ;;  %v8414_v61 = vld [vmem:[%s9416_s21 + $0x320] ss:$16 sps:$4 sm:$0xff]  }
 0x2bf   : > { %v7862_v60 = vpop.f32.mrb[64].mxu0  ;;  %3853 = vmatprep.mubr.bf16.mxu1 %v8400_v31  ;;  %v8418_v31 = vld [vmem:[%s9416_s21 + $0x34c] ss:$16 sps:$4 sm:$0xff]  }
 0x2c0   : > { %v11096_v8 = vadd.f32 %v7862_v60, %v1874_v18  ;;  %v2026_v21 = vpop.f32.mrb[65].mxu0  ;;  %v7065_v18 = vadd.f32 %v7064_v57, %v7063_v36 }
 0x2c1   : > { %v11101_v9 = vadd.f32 %v2026_v21, %v11035_v44  ;;  %v7863_v6 = vpop.f32.mrb[66].mxu0 }
 0x2c2   : > { %v11105_v56 = vadd.f32 %v7863_v6, %v1877_v54  ;;  %v2029_v42 = vpop.f32.mrb[67].mxu0  ;;  %v1901_v44 = vadd.f32 %v7065_v18, %v10868_v22  ;;  %v7066_v54 = vpop.f32.mrb[68].mxu1  ;;  %v8416_v6 = vld [vmem:[%s9416_s21 + $0x344] ss:$16 sps:$4 sm:$0xff]  }
 0x2c3   : > { %v11108_v41 = vadd.f32 %v2029_v42, %v11038_v2  ;;  %v7067_v0 = vpop.f32.mrb[69].mxu1 }
 0x2c4   : > { %4007 = vmatmul.mubr.bf16.gmra.mrb[172].mxu0 %v8399_v33  ;;  %v7068_v2 = vadd.f32 %v7067_v0, %v7066_v54  ;;  %v7069_v27 = vpop.f32.mrb[70].mxu1  ;;  %v8415_v33 = vld [vmem:[%s9416_s21 + $0x328] ss:$16 sps:$4 sm:$0xff]  }
 0x2c5   : > { %4014 = vmatprep.mubr.bf16.mxu0 %v8402_v23  ;;  %v7070_v51 = vpop.f32.mrb[71].mxu1 }
 0x2c6   : > { %v7071_v1 = vadd.f32 %v7070_v51, %v7069_v27  ;;  %3854 = vmatmul.mubr.bf16.gmra.mrb[176].mxu1 %v8404_v45 }
 0x2c7   : > { %v7866_v10 = vpop.f32.mrb[68].mxu0  ;;  %3861 = vmatprep.mubr.bf16.mxu1 %v8410_v29  ;;  %v8426_v29 = vld [vmem:[%s9416_s21 + $0x364] ss:$16 sps:$4 sm:$0xff]  }
 0x2c8   : > { %v11112_v59 = vadd.f32 %v7866_v10, %v1890_v58  ;;  %v2042_v4 = vpop.f32.mrb[69].mxu0  ;;  %v1906_v58 = vadd.f32 %v7068_v2, %v10874_v50  ;;  %v8421_v2 = vld [vmem:[%s9416_s21 + $0x348] ss:$16 sps:$4 sm:$0xff]  }
 0x2c9   : > { %v11116_v24 = vadd.f32 %v2042_v4, %v1882_v55  ;;  %v7867_v35 = vpop.f32.mrb[70].mxu0  ;;  %v1909_v55 = vadd.f32 %v7071_v1, %v10880_v11 }
 0x2ca   : > { %v11120_v17 = vadd.f32 %v7867_v35, %v1893_v38  ;;  %v2045_v22 = vpop.f32.mrb[71].mxu0  ;;  %v7072_v38 = vpop.f32.mrb[72].mxu1 }
 0x2cb   : > { %v11123_v47 = vadd.f32 %v2045_v22, %v11076_v40  ;;  %v7073_v15 = vpop.f32.mrb[73].mxu1 }
 0x2cc   : > { %4015 = vmatmul.mubr.bf16.gmra.mrb[176].mxu0 %v8405_v34  ;;  %v7074_v40 = vadd.f32 %v7073_v15, %v7072_v38  ;;  %v7075_v50 = vpop.f32.mrb[74].mxu1  ;;  %v8420_v34 = vld [vmem:[%s9416_s21 + $0x340] ss:$16 sps:$4 sm:$0xff]  }
 0x2cd   : > { %4022 = vmatprep.mubr.bf16.mxu0 %v8412_v32  ;;  %v7076_v11 = vpop.f32.mrb[75].mxu1  ;;  %v8428_v32 = vld [vmem:[%s9416_s21 + $0x36c] ss:$16 sps:$4 sm:$0xff]  }
 0x2ce   : > { %v7077_v42 = vadd.f32 %v7076_v11, %v7075_v50  ;;  %v1914_v54 = vadd.f32 %v7074_v40, %v10886_v62  ;;  %3862 = vmatmul.mubr.bf16.gmra.mrb[180].mxu1 %v8414_v61  ;;  %v8430_v40 = vld [vmem:[%s9416_s21 + $0x360] ss:$16 sps:$4 sm:$0xff]   ;;  %v8431_v50 = vld [vmem:[%s9416_s21 + $0x368] ss:$16 sps:$4 sm:$0xff]  }
 0x2cf   : > { %v7870_v16 = vpop.f32.mrb[72].mxu0  ;;  %3869 = vmatprep.mubr.bf16.mxu1 %v8416_v6 }
 0x2d0   : > { %v11127_v60 = vadd.f32 %v7870_v16, %v1906_v58  ;;  %v2058_v21 = vpop.f32.mrb[73].mxu0  ;;  %v640_v16 = vld [vmem:[%s9395_s17] sm:$0xff] }
 0x2d1   : > { %v11131_v20 = vadd.f32 %v2058_v21, %v1898_v14  ;;  %v7871_v36 = vpop.f32.mrb[74].mxu0  ;;  %v1917_v14 = vadd.f32 %v7077_v42, %v10892_v28  ;;  %v7078_v10 = vpop.f32.mrb[76].mxu1  ;;  %v641_v42 = vld [vmem:[%s9395_s17 + $0x8] sm:$0xff] }
 0x2d2   : > { %v11135_v23 = vadd.f32 %v7871_v36, %v1909_v55  ;;  %v2061_v57 = vpop.f32.mrb[75].mxu0  ;;  %v7079_v4 = vpop.f32.mrb[77].mxu1 }
 0x2d3   : > { %v11137_v18 = vadd.f32 %v2061_v57, %v1901_v44  ;;  %v7080_v27 = vadd.f32 %v7079_v4, %v7078_v10  ;;  %v7081_v44 = vpop.f32.mrb[78].mxu1  ;;  %v8432_v57 = vld [vmem:[%s9416_s21 + $0x384] ss:$16 sps:$4 sm:$0xff]   ;;  %v2089_v10 = vadd.f32 %v11024_v12, %v640_v16 }
 0x2d4   : > { %4023 = vmatmul.mubr.bf16.gmra.mrb[180].mxu0 %v8415_v33  ;;  %v7082_v51 = vpop.f32.mrb[79].mxu1 }
 0x2d5   : > { %4030 = vmatprep.mubr.bf16.mxu0 %v8418_v31  ;;  %v1922_v28 = vadd.f32 %v7080_v27, %v10898_v19  ;;  %v7083_v1 = vadd.f32 %v7082_v51, %v7081_v44  ;;  %v642_v44 = vld [vmem:[%s9395_s17 + $0x10] sm:$0xff] }
 0x2d6   : > { %3870 = vmatmul.mubr.bf16.gmra.mrb[184].mxu1 %v8420_v34  ;;  %v2090_v34 = vadd.f32 %v11032_v43, %v641_v42  ;;  %v644_v42 = vld [vmem:[%s9395_s17 + $0x20] sm:$0xff] }
 0x2d7   : > { %v7874_v0 = vpop.f32.mrb[76].mxu0  ;;  %v1925_v38 = vadd.f32 %v7083_v1, %v10904_v39  ;;  %3877 = vmatprep.mubr.bf16.mxu1 %v8426_v29  ;;  %v8434_v39 = vld [vmem:[%s9416_s21 + $0x38c] ss:$16 sps:$4 sm:$0xff]  }
 0x2d8   : > { %v2074_v45 = vpop.f32.mrb[77].mxu0  ;;  %v11150_v55 = vadd.f32 %v7874_v0, %v1922_v28  ;;  %v8437_v28 = vld [vmem:[%s9416_s21 + $0x388] ss:$16 sps:$4 sm:$0xff]  }
 0x2d9   : > { %v11143_v35 = vadd.f32 %v2074_v45, %v1914_v54  ;;  %v7875_v62 = vpop.f32.mrb[78].mxu0  ;;  %v7124_v21 = vpop.f32.mrb[80].mxu1 }
 0x2da   : > { %v2077_v22 = vpop.f32.mrb[79].mxu0  ;;  %v11154_v15 = vadd.f32 %v7875_v62, %v1925_v38  ;;  %v7125_v61 = vpop.f32.mrb[81].mxu1 }
 0x2db   : > { %v11148_v58 = vadd.f32 %v2077_v22, %v1917_v14  ;;  %v7126_v36 = vadd.f32 %v7125_v61, %v7124_v21  ;;  %v7127_v31 = vpop.f32.mrb[82].mxu1  ;;  %v8436_v22 = vld [vmem:[%s9416_s21 + $0x380] ss:$16 sps:$4 sm:$0xff]   ;;  %v8442_v21 = vld [vmem:[%s9416_s21 + $0x3a4] ss:$16 sps:$4 sm:$0xff]  }
 0x2dc   : > { %4031 = vmatmul.mubr.bf16.gmra.mrb[184].mxu0 %v8421_v2  ;;  %v7128_v54 = vpop.f32.mrb[83].mxu1  ;;  %v643_v61 = vld [vmem:[%s9395_s17 + $0x18] sm:$0xff] }
 0x2dd   : > { %4038 = vmatprep.mubr.bf16.mxu0 %v8428_v32  ;;  %v7129_v4 = vadd.f32 %v7128_v54, %v7127_v31 }
 0x2de   : > { %3878 = vmatmul.mubr.bf16.gmra.mrb[188].mxu1 %v8430_v40 }
 0x2df   : > { %v7236_v19 = vpop.f32.mrb[80].mxu0  ;;  %3885 = vmatprep.mubr.bf16.mxu1 %v8432_v57 }
 0x2e0   : > { %v7237_v33 = vpop.f32.mrb[81].mxu0 }
 0x2e1   : > { %v7238_v6 = vadd.f32 %v7237_v33, %v7236_v19  ;;  %v7239_v11 = vpop.f32.mrb[82].mxu0  ;;  %v7130_v12 = vpop.f32.mrb[84].mxu1  ;;  %v8444_v19 = vld [vmem:[%s9416_s21 + $0x3ac] ss:$16 sps:$4 sm:$0xff]  }
 0x2e2   : > { %v7240_v14 = vpop.f32.mrb[83].mxu0  ;;  %v7131_v32 = vpop.f32.mrb[85].mxu1 }
 0x2e3   : > { %v2957_v0 = vadd.f32 %v7238_v6, %v7126_v36  ;;  %v7241_v45 = vadd.f32 %v7240_v14, %v7239_v11  ;;  %v7132_v1 = vadd.f32 %v7131_v32, %v7130_v12  ;;  %v7133_v43 = vpop.f32.mrb[86].mxu1  ;;  %v2092_v11 = vadd.f32 %v11029_v25, %v643_v61  ;;  %v8448_v12 = vld [vmem:[%s9416_s21 + $0x3c4] ss:$16 sps:$4 sm:$0xff]  }
 0x2e4   : > { %4039 = vmatmul.mubr.bf16.gmra.mrb[188].mxu0 %v8431_v50  ;;  %v7134_v33 = vpop.f32.mrb[87].mxu1  ;;  %v2091_v50 = vadd.f32 %v11019_v49, %v642_v44  ;;  %v645_v32 = vld [vmem:[%s9395_s17 + $0x28] sm:$0xff]  ;;  %v646_v61 = vld [vmem:[%s9395_s17 + $0x30] sm:$0xff] }
 0x2e5   : > { %v11163_v2 = vadd.f32 %v2957_v0, %v2089_v10  ;;  %v2960_v27 = vadd.f32 %v7241_v45, %v7129_v4  ;;  %4046 = vmatprep.mubr.bf16.mxu0 %v8434_v39  ;;  %v7135_v6 = vadd.f32 %v7134_v33, %v7133_v43  ;;  %v8446_v4 = vld [vmem:[%s9416_s21 + $0x3a0] ss:$16 sps:$4 sm:$0xff]   ;;  %v8447_v45 = vld [vmem:[%s9416_s21 + $0x3a8] ss:$16 sps:$4 sm:$0xff]  }
 0x2e6   : > { %3886 = vmatmul.mubr.bf16.gmra.mrb[192].mxu1 %v8436_v22 }
 0x2e7   : > { %v11166_v62 = vadd.f32 %v2960_v27, %v2090_v34  ;;  %v7242_v29 = vpop.f32.mrb[84].mxu0  ;;  %3893 = vmatprep.mubr.bf16.mxu1 %v8442_v21 }
 0x2e8   : > { %v7243_v51 = vpop.f32.mrb[85].mxu0 }
 0x2e9   : > { %v7244_v38 = vadd.f32 %v7243_v51, %v7242_v29  ;;  %v7245_v16 = vpop.f32.mrb[86].mxu0  ;;  %v7136_v49 = vpop.f32.mrb[88].mxu1  ;;  %v8450_v29 = vld [vmem:[%s9416_s21 + $0x3cc] ss:$16 sps:$4 sm:$0xff]  }
 0x2ea   : > { %v7246_v40 = vpop.f32.mrb[87].mxu0  ;;  %v7137_v10 = vpop.f32.mrb[89].mxu1 }
 0x2eb   : > { %v2965_v36 = vadd.f32 %v7244_v38, %v7132_v1  ;;  %v7247_v31 = vadd.f32 %v7246_v40, %v7245_v16  ;;  %v7138_v34 = vadd.f32 %v7137_v10, %v7136_v49  ;;  %v7139_v25 = vpop.f32.mrb[90].mxu1  ;;  %v2094_v16 = vadd.f32 %v11054_v5, %v645_v32  ;;  %v8458_v49 = vld [vmem:[%s9416_s21 + $0x3e4] ss:$16 sps:$4 sm:$0xff]  }
 0x2ec   : > { %4047 = vmatmul.mubr.bf16.gmra.mrb[192].mxu0 %v8437_v28  ;;  %v7140_v51 = vpop.f32.mrb[91].mxu1  ;;  %v2093_v28 = vadd.f32 %v11046_v7, %v644_v42  ;;  %v647_v10 = vld [vmem:[%s9395_s17 + $0x38] sm:$0xff]  ;;  %v648_v32 = vld [vmem:[%s9395_s17 + $0x40] sm:$0xff] }
 0x2ed   : > { %v11175_v57 = vadd.f32 %v2965_v36, %v2091_v50  ;;  %v2968_v39 = vadd.f32 %v7247_v31, %v7135_v6  ;;  %4054 = vmatprep.mubr.bf16.mxu0 %v8444_v19  ;;  %v7141_v38 = vadd.f32 %v7140_v51, %v7139_v25  ;;  %v8452_v6 = vld [vmem:[%s9416_s21 + $0x3c0] ss:$16 sps:$4 sm:$0xff]   ;;  %v8453_v31 = vld [vmem:[%s9416_s21 + $0x3c8] ss:$16 sps:$4 sm:$0xff]  }
 0x2ee   : > { %3894 = vmatmul.mubr.bf16.gmra.mrb[196].mxu1 %v8446_v4 }
 0x2ef   : > { %v11178_v54 = vadd.f32 %v2968_v39, %v2092_v11  ;;  %v7248_v14 = vpop.f32.mrb[88].mxu0  ;;  %3901 = vmatprep.mubr.bf16.mxu1 %v8448_v12 }
 0x2f0   : > { %v7249_v0 = vpop.f32.mrb[89].mxu0 }
 0x2f1   : > { %v7250_v27 = vadd.f32 %v7249_v0, %v7248_v14  ;;  %v7251_v44 = vpop.f32.mrb[90].mxu0  ;;  %v7142_v7 = vpop.f32.mrb[92].mxu1  ;;  %v8460_v14 = vld [vmem:[%s9416_s21 + $0x3ec] ss:$16 sps:$4 sm:$0xff]  }
 0x2f2   : > { %v7252_v22 = vpop.f32.mrb[91].mxu0  ;;  %v7143_v50 = vpop.f32.mrb[93].mxu1 }
 0x2f3   : > { %v2973_v1 = vadd.f32 %v7250_v27, %v7138_v34  ;;  %v7253_v43 = vadd.f32 %v7252_v22, %v7251_v44  ;;  %v7144_v11 = vadd.f32 %v7143_v50, %v7142_v7  ;;  %v7145_v5 = vpop.f32.mrb[94].mxu1  ;;  %v2096_v44 = vadd.f32 %v11051_v37, %v647_v10  ;;  %v8466_v7 = vld [vmem:[%s9416_s21 + $0x404] ss:$16 sps:$4 sm:$0xff]  }
 0x2f4   : > { %4055 = vmatmul.mubr.bf16.gmra.mrb[196].mxu0 %v8447_v45  ;;  %v7146_v0 = vpop.f32.mrb[95].mxu1  ;;  %v2095_v45 = vadd.f32 %v11041_v26, %v646_v61  ;;  %v649_v50 = vld [vmem:[%s9395_s17 + $0x48] sm:$0xff]  ;;  %v650_v10 = vld [vmem:[%s9395_s17 + $0x50] sm:$0xff] }
 0x2f5   : > { %v11187_v21 = vadd.f32 %v2973_v1, %v2093_v28  ;;  %v2976_v19 = vadd.f32 %v7253_v43, %v7141_v38  ;;  %4062 = vmatprep.mubr.bf16.mxu0 %v8450_v29  ;;  %v7147_v27 = vadd.f32 %v7146_v0, %v7145_v5  ;;  %v8462_v38 = vld [vmem:[%s9416_s21 + $0x3e0] ss:$16 sps:$4 sm:$0xff]   ;;  %v8463_v43 = vld [vmem:[%s9416_s21 + $0x3e8] ss:$16 sps:$4 sm:$0xff]  }
 0x2f6   : > { %3902 = vmatmul.mubr.bf16.gmra.mrb[200].mxu1 %v8452_v6 }
 0x2f7   : > { %v11190_v33 = vadd.f32 %v2976_v19, %v2094_v16  ;;  %v7254_v40 = vpop.f32.mrb[92].mxu0  ;;  %3909 = vmatprep.mubr.bf16.mxu1 %v8458_v49 }
 0x2f8   : > { %v7255_v36 = vpop.f32.mrb[93].mxu0 }
 0x2f9   : > { %v7256_v39 = vadd.f32 %v7255_v36, %v7254_v40  ;;  %v7257_v42 = vpop.f32.mrb[94].mxu0  ;;  %v7148_v26 = vpop.f32.mrb[96].mxu1  ;;  %v8469_v40 = vld [vmem:[%s9416_s21 + $0x40c] ss:$16 sps:$4 sm:$0xff]  }
 0x2fa   : > { %v7258_v4 = vpop.f32.mrb[95].mxu0  ;;  %v7149_v28 = vpop.f32.mrb[97].mxu1 }
 0x2fb   : > { %v2981_v34 = vadd.f32 %v7256_v39, %v7144_v11  ;;  %v7259_v25 = vadd.f32 %v7258_v4, %v7257_v42  ;;  %v7150_v16 = vadd.f32 %v7149_v28, %v7148_v26  ;;  %v7151_v37 = vpop.f32.mrb[98].mxu1  ;;  %v2098_v42 = vadd.f32 %v11072_v48, %v649_v50  ;;  %v8470_v26 = vld [vmem:[%s9416_s21 + $0x424] ss:$16 sps:$4 sm:$0xff]  }
 0x2fc   : > { %4063 = vmatmul.mubr.bf16.gmra.mrb[200].mxu0 %v8453_v31  ;;  %v7152_v36 = vpop.f32.mrb[99].mxu1  ;;  %v2097_v31 = vadd.f32 %v11064_v13, %v648_v32  ;;  %v651_v28 = vld [vmem:[%s9395_s17 + $0x58] sm:$0xff]  ;;  %v652_v50 = vld [vmem:[%s9395_s17 + $0x60] sm:$0xff] }
 0x2fd   : > { %v11199_v12 = vadd.f32 %v2981_v34, %v2095_v45  ;;  %v2984_v29 = vadd.f32 %v7259_v25, %v7147_v27  ;;  %4070 = vmatprep.mubr.bf16.mxu0 %v8460_v14  ;;  %v7153_v39 = vadd.f32 %v7152_v36, %v7151_v37  ;;  %v8464_v27 = vld [vmem:[%s9416_s21 + $0x400] ss:$16 sps:$4 sm:$0xff]   ;;  %v8467_v25 = vld [vmem:[%s9416_s21 + $0x408] ss:$16 sps:$4 sm:$0xff]  }
 0x2fe   : > { %3910 = vmatmul.mubr.bf16.gmra.mrb[204].mxu1 %v8462_v38 }
 0x2ff   : > { %v11202_v51 = vadd.f32 %v2984_v29, %v2096_v44  ;;  %v7260_v22 = vpop.f32.mrb[96].mxu0  ;;  %4785 = vmatprep.mubr.bf16.mxu1 %v8466_v7 }
 0x300   : > { %v7261_v1 = vpop.f32.mrb[97].mxu0 }
 0x301   : > { %v7262_v19 = vadd.f32 %v7261_v1, %v7260_v22  ;;  %v7263_v61 = vpop.f32.mrb[98].mxu0  ;;  %v7154_v13 = vpop.f32.mrb[100].mxu1  ;;  %v8472_v22 = vld [vmem:[%s9416_s21 + $0x42c] ss:$16 sps:$4 sm:$0xff]  }
 0x302   : > { %v7264_v6 = vpop.f32.mrb[99].mxu0  ;;  %v7155_v45 = vpop.f32.mrb[101].mxu1 }
 0x303   : > { %v2989_v11 = vadd.f32 %v7262_v19, %v7150_v16  ;;  %v7265_v5 = vadd.f32 %v7264_v6, %v7263_v61  ;;  %v7156_v44 = vadd.f32 %v7155_v45, %v7154_v13  ;;  %v7157_v48 = vpop.f32.mrb[102].mxu1  ;;  %v2100_v61 = vadd.f32 %v11069_v63, %v651_v28  ;;  %v8476_v13 = vld [vmem:[%s9416_s21 + $0x444] ss:$16 sps:$4 sm:$0xff]  }
 0x304   : > { %4071 = vmatmul.mubr.bf16.gmra.mrb[204].mxu0 %v8463_v43  ;;  %v7158_v1 = vpop.f32.mrb[103].mxu1  ;;  %v2099_v43 = vadd.f32 %v11059_v46, %v650_v10  ;;  %v653_v45 = vld [vmem:[%s9395_s17 + $0x68] sm:$0xff]  ;;  %v654_v28 = vld [vmem:[%s9395_s17 + $0x70] sm:$0xff] }
 0x305   : > { %v11211_v49 = vadd.f32 %v2989_v11, %v2097_v31  ;;  %v2992_v14 = vadd.f32 %v7265_v5, %v7153_v39  ;;  %4946 = vmatprep.mubr.bf16.mxu0 %v8469_v40  ;;  %v7159_v19 = vadd.f32 %v7158_v1, %v7157_v48  ;;  %v8474_v39 = vld [vmem:[%s9416_s21 + $0x420] ss:$16 sps:$4 sm:$0xff]   ;;  %v8475_v5 = vld [vmem:[%s9416_s21 + $0x428] ss:$16 sps:$4 sm:$0xff]  }
 0x306   : > { %4786 = vmatmul.mubr.bf16.vlgmr.msra.gmra.mrb[208].mxu1 %v8464_v27 }
 0x307   : > { %v11214_v0 = vadd.f32 %v2992_v14, %v2098_v42  ;;  %v7266_v4 = vpop.f32.mrb[100].mxu0  ;;  %4793 = vmatprep.mubr.bf16.mxu1 %v8470_v26 }
 0x308   : > { %v7267_v34 = vpop.f32.mrb[101].mxu0 }
 0x309   : > { %v7268_v29 = vadd.f32 %v7267_v34, %v7266_v4  ;;  %v7269_v32 = vpop.f32.mrb[102].mxu0  ;;  %v7160_v46 = vpop.f32.mrb[104].mxu1  ;;  %v8478_v4 = vld [vmem:[%s9416_s21 + $0x44c] ss:$16 sps:$4 sm:$0xff]  }
 0x30a   : > { %v7270_v38 = vpop.f32.mrb[103].mxu0  ;;  %v7161_v31 = vpop.f32.mrb[105].mxu1 }
 0x30b   : > { %v2997_v16 = vadd.f32 %v7268_v29, %v7156_v44  ;;  %v7271_v37 = vadd.f32 %v7270_v38, %v7269_v32  ;;  %v7162_v42 = vadd.f32 %v7161_v31, %v7160_v46  ;;  %v7163_v63 = vpop.f32.mrb[106].mxu1  ;;  %v2102_v32 = vadd.f32 %v11092_v3, %v653_v45  ;;  %v8482_v46 = vld [vmem:[%s9416_s21 + $0x464] ss:$16 sps:$4 sm:$0xff]  }
 0x30c   : > { %4947 = vmatmul.mubr.bf16.vlgmr.msra.gmra.mrb[208].mxu0 %v8467_v25  ;;  %v7164_v34 = vpop.f32.mrb[107].mxu1  ;;  %v2101_v25 = vadd.f32 %v11084_v52, %v652_v50  ;;  %v655_v31 = vld [vmem:[%s9395_s17 + $0x78] sm:$0xff]  ;;  %v656_v45 = vld [vmem:[%s9395_s17 + $0x80] sm:$0xff] }
 0x30d   : > { %v11223_v7 = vadd.f32 %v2997_v16, %v2099_v43  ;;  %v3000_v40 = vadd.f32 %v7271_v37, %v7159_v19  ;;  %4954 = vmatprep.mubr.bf16.mxu0 %v8472_v22  ;;  %v7165_v29 = vadd.f32 %v7164_v34, %v7163_v63  ;;  %v8480_v19 = vld [vmem:[%s9416_s21 + $0x440] ss:$16 sps:$4 sm:$0xff]   ;;  %v8481_v37 = vld [vmem:[%s9416_s21 + $0x448] ss:$16 sps:$4 sm:$0xff]  }
 0x30e   : > { %4794 = vmatmul.mubr.bf16.gmra.mrb[212].mxu1 %v8474_v39 }
 0x30f   : > { %v11226_v36 = vadd.f32 %v3000_v40, %v2100_v61  ;;  %v7272_v6 = vpop.f32.mrb[104].mxu0  ;;  %4801 = vmatprep.mubr.bf16.mxu1 %v8476_v13 }
 0x310   : > { %v7273_v11 = vpop.f32.mrb[105].mxu0 }
 0x311   : > { %v7274_v14 = vadd.f32 %v7273_v11, %v7272_v6  ;;  %v7275_v10 = vpop.f32.mrb[106].mxu0  ;;  %v7166_v52 = vpop.f32.mrb[108].mxu1  ;;  %v8484_v6 = vld [vmem:[%s9416_s21 + $0x46c] ss:$16 sps:$4 sm:$0xff]  }
 0x312   : > { %v7276_v27 = vpop.f32.mrb[107].mxu0  ;;  %v7167_v43 = vpop.f32.mrb[109].mxu1 }
 0x313   : > { %v3005_v44 = vadd.f32 %v7274_v14, %v7162_v42  ;;  %v7277_v48 = vadd.f32 %v7276_v27, %v7275_v10  ;;  %v7168_v61 = vadd.f32 %v7167_v43, %v7166_v52  ;;  %v7169_v3 = vpop.f32.mrb[110].mxu1  ;;  %v2104_v10 = vadd.f32 %v11089_v30, %v655_v31  ;;  %v8488_v52 = vld [vmem:[%s9416_s21 + $0x484] ss:$16 sps:$4 sm:$0xff]  }
 0x314   : > { %4955 = vmatmul.mubr.bf16.gmra.mrb[212].mxu0 %v8475_v5  ;;  %v7170_v11 = vpop.f32.mrb[111].mxu1  ;;  %v2103_v5 = vadd.f32 %v11079_v53, %v654_v28  ;;  %v657_v43 = vld [vmem:[%s9395_s17 + $0x88] sm:$0xff]  ;;  %v658_v31 = vld [vmem:[%s9395_s17 + $0x90] sm:$0xff] }
 0x315   : > { %v11235_v26 = vadd.f32 %v3005_v44, %v2101_v25  ;;  %v3008_v22 = vadd.f32 %v7277_v48, %v7165_v29  ;;  %4962 = vmatprep.mubr.bf16.mxu0 %v8478_v4  ;;  %v7171_v14 = vadd.f32 %v7170_v11, %v7169_v3  ;;  %v8486_v29 = vld [vmem:[%s9416_s21 + $0x460] ss:$16 sps:$4 sm:$0xff]   ;;  %v8487_v48 = vld [vmem:[%s9416_s21 + $0x468] ss:$16 sps:$4 sm:$0xff]  }
 0x316   : > { %4802 = vmatmul.mubr.bf16.gmra.mrb[216].mxu1 %v8480_v19 }
 0x317   : > { %v11238_v1 = vadd.f32 %v3008_v22, %v2102_v32  ;;  %v7278_v38 = vpop.f32.mrb[108].mxu0  ;;  %4809 = vmatprep.mubr.bf16.mxu1 %v8482_v46 }
 0x318   : > { %v7279_v16 = vpop.f32.mrb[109].mxu0 }
 0x319   : > { %v7280_v40 = vadd.f32 %v7279_v16, %v7278_v38  ;;  %v7281_v50 = vpop.f32.mrb[110].mxu0  ;;  %v7172_v53 = vpop.f32.mrb[112].mxu1  ;;  %v8490_v38 = vld [vmem:[%s9416_s21 + $0x48c] ss:$16 sps:$4 sm:$0xff]  }
 0x31a   : > { %v7282_v39 = vpop.f32.mrb[111].mxu0  ;;  %v7173_v25 = vpop.f32.mrb[113].mxu1 }
 0x31b   : > { %v3013_v42 = vadd.f32 %v7280_v40, %v7168_v61  ;;  %v7283_v63 = vadd.f32 %v7282_v39, %v7281_v50  ;;  %v7174_v32 = vadd.f32 %v7173_v25, %v7172_v53  ;;  %v7175_v30 = vpop.f32.mrb[114].mxu1  ;;  %v2106_v50 = vadd.f32 %v11108_v41, %v657_v43  ;;  %v8494_v53 = vld [vmem:[%s9416_s21 + $0x4a4] ss:$16 sps:$4 sm:$0xff]  }
 0x31c   : > { %4963 = vmatmul.mubr.bf16.gmra.mrb[216].mxu0 %v8481_v37  ;;  %v7176_v16 = vpop.f32.mrb[115].mxu1  ;;  %v2105_v37 = vadd.f32 %v11101_v9, %v656_v45  ;;  %v659_v25 = vld [vmem:[%s9395_s17 + $0x98] sm:$0xff]  ;;  %v660_v43 = vld [vmem:[%s9395_s17 + $0xa0] sm:$0xff] }
 0x31d   : > { %v11247_v13 = vadd.f32 %v3013_v42, %v2103_v5  ;;  %v3016_v4 = vadd.f32 %v7283_v63, %v7171_v14  ;;  %4970 = vmatprep.mubr.bf16.mxu0 %v8484_v6  ;;  %v7177_v40 = vadd.f32 %v7176_v16, %v7175_v30  ;;  %v8492_v14 = vld [vmem:[%s9416_s21 + $0x480] ss:$16 sps:$4 sm:$0xff]   ;;  %v8493_v63 = vld [vmem:[%s9416_s21 + $0x488] ss:$16 sps:$4 sm:$0xff]  }
 0x31e   : > { %4810 = vmatmul.mubr.bf16.gmra.mrb[220].mxu1 %v8486_v29 }
 0x31f   : > { %v11250_v34 = vadd.f32 %v3016_v4, %v2104_v10  ;;  %v7284_v27 = vpop.f32.mrb[112].mxu0  ;;  %4817 = vmatprep.mubr.bf16.mxu1 %v8488_v52 }
 0x320   : > { %v7285_v44 = vpop.f32.mrb[113].mxu0 }
 0x321   : > { %v7286_v22 = vadd.f32 %v7285_v44, %v7284_v27  ;;  %v7287_v28 = vpop.f32.mrb[114].mxu0  ;;  %v7178_v9 = vpop.f32.mrb[116].mxu1  ;;  %v8496_v27 = vld [vmem:[%s9416_s21 + $0x4ac] ss:$16 sps:$4 sm:$0xff]  }
 0x322   : > { %v7288_v19 = vpop.f32.mrb[115].mxu0  ;;  %v7179_v5 = vpop.f32.mrb[117].mxu1 }
 0x323   : > { %v3021_v61 = vadd.f32 %v7286_v22, %v7174_v32  ;;  %v7289_v3 = vadd.f32 %v7288_v19, %v7287_v28  ;;  %v7180_v10 = vadd.f32 %v7179_v5, %v7178_v9  ;;  %v7181_v41 = vpop.f32.mrb[118].mxu1  ;;  %v2108_v28 = vadd.f32 %v11105_v56, %v659_v25  ;;  %v8502_v5 = vld [vmem:[%s9416_s21 + $0x4cc] ss:$16 sps:$4 sm:$0xff]  }
 0x324   : > { %4971 = vmatmul.mubr.bf16.gmra.mrb[220].mxu0 %v8487_v48  ;;  %v7182_v44 = vpop.f32.mrb[119].mxu1  ;;  %v2107_v48 = vadd.f32 %v11096_v8, %v658_v31 }
 0x325   : > { %v11259_v46 = vadd.f32 %v3021_v61, %v2105_v37  ;;  %v3024_v6 = vadd.f32 %v7289_v3, %v7177_v40  ;;  %4978 = vmatprep.mubr.bf16.mxu0 %v8490_v38  ;;  %v7183_v22 = vadd.f32 %v7182_v44, %v7181_v41  ;;  %v8560_v37 = vld [vmem:[#allocation11] sm:$0xff]  }
 0x326   : > { %4818 = vmatmul.mubr.bf16.gmra.mrb[224].mxu1 %v8492_v14  ;;  %v8498_v3 = vld [vmem:[%s9416_s21 + $0x4a0] ss:$16 sps:$4 sm:$0xff]   ;;  %7876 = vmatprep.subr.bf16.mxu1 %v8560_v37  ;;  %v662_v44 = vld [vmem:[%s9395_s17 + $0xb0] sm:$0xff] }
 0x327   : > { %v11262_v11 = vadd.f32 %v3024_v6, %v2106_v50  ;;  %v7290_v39 = vpop.f32.mrb[116].mxu0  ;;  %4825 = vmatprep.mubr.bf16.mxu1 %v8494_v53  ;;  %v8499_v50 = vld [vmem:[%s9416_s21 + $0x4a8] ss:$16 sps:$4 sm:$0xff]   ;;  %7877 = vmatpush3.bf16.msra.mxu1 %v8560_v37  ;;  %v8508_v37 = vld [vmem:[%s9416_s21 + $0x4ec] ss:$16 sps:$4 sm:$0xff]  }
 0x328   : > { %v7291_v42 = vpop.f32.mrb[117].mxu0 }
 0x329   : > { %v7292_v4 = vadd.f32 %v7291_v42, %v7290_v39  ;;  %v7293_v45 = vpop.f32.mrb[118].mxu0  ;;  %v7184_v8 = vpop.f32.mrb[120].mxu1  ;;  %v8500_v39 = vld [vmem:[%s9416_s21 + $0x4c4] ss:$16 sps:$4 sm:$0xff]  }
 0x32a   : > { %v7294_v29 = vpop.f32.mrb[119].mxu0  ;;  %v7185_v61 = vpop.f32.mrb[121].mxu1  ;;  %v661_v42 = vld [vmem:[%s9395_s17 + $0xa8] sm:$0xff] }
 0x32b   : > { %v3029_v32 = vadd.f32 %v7292_v4, %v7180_v10  ;;  %v7295_v30 = vadd.f32 %v7294_v29, %v7293_v45  ;;  %v7186_v6 = vadd.f32 %v7185_v61, %v7184_v8  ;;  %v7187_v31 = vpop.f32.mrb[122].mxu1  ;;  %v2109_v10 = vadd.f32 %v11116_v24, %v660_v43  ;;  %v663_v61 = vld [vmem:[%s9395_s17 + $0xb8] sm:$0xff] }
 0x32c   : > { %4979 = vmatmul.mubr.bf16.gmra.mrb[224].mxu0 %v8493_v63  ;;  %v7188_v14 = vpop.f32.mrb[123].mxu1  ;;  %v2110_v53 = vadd.f32 %v11123_v47, %v661_v42  ;;  %v664_v42 = vld [vmem:[%s9395_s17 + $0xc0] sm:$0xff] }
 0x32d   : > { %v11271_v52 = vadd.f32 %v3029_v32, %v2107_v48  ;;  %v3032_v38 = vadd.f32 %v7295_v30, %v7183_v22  ;;  %4986 = vmatprep.mubr.bf16.mxu0 %v8496_v27  ;;  %v7189_v41 = vadd.f32 %v7188_v14, %v7187_v31  ;;  %v8504_v30 = vld [vmem:[%s9416_s21 + $0x4c0] ss:$16 sps:$4 sm:$0xff]  }
 0x32e   : > { %4826 = vmatmul.mubr.bf16.gmra.mrb[228].mxu1 %v8498_v3 }
 0x32f   : > { %v11274_v16 = vadd.f32 %v3032_v38, %v2108_v28  ;;  %v7296_v19 = vpop.f32.mrb[120].mxu0  ;;  %4833 = vmatprep.mubr.bf16.mxu1 %v8500_v39  ;;  %v8505_v28 = vld [vmem:[%s9416_s21 + $0x4c8] ss:$16 sps:$4 sm:$0xff]  }
 0x330   : > { %v7297_v40 = vpop.f32.mrb[121].mxu0 }
 0x331   : > { %v7298_v56 = vadd.f32 %v7297_v40, %v7296_v19  ;;  %v7299_v9 = vpop.f32.mrb[122].mxu0  ;;  %v7190_v24 = vpop.f32.mrb[124].mxu1  ;;  %v8506_v19 = vld [vmem:[%s9416_s21 + $0x4e4] ss:$16 sps:$4 sm:$0xff]  }
 0x332   : > { %v7300_v63 = vpop.f32.mrb[123].mxu0  ;;  %v7191_v32 = vpop.f32.mrb[125].mxu1 }
 0x333   : > { %v3037_v4 = vadd.f32 %v7298_v56, %v7186_v6  ;;  %v7301_v45 = vadd.f32 %v7300_v63, %v7299_v9  ;;  %v7192_v38 = vadd.f32 %v7191_v32, %v7190_v24  ;;  %v7193_v47 = vpop.f32.mrb[126].mxu1  ;;  %v2112_v9 = vadd.f32 %v11120_v17, %v663_v61  ;;  %v8514_v32 = vld [vmem:[%s9416_s21 + $0x50c] ss:$16 sps:$4 sm:$0xff]  }
 0x334   : > { %4987 = vmatmul.mubr.bf16.gmra.mrb[228].mxu0 %v8499_v50  ;;  %v7194_v40 = vpop.f32.mrb[127].mxu1  ;;  %v2111_v50 = vadd.f32 %v11112_v59, %v662_v44 }
 0x335   : > { %v11283_v27 = vadd.f32 %v3037_v4, %v2109_v10  ;;  %v3040_v25 = vadd.f32 %v7301_v45, %v7189_v41  ;;  %4994 = vmatprep.mubr.bf16.mxu0 %v8502_v5  ;;  %v7195_v56 = vadd.f32 %v7194_v40, %v7193_v47  ;;  %v8561_v10 = vld [vmem:[#allocation11 + $0x8] sm:$0xff]   ;;  %v8510_v45 = vld [vmem:[%s9416_s21 + $0x4e0] ss:$16 sps:$4 sm:$0xff]  }
 0x336   : > { %4834 = vmatmul.mubr.bf16.gmra.mrb[232].mxu1 %v8504_v30  ;;  %7878 = vmatprep.subr.bf16.mxu1 %v8561_v10  ;;  %v666_v40 = vld [vmem:[%s9395_s17 + $0xd0] sm:$0xff] }
 0x337   : > { %v11286_v29 = vadd.f32 %v3040_v25, %v2110_v53  ;;  %v7302_v48 = vpop.f32.mrb[124].mxu0  ;;  %4841 = vmatprep.mubr.bf16.mxu1 %v8506_v19  ;;  %v8511_v53 = vld [vmem:[%s9416_s21 + $0x4e8] ss:$16 sps:$4 sm:$0xff]   ;;  %7879 = vmatpush3.bf16.msra.mxu1 %v8561_v10  ;;  %v8520_v10 = vld [vmem:[%s9416_s21 + $0x52c] ss:$16 sps:$4 sm:$0xff]  }
 0x338   : > { %v7303_v22 = vpop.f32.mrb[125].mxu0 }
 0x339   : > { %v7304_v43 = vadd.f32 %v7303_v22, %v7302_v48  ;;  %v7305_v8 = vpop.f32.mrb[126].mxu0  ;;  %v7196_v59 = vpop.f32.mrb[128].mxu1  ;;  %v8512_v48 = vld [vmem:[%s9416_s21 + $0x504] ss:$16 sps:$4 sm:$0xff]  }
 0x33a   : > { %v7306_v3 = vpop.f32.mrb[127].mxu0  ;;  %v7197_v4 = vpop.f32.mrb[129].mxu1  ;;  %v665_v22 = vld [vmem:[%s9395_s17 + $0xc8] sm:$0xff] }
 0x33b   : > { %v3045_v6 = vadd.f32 %v7304_v43, %v7192_v38  ;;  %v7307_v31 = vadd.f32 %v7306_v3, %v7305_v8  ;;  %v7198_v25 = vadd.f32 %v7197_v4, %v7196_v59  ;;  %v7199_v44 = vpop.f32.mrb[130].mxu1  ;;  %v2113_v38 = vadd.f32 %v11131_v20, %v664_v42  ;;  %v667_v4 = vld [vmem:[%s9395_s17 + $0xd8] sm:$0xff] }
 0x33c   : > { %4995 = vmatmul.mubr.bf16.gmra.mrb[232].mxu0 %v8505_v28  ;;  %v7200_v30 = vpop.f32.mrb[131].mxu1  ;;  %v2114_v19 = vadd.f32 %v11137_v18, %v665_v22  ;;  %v668_v22 = vld [vmem:[%s9395_s17 + $0xe0] sm:$0xff] }
 0x33d   : > { %v11295_v39 = vadd.f32 %v3045_v6, %v2111_v50  ;;  %v3048_v5 = vadd.f32 %v7307_v31, %v7195_v56  ;;  %5002 = vmatprep.mubr.bf16.mxu0 %v8508_v37  ;;  %v7201_v47 = vadd.f32 %v7200_v30, %v7199_v44  ;;  %v8516_v31 = vld [vmem:[%s9416_s21 + $0x500] ss:$16 sps:$4 sm:$0xff]  }
 0x33e   : > { %4842 = vmatmul.mubr.bf16.gmra.mrb[236].mxu1 %v8510_v45 }
 0x33f   : > { %v11298_v14 = vadd.f32 %v3048_v5, %v2112_v9  ;;  %v7308_v63 = vpop.f32.mrb[128].mxu0  ;;  %4849 = vmatprep.mubr.bf16.mxu1 %v8512_v48  ;;  %v8517_v9 = vld [vmem:[%s9416_s21 + $0x508] ss:$16 sps:$4 sm:$0xff]  }
 0x340   : > { %v7309_v41 = vpop.f32.mrb[129].mxu0 }
 0x341   : > { %v7310_v17 = vadd.f32 %v7309_v41, %v7308_v63  ;;  %v7311_v24 = vpop.f32.mrb[130].mxu0  ;;  %v7202_v20 = vpop.f32.mrb[132].mxu1  ;;  %v8518_v63 = vld [vmem:[%s9416_s21 + $0x524] ss:$16 sps:$4 sm:$0xff]  }
 0x342   : > { %v7312_v28 = vpop.f32.mrb[131].mxu0  ;;  %v7203_v6 = vpop.f32.mrb[133].mxu1 }
 0x343   : > { %v3053_v43 = vadd.f32 %v7310_v17, %v7198_v25  ;;  %v7313_v8 = vadd.f32 %v7312_v28, %v7311_v24  ;;  %v7204_v5 = vadd.f32 %v7203_v6, %v7202_v20  ;;  %v7205_v18 = vpop.f32.mrb[134].mxu1  ;;  %v2116_v24 = vadd.f32 %v11135_v23, %v667_v4  ;;  %v8526_v6 = vld [vmem:[%s9416_s21 + $0x54c] ss:$16 sps:$4 sm:$0xff]  }
 0x344   : > { %5003 = vmatmul.mubr.bf16.gmra.mrb[236].mxu0 %v8511_v53  ;;  %v7206_v41 = vpop.f32.mrb[135].mxu1  ;;  %v2115_v53 = vadd.f32 %v11127_v60, %v666_v40 }
 0x345   : > { %v11307_v37 = vadd.f32 %v3053_v43, %v2113_v38  ;;  %v3056_v61 = vadd.f32 %v7313_v8, %v7201_v47  ;;  %5010 = vmatprep.mubr.bf16.mxu0 %v8514_v32  ;;  %v7207_v17 = vadd.f32 %v7206_v41, %v7205_v18  ;;  %v8562_v38 = vld [vmem:[#allocation11 + $0x10] sm:$0xff]  }
 0x346   : > { %4850 = vmatmul.mubr.bf16.gmra.mrb[240].mxu1 %v8516_v31  ;;  %v8522_v8 = vld [vmem:[%s9416_s21 + $0x520] ss:$16 sps:$4 sm:$0xff]   ;;  %7880 = vmatprep.subr.bf16.mxu1 %v8562_v38 }
 0x347   : > { %v11310_v3 = vadd.f32 %v3056_v61, %v2114_v19  ;;  %v7314_v50 = vpop.f32.mrb[132].mxu0  ;;  %4857 = vmatprep.mubr.bf16.mxu1 %v8518_v63  ;;  %v8523_v19 = vld [vmem:[%s9416_s21 + $0x528] ss:$16 sps:$4 sm:$0xff]   ;;  %7881 = vmatpush3.bf16.msra.mxu1 %v8562_v38  ;;  %v8532_v38 = vld [vmem:[%s9416_s21 + $0x56c] ss:$16 sps:$4 sm:$0xff]  }
 0x348   : > { %v7315_v56 = vpop.f32.mrb[133].mxu0 }
 0x349   : > { %v7316_v42 = vadd.f32 %v7315_v56, %v7314_v50  ;;  %v7317_v59 = vpop.f32.mrb[134].mxu0  ;;  %v7208_v60 = vpop.f32.mrb[136].mxu1  ;;  %v8524_v50 = vld [vmem:[%s9416_s21 + $0x544] ss:$16 sps:$4 sm:$0xff]  }
 0x34a   : > { %v7318_v45 = vpop.f32.mrb[135].mxu0  ;;  %v7209_v43 = vpop.f32.mrb[137].mxu1  ;;  %v669_v56 = vld [vmem:[%s9395_s17 + $0xe8] sm:$0xff] }
 0x34b   : > { %v3061_v25 = vadd.f32 %v7316_v42, %v7204_v5  ;;  %v7319_v44 = vadd.f32 %v7318_v45, %v7317_v59  ;;  %v7210_v61 = vadd.f32 %v7209_v43, %v7208_v60  ;;  %v7211_v40 = vpop.f32.mrb[138].mxu1  ;;  %v2117_v5 = vadd.f32 %v11143_v35, %v668_v22 }
 0x34c   : > { %5011 = vmatmul.mubr.bf16.gmra.mrb[240].mxu0 %v8517_v9  ;;  %v7212_v31 = vpop.f32.mrb[139].mxu1  ;;  %v2118_v63 = vadd.f32 %v11148_v58, %v669_v56  ;;  %v8563_v56 = vld [vmem:[#allocation11 + $0x18] sm:$0xff]  }
 0x34d   : > { %v11319_v48 = vadd.f32 %v3061_v25, %v2115_v53  ;;  %v3064_v32 = vadd.f32 %v7319_v44, %v7207_v17  ;;  %5018 = vmatprep.mubr.bf16.mxu0 %v8520_v10  ;;  %v7213_v18 = vadd.f32 %v7212_v31, %v7211_v40  ;;  %v670_v53 = vld [vmem:[%s9395_s17 + $0xf0] sm:$0xff]  ;;  %v8528_v44 = vld [vmem:[%s9416_s21 + $0x540] ss:$16 sps:$4 sm:$0xff]   ;;  %7882 = vmatprep.subr.bf16.mxu1 %v8563_v56 }
 0x34e   : > { %4858 = vmatmul.mubr.bf16.gmra.mrb[244].mxu1 %v8522_v8 }
 0x34f   : > { %v11322_v30 = vadd.f32 %v3064_v32, %v2116_v24  ;;  %v7320_v28 = vpop.f32.mrb[136].mxu0  ;;  %4865 = vmatprep.mubr.bf16.mxu1 %v8524_v50  ;;  %v8529_v24 = vld [vmem:[%s9416_s21 + $0x548] ss:$16 sps:$4 sm:$0xff]   ;;  %7883 = vmatpush3.bf16.msra.mxu1 %v8563_v56 }
 0x350   : > { %v7321_v47 = vpop.f32.mrb[137].mxu0 }
 0x351   : > { %v7322_v23 = vadd.f32 %v7321_v47, %v7320_v28  ;;  %v7323_v20 = vpop.f32.mrb[138].mxu0  ;;  %v7214_v35 = vpop.f32.mrb[140].mxu1  ;;  %v8530_v28 = vld [vmem:[%s9416_s21 + $0x564] ss:$16 sps:$4 sm:$0xff]  }
 0x352   : > { %v7324_v9 = vpop.f32.mrb[139].mxu0  ;;  %v7215_v25 = vpop.f32.mrb[141].mxu1  ;;  %v671_v47 = vld [vmem:[%s9395_s17 + $0xf8] sm:$0xff]  ;;  %s8975_s17 = smov [#allocation19]  }
 0x353   : > { %v3069_v42 = vadd.f32 %v7322_v23, %v7210_v61  ;;  %v7325_v59 = vadd.f32 %v7324_v9, %v7323_v20  ;;  %v7216_v32 = vadd.f32 %v7215_v25, %v7214_v35  ;;  %v7217_v58 = vpop.f32.mrb[142].mxu1  ;;  %v2120_v50 = vadd.f32 %v11154_v15, %v671_v47  ;;  %v8564_v25 = vld [vmem:[#allocation11 + $0x20] sm:$0xff]   ;;  %s8860_s27 = sshll.u32 %s8975_s17, 4  ;;  %s8861_s27 = int_to_ptr.vmem [resolvable:$false] %s8860_s27 }
 0x354   : > { %5019 = vmatmul.mubr.bf16.gmra.mrb[244].mxu0 %v8523_v19  ;;  %v7218_v43 = vpop.f32.mrb[143].mxu1  ;;  %v2119_v19 = vadd.f32 %v11150_v55, %v670_v53  ;;  %v8541_v53 = vld [vmem:[%s9416_s21 + $0x58c] ss:$16 sps:$4 sm:$0xff]   ;;  %7884 = vmatprep.subr.bf16.mxu1 %v8564_v25  ;;  %s8862_s12 = scalar_lea.vmem %s8861_s27, 8192  ;;  %p8863_p3 = scmp.lt.s32.totalorder %s11669_s25, %s8861_s27 }
 0x355   : > { %v11331_v10 = vadd.f32 %v3069_v42, %v2117_v5  ;;  %v3072_v4 = vadd.f32 %v7325_v59, %v7213_v18  ;;  %5026 = vmatprep.mubr.bf16.mxu0 %v8526_v6  ;;  %v7219_v23 = vadd.f32 %v7218_v43, %v7217_v58  ;;  %v8534_v5 = vld [vmem:[%s9416_s21 + $0x560] ss:$16 sps:$4 sm:$0xff]   ;;  %v8535_v59 = vld [vmem:[%s9416_s21 + $0x568] ss:$16 sps:$4 sm:$0xff]   ;;  %7885 = vmatpush3.bf16.msra.mxu1 %v8564_v25  ;;  %p8864_p10 = scmp.lt.s32.totalorder %s8862_s12, %s8856_s15 }
 0x356   : > { %4866 = vmatmul.mubr.bf16.gmra.mrb[248].mxu1 %v8528_v44 }
 0x357   : > { %v11333_v41 = vadd.f32 %v3072_v4, %v2118_v63  ;;  %v7326_v45 = vpop.f32.mrb[140].mxu0  ;;  %4873 = vmatprep.mubr.bf16.mxu1 %v8530_v28  ;;  %v8538_v63 = vld [vmem:[%s9416_s21 + $0x584] ss:$16 sps:$4 sm:$0xff]   ;;  %v8565_v28 = vld [vmem:[#allocation11 + $0x28] sm:$0xff]   ;;  %p8865_p1 = por %p8864_p10, %p8863_p3 }
 0x358   : > { %v7327_v17 = vpop.f32.mrb[141].mxu0  ;;  %7886 = vmatprep.subr.bf16.mxu1 %v8565_v28 }
 0x359   : > { %v7328_v22 = vadd.f32 %v7327_v17, %v7326_v45  ;;  %v7329_v60 = vpop.f32.mrb[142].mxu0  ;;  %v7348_v9 = vpop.f32.mrb[144].mxu1  ;;  %7887 = vmatpush3.bf16.msra.mxu1 %v8565_v28  ;;  %v8550_v28 = vld [vmem:[%s9416_s21 + $0x5c4] ss:$16 sps:$4 sm:$0xff]   ;;  %p8866_p2 = pnand %p8865_p1, %p8859_p9 }
 0x35a   : > { %v7330_v8 = vpop.f32.mrb[143].mxu0  ;;  %v7349_v42 = vpop.f32.mrb[145].mxu1 }
 0x35b   : > { %v3077_v61 = vadd.f32 %v7328_v22, %v7216_v32  ;;  %v7331_v40 = vadd.f32 %v7330_v8, %v7329_v60  ;;  %v7350_v4 = vadd.f32 %v7349_v42, %v7348_v9  ;;  %v7351_v45 = vpop.f32.mrb[146].mxu1  ;;  %v8536_v8 = vld [vmem:[%s9416_s21 + $0x580] ss:$16 sps:$4 sm:$0xff]   ;;  %v8547_v9 = vld [vmem:[%s9416_s21 + $0x5ac] ss:$16 sps:$4 sm:$0xff]  }
 0x35c   : > { %5027 = vmatmul.mubr.bf16.gmra.mrb[248].mxu0 %v8529_v24  ;;  %v7352_v17 = vpop.f32.mrb[147].mxu1 }
 0x35d   : > { %v11342_v20 = vadd.f32 %v3077_v61, %v2119_v19  ;;  %v3080_v6 = vadd.f32 %v7331_v40, %v7219_v23  ;;  %5034 = vmatprep.mubr.bf16.mxu0 %v8532_v38  ;;  %v7353_v32 = vadd.f32 %v7352_v17, %v7351_v45  ;;  %v8539_v23 = vld [vmem:[%s9416_s21 + $0x588] ss:$16 sps:$4 sm:$0xff]   ;;  %v8544_v40 = vld [vmem:[%s9416_s21 + $0x5a4] ss:$16 sps:$4 sm:$0xff]  }
 0x35e   : > { %4874 = vmatmul.mubr.bf16.gmra.mrb[252].mxu1 %v8534_v5 }
 0x35f   : > { %v11345_v31 = vadd.f32 %v3080_v6, %v2120_v50  ;;  %v7460_v55 = vpop.f32.mrb[144].mxu0  ;;  %4881 = vmatprep.mubr.bf16.mxu1 %v8538_v63 }
 0x360   : > { %v7461_v18 = vpop.f32.mrb[145].mxu0 }
 0x361   : > { %v7462_v35 = vadd.f32 %v7461_v18, %v7460_v55  ;;  %v7463_v15 = vpop.f32.mrb[146].mxu0  ;;  %v7354_v43 = vpop.f32.mrb[148].mxu1  ;;  %v8566_v55 = vld [vmem:[#allocation11 + $0x30] sm:$0xff]  }
 0x362   : > { %v7464_v44 = vpop.f32.mrb[147].mxu0  ;;  %v7355_v19 = vpop.f32.mrb[149].mxu1  ;;  %7888 = vmatprep.subr.bf16.mxu1 %v8566_v55 }
 0x363   : > { %v3953_v24 = vadd.f32 %v7462_v35, %v7350_v4  ;;  %v7465_v22 = vadd.f32 %v7464_v44, %v7463_v15  ;;  %v7356_v50 = vadd.f32 %v7355_v19, %v7354_v43  ;;  %v7357_v6 = vpop.f32.mrb[150].mxu1  ;;  %v8567_v35 = vld [vmem:[#allocation11 + $0x38] sm:$0xff]   ;;  %7889 = vmatpush3.bf16.msra.mxu1 %v8566_v55  ;;  %v8542_v44 = vld [vmem:[%s9416_s21 + $0x5a0] ss:$16 sps:$4 sm:$0xff]  }
 0x364   : > { %5035 = vmatmul.mubr.bf16.gmra.mrb[252].mxu0 %v8535_v59  ;;  %v7358_v5 = vpop.f32.mrb[151].mxu1  ;;  %7890 = vmatprep.subr.bf16.mxu1 %v8567_v35  ;;  %v8553_v43 = vld [vmem:[%s9416_s21 + $0x5cc] ss:$16 sps:$4 sm:$0xff]   ;;  %v8548_v55 = vld [vmem:[%s9416_s21 + $0x5c0] ss:$16 sps:$4 sm:$0xff]  }
 0x365   : > { %v11352_v58 = vadd.f32 %v3953_v24, %v11163_v2  ;;  %v3956_v60 = vadd.f32 %v7465_v22, %v7353_v32  ;;  %5042 = vmatprep.mubr.bf16.mxu0 %v8541_v53  ;;  %v8545_v24 = vld [vmem:[%s9416_s21 + $0x5a8] ss:$16 sps:$4 sm:$0xff]  }
 0x366   : > { %4882 = vmatmul.mubr.bf16.gmra.mrb[0].mxu1 %v8536_v8 }
 0x367   : > { %v11355_v38 = vadd.f32 %v3956_v60, %v11166_v62  ;;  %v7466_v47 = vpop.f32.mrb[148].mxu0  ;;  %v7359_v62 = vadd.f32 %v7358_v5, %v7357_v6  ;;  %4889 = vmatprep.mubr.bf16.mxu1 %v8544_v40  ;;  %7891 = vmatpush3.bf16.msra.mxu1 %v8567_v35  ;;  %v8551_v5 = vld [vmem:[%s9416_s21 + $0x5c8] ss:$16 sps:$4 sm:$0xff]  }
 0x368   : > { %v7467_v61 = vpop.f32.mrb[149].mxu0 }
 0x369   : > { %v7468_v2 = vadd.f32 %v7467_v61, %v7466_v47  ;;  %v7469_v56 = vpop.f32.mrb[150].mxu0  ;;  %v7360_v15 = vpop.f32.mrb[152].mxu1 }
 0x36a   : > { %v7470_v42 = vpop.f32.mrb[151].mxu0  ;;  %v7361_v25 = vpop.f32.mrb[153].mxu1 }
 0x36b   : > { %v3961_v18 = vadd.f32 %v7468_v2, %v7356_v50  ;;  %v7471_v59 = vadd.f32 %v7470_v42, %v7469_v56  ;;  %v7362_v32 = vadd.f32 %v7361_v25, %v7360_v15  ;;  %v7363_v22 = vpop.f32.mrb[154].mxu1 }
 0x36c   : > { %5043 = vmatmul.mubr.bf16.gmra.mrb[0].mxu0 %v8539_v23  ;;  %v7364_v47 = vpop.f32.mrb[155].mxu1 }
 0x36d   : > { %v11362_v63 = vadd.f32 %v3961_v18, %v11175_v57  ;;  %v3964_v4 = vadd.f32 %v7471_v59, %v7359_v62  ;;  %5050 = vmatprep.mubr.bf16.mxu0 %v8547_v9  ;;  %v7365_v19 = vadd.f32 %v7364_v47, %v7363_v22 }
 0x36e   : > { %4890 = vmatmul.mubr.bf16.gmra.mrb[4].mxu1 %v8542_v44 }
 0x36f   : > { %v11365_v45 = vadd.f32 %v3964_v4, %v11178_v54  ;;  %v7472_v53 = vpop.f32.mrb[152].mxu0  ;;  %4897 = vmatprep.mubr.bf16.mxu1 %v8550_v28  ;;  %v8556_v4 = vld [vmem:[%s9416_s21 + $0x5e4] ss:$16 sps:$4 sm:$0xff]   ;;  %v8554_v28 = vld [vmem:[%s9416_s21 + $0x5e0] ss:$16 sps:$4 sm:$0xff]  }
 0x370   : > { %v7473_v17 = vpop.f32.mrb[153].mxu0 }
 0x371   : > { %v7474_v57 = vadd.f32 %v7473_v17, %v7472_v53  ;;  %v7475_v60 = vpop.f32.mrb[154].mxu0  ;;  %v7366_v2 = vpop.f32.mrb[156].mxu1 }
 0x372   : > { %v7476_v8 = vpop.f32.mrb[155].mxu0  ;;  %v7367_v56 = vpop.f32.mrb[157].mxu1 }
 0x373   : > { %v3969_v54 = vadd.f32 %v7474_v57, %v7362_v32  ;;  %v7477_v61 = vadd.f32 %v7476_v8, %v7475_v60  ;;  %v7368_v42 = vadd.f32 %v7367_v56, %v7366_v2  ;;  %v7369_v62 = vpop.f32.mrb[158].mxu1 }
 0x374   : > { %5051 = vmatmul.mubr.bf16.gmra.mrb[4].mxu0 %v8545_v24  ;;  %v7370_v35 = vpop.f32.mrb[159].mxu1 }
 0x375   : > { %v11372_v23 = vadd.f32 %v3969_v54, %v11187_v21  ;;  %v3972_v40 = vadd.f32 %v7477_v61, %v7365_v19  ;;  %5058 = vmatprep.mubr.bf16.mxu0 %v8553_v43  ;;  %v8559_v21 = vld [vmem:[%s9416_s21 + $0x5ec] ss:$16 sps:$4 sm:$0xff]   ;;  %v7371_v25 = vadd.f32 %v7370_v35, %v7369_v62  ;;  %v8557_v43 = vld [vmem:[%s9416_s21 + $0x5e8] ss:$16 sps:$4 sm:$0xff]  }
 0x376   : > { %4898 = vmatmul.mubr.bf16.gmra.mrb[8].mxu1 %v8548_v55 }
 0x377   : > { %v11375_v50 = vadd.f32 %v3972_v40, %v11190_v33  ;;  %v7478_v6 = vpop.f32.mrb[156].mxu0  ;;  %4905 = vmatprep.mubr.bf16.mxu1 %v8556_v4 }
 0x378   : > { %v7479_v9 = vpop.f32.mrb[157].mxu0 }
 0x379   : > { %v7480_v18 = vadd.f32 %v7479_v9, %v7478_v6  ;;  %v7481_v59 = vpop.f32.mrb[158].mxu0  ;;  %v7372_v32 = vpop.f32.mrb[160].mxu1 }
 0x37a   : > { %v7482_v15 = vpop.f32.mrb[159].mxu0  ;;  %v7373_v22 = vpop.f32.mrb[161].mxu1 }
 0x37b   : > { %v3977_v53 = vadd.f32 %v7480_v18, %v7368_v42  ;;  %v7483_v33 = vadd.f32 %v7482_v15, %v7481_v59  ;;  %v7374_v47 = vadd.f32 %v7373_v22, %v7372_v32  ;;  %v7375_v54 = vpop.f32.mrb[162].mxu1 }
 0x37c   : > { %5059 = vmatmul.mubr.bf16.gmra.mrb[8].mxu0 %v8551_v5  ;;  %v7376_v61 = vpop.f32.mrb[163].mxu1 }
 0x37d   : > { %v11382_v17 = vadd.f32 %v3977_v53, %v11199_v12  ;;  %v3980_v44 = vadd.f32 %v7483_v33, %v7371_v25  ;;  %5066 = vmatprep.mubr.bf16.mxu0 %v8559_v21  ;;  %v7377_v2 = vadd.f32 %v7376_v61, %v7375_v54 }
 0x37e   : > { %4906 = vmatmul.mubr.bf16.gmra.mrb[12].mxu1 %v8554_v28 }
 0x37f   : > { %v11385_v24 = vadd.f32 %v3980_v44, %v11202_v51  ;;  %v7484_v57 = vpop.f32.mrb[160].mxu0 }
 0x380   : > { %v7485_v60 = vpop.f32.mrb[161].mxu0 }
 0x381   : > { %v7486_v8 = vadd.f32 %v7485_v60, %v7484_v57  ;;  %v7487_v19 = vpop.f32.mrb[162].mxu0  ;;  %v7378_v55 = vpop.f32.mrb[164].mxu1 }
 0x382   : > { %v7488_v40 = vpop.f32.mrb[163].mxu0  ;;  %v7379_v42 = vpop.f32.mrb[165].mxu1 }
 0x383   : > { %v3985_v12 = vadd.f32 %v7486_v8, %v7374_v47  ;;  %v7489_v6 = vadd.f32 %v7488_v40, %v7487_v19  ;;  %v7380_v62 = vadd.f32 %v7379_v42, %v7378_v55  ;;  %v7381_v4 = vpop.f32.mrb[166].mxu1 }
 0x384   : > { %5067 = vmatmul.mubr.bf16.gmra.mrb[12].mxu0 %v8557_v43  ;;  %v7382_v35 = vpop.f32.mrb[167].mxu1 }
 0x385   : > { %v11390_v51 = vadd.f32 %v3985_v12, %v11211_v49  ;;  %v3988_v56 = vadd.f32 %v7489_v6, %v7377_v2  ;;  %v7383_v25 = vadd.f32 %v7382_v35, %v7381_v4 }
 0x387   : > { %v11393_v9 = vadd.f32 %v3988_v56, %v11214_v0  ;;  %v7490_v5 = vpop.f32.mrb[164].mxu0 }
 0x388   : > { %v7491_v18 = vpop.f32.mrb[165].mxu0 }
 0x389   : > { %v7492_v59 = vadd.f32 %v7491_v18, %v7490_v5  ;;  %v7493_v21 = vpop.f32.mrb[166].mxu0  ;;  %v7384_v32 = vpop.f32.mrb[168].mxu1 }
 0x38a   : > { %v7494_v15 = vpop.f32.mrb[167].mxu0  ;;  %v7385_v22 = vpop.f32.mrb[169].mxu1 }
 0x38b   : > { %v3993_v53 = vadd.f32 %v7492_v59, %v7380_v62  ;;  %v7495_v33 = vadd.f32 %v7494_v15, %v7493_v21  ;;  %v7386_v28 = vadd.f32 %v7385_v22, %v7384_v32  ;;  %v7387_v47 = vpop.f32.mrb[170].mxu1 }
 0x38c   : > { %v7388_v54 = vpop.f32.mrb[171].mxu1 }
 0x38d   : > { %v11396_v49 = vadd.f32 %v3993_v53, %v11223_v7  ;;  %v3996_v44 = vadd.f32 %v7495_v33, %v7383_v25  ;;  %v7389_v40 = vadd.f32 %v7388_v54, %v7387_v47 }
 0x38f   : > { %v11399_v0 = vadd.f32 %v3996_v44, %v11226_v36  ;;  %v7496_v57 = vpop.f32.mrb[168].mxu0 }
 0x390   : > { %v7497_v60 = vpop.f32.mrb[169].mxu0 }
 0x391   : > { %v7498_v43 = vadd.f32 %v7497_v60, %v7496_v57  ;;  %v7499_v8 = vpop.f32.mrb[170].mxu0  ;;  %v7390_v6 = vpop.f32.mrb[172].mxu1 }
 0x392   : > { %v7500_v19 = vpop.f32.mrb[171].mxu0  ;;  %v7391_v55 = vpop.f32.mrb[173].mxu1 }
 0x393   : > { %v4001_v61 = vadd.f32 %v7498_v43, %v7386_v28  ;;  %v7501_v12 = vadd.f32 %v7500_v19, %v7499_v8  ;;  %v7392_v42 = vadd.f32 %v7391_v55, %v7390_v6  ;;  %v7393_v62 = vpop.f32.mrb[174].mxu1 }
 0x394   : > { %v7394_v4 = vpop.f32.mrb[175].mxu1 }
 0x395   : > { %v11402_v7 = vadd.f32 %v4001_v61, %v11235_v26  ;;  %v4004_v2 = vadd.f32 %v7501_v12, %v7389_v40  ;;  %v7395_v15 = vadd.f32 %v7394_v4, %v7393_v62 }
 0x397   : > { %v11405_v36 = vadd.f32 %v4004_v2, %v11238_v1  ;;  %v7502_v56 = vpop.f32.mrb[172].mxu0 }
 0x398   : > { %v7503_v5 = vpop.f32.mrb[173].mxu0 }
 0x399   : > { %v7504_v18 = vadd.f32 %v7503_v5, %v7502_v56  ;;  %v7505_v59 = vpop.f32.mrb[174].mxu0  ;;  %v7396_v33 = vpop.f32.mrb[176].mxu1 }
 0x39a   : > { %v7506_v21 = vpop.f32.mrb[175].mxu0  ;;  %v7397_v32 = vpop.f32.mrb[177].mxu1 }
 0x39b   : > { %v4009_v35 = vadd.f32 %v7504_v18, %v7392_v42  ;;  %v7507_v53 = vadd.f32 %v7506_v21, %v7505_v59  ;;  %v7398_v22 = vadd.f32 %v7397_v32, %v7396_v33  ;;  %v7399_v28 = vpop.f32.mrb[178].mxu1 }
 0x39c   : > { %v7400_v47 = vpop.f32.mrb[179].mxu1 }
 0x39d   : > { %v11408_v26 = vadd.f32 %v4009_v35, %v11247_v13  ;;  %v4012_v25 = vadd.f32 %v7507_v53, %v7395_v15  ;;  %v7401_v19 = vadd.f32 %v7400_v47, %v7399_v28 }
 0x39f   : > { %v11411_v1 = vadd.f32 %v4012_v25, %v11250_v34  ;;  %v7508_v44 = vpop.f32.mrb[176].mxu0 }
 0x3a0   : > { %v7509_v57 = vpop.f32.mrb[177].mxu0 }
 0x3a1   : > { %v7510_v60 = vadd.f32 %v7509_v57, %v7508_v44  ;;  %v7511_v43 = vpop.f32.mrb[178].mxu0  ;;  %v7402_v12 = vpop.f32.mrb[180].mxu1 }
 0x3a2   : > { %v7512_v8 = vpop.f32.mrb[179].mxu0  ;;  %v7403_v6 = vpop.f32.mrb[181].mxu1 }
 0x3a3   : > { %v4017_v54 = vadd.f32 %v7510_v60, %v7398_v22  ;;  %v7513_v61 = vadd.f32 %v7512_v8, %v7511_v43  ;;  %v7404_v55 = vadd.f32 %v7403_v6, %v7402_v12  ;;  %v7405_v42 = vpop.f32.mrb[182].mxu1 }
 0x3a4   : > { %v7406_v62 = vpop.f32.mrb[183].mxu1 }
 0x3a5   : > { %v11414_v13 = vadd.f32 %v4017_v54, %v11259_v46  ;;  %v4020_v40 = vadd.f32 %v7513_v61, %v7401_v19  ;;  %v7407_v21 = vadd.f32 %v7406_v62, %v7405_v42 }
 0x3a7   : > { %v11417_v34 = vadd.f32 %v4020_v40, %v11262_v11  ;;  %v7514_v2 = vpop.f32.mrb[180].mxu0 }
 0x3a8   : > { %v7515_v56 = vpop.f32.mrb[181].mxu0 }
 0x3a9   : > { %v7516_v5 = vadd.f32 %v7515_v56, %v7514_v2  ;;  %v7517_v18 = vpop.f32.mrb[182].mxu0  ;;  %v7408_v53 = vpop.f32.mrb[184].mxu1 }
 0x3aa   : > { %v7518_v59 = vpop.f32.mrb[183].mxu0  ;;  %v7409_v33 = vpop.f32.mrb[185].mxu1 }
 0x3ab   : > { %v4025_v4 = vadd.f32 %v7516_v5, %v7404_v55  ;;  %v7519_v35 = vadd.f32 %v7518_v59, %v7517_v18  ;;  %v7410_v32 = vadd.f32 %v7409_v33, %v7408_v53  ;;  %v7411_v22 = vpop.f32.mrb[186].mxu1 }
 0x3ac   : > { %v7412_v28 = vpop.f32.mrb[187].mxu1 }
 0x3ad   : > { %v11420_v46 = vadd.f32 %v4025_v4, %v11271_v52  ;;  %v4028_v15 = vadd.f32 %v7519_v35, %v7407_v21  ;;  %v7413_v8 = vadd.f32 %v7412_v28, %v7411_v22 }
 0x3af   : > { %v11423_v11 = vadd.f32 %v4028_v15, %v11274_v16  ;;  %v7520_v25 = vpop.f32.mrb[184].mxu0 }
 0x3b0   : > { %v7521_v44 = vpop.f32.mrb[185].mxu0 }
 0x3b1   : > { %v7522_v57 = vadd.f32 %v7521_v44, %v7520_v25  ;;  %v7523_v60 = vpop.f32.mrb[186].mxu0  ;;  %v7414_v61 = vpop.f32.mrb[188].mxu1 }
 0x3b2   : > { %v7524_v43 = vpop.f32.mrb[187].mxu0  ;;  %v7415_v12 = vpop.f32.mrb[189].mxu1 }
 0x3b3   : > { %v4033_v47 = vadd.f32 %v7522_v57, %v7410_v32  ;;  %v7525_v54 = vadd.f32 %v7524_v43, %v7523_v60  ;;  %v7416_v6 = vadd.f32 %v7415_v12, %v7414_v61  ;;  %v7417_v55 = vpop.f32.mrb[190].mxu1 }
 0x3b4   : > { %v7418_v42 = vpop.f32.mrb[191].mxu1 }
 0x3b5   : > { %v11426_v52 = vadd.f32 %v4033_v47, %v11283_v27  ;;  %v4036_v19 = vadd.f32 %v7525_v54, %v7413_v8  ;;  %v7419_v59 = vadd.f32 %v7418_v42, %v7417_v55 }
 0x3b7   : > { %v11429_v16 = vadd.f32 %v4036_v19, %v11286_v29  ;;  %v7526_v40 = vpop.f32.mrb[188].mxu0 }
 0x3b8   : > { %v7527_v2 = vpop.f32.mrb[189].mxu0 }
 0x3b9   : > { %v7528_v56 = vadd.f32 %v7527_v2, %v7526_v40  ;;  %v7529_v5 = vpop.f32.mrb[190].mxu0  ;;  %v7420_v35 = vpop.f32.mrb[192].mxu1 }
 0x3ba   : > { %v7530_v18 = vpop.f32.mrb[191].mxu0  ;;  %v7421_v53 = vpop.f32.mrb[193].mxu1 }
 0x3bb   : > { %v4041_v62 = vadd.f32 %v7528_v56, %v7416_v6  ;;  %v7531_v4 = vadd.f32 %v7530_v18, %v7529_v5  ;;  %v7422_v33 = vadd.f32 %v7421_v53, %v7420_v35  ;;  %v7423_v32 = vpop.f32.mrb[194].mxu1 }
 0x3bc   : > { %v7424_v22 = vpop.f32.mrb[195].mxu1 }
 0x3bd   : > { %v11432_v27 = vadd.f32 %v4041_v62, %v11295_v39  ;;  %v4044_v21 = vadd.f32 %v7531_v4, %v7419_v59  ;;  %v7425_v43 = vadd.f32 %v7424_v22, %v7423_v32 }
 0x3bf   : > { %v11435_v29 = vadd.f32 %v4044_v21, %v11298_v14  ;;  %v7532_v15 = vpop.f32.mrb[192].mxu0 }
 0x3c0   : > { %v7533_v25 = vpop.f32.mrb[193].mxu0 }
 0x3c1   : > { %v7534_v44 = vadd.f32 %v7533_v25, %v7532_v15  ;;  %v7535_v57 = vpop.f32.mrb[194].mxu0  ;;  %v7426_v54 = vpop.f32.mrb[196].mxu1 }
 0x3c2   : > { %v7536_v60 = vpop.f32.mrb[195].mxu0  ;;  %v7427_v61 = vpop.f32.mrb[197].mxu1 }
 0x3c3   : > { %v4049_v28 = vadd.f32 %v7534_v44, %v7422_v33  ;;  %v7537_v47 = vadd.f32 %v7536_v60, %v7535_v57  ;;  %v7428_v12 = vadd.f32 %v7427_v61, %v7426_v54  ;;  %v7429_v6 = vpop.f32.mrb[198].mxu1 }
 0x3c4   : > { %v7430_v55 = vpop.f32.mrb[199].mxu1 }
 0x3c5   : > { %v11438_v39 = vadd.f32 %v4049_v28, %v11307_v37  ;;  %v4052_v8 = vadd.f32 %v7537_v47, %v7425_v43  ;;  %v7431_v18 = vadd.f32 %v7430_v55, %v7429_v6 }
 0x3c7   : > { %v11441_v14 = vadd.f32 %v4052_v8, %v11310_v3  ;;  %v7538_v19 = vpop.f32.mrb[196].mxu0 }
 0x3c8   : > { %v7539_v40 = vpop.f32.mrb[197].mxu0 }
 0x3c9   : > { %v7540_v2 = vadd.f32 %v7539_v40, %v7538_v19  ;;  %v7541_v56 = vpop.f32.mrb[198].mxu0  ;;  %v7432_v4 = vpop.f32.mrb[200].mxu1 }
 0x3ca   : > { %v7542_v5 = vpop.f32.mrb[199].mxu0  ;;  %v7433_v35 = vpop.f32.mrb[201].mxu1 }
 0x3cb   : > { %v4057_v42 = vadd.f32 %v7540_v2, %v7428_v12  ;;  %v7543_v62 = vadd.f32 %v7542_v5, %v7541_v56  ;;  %v7434_v53 = vadd.f32 %v7433_v35, %v7432_v4  ;;  %v7435_v33 = vpop.f32.mrb[202].mxu1 }
 0x3cc   : > { %v7436_v32 = vpop.f32.mrb[203].mxu1 }
 0x3cd   : > { %v11444_v37 = vadd.f32 %v4057_v42, %v11319_v48  ;;  %v4060_v59 = vadd.f32 %v7543_v62, %v7431_v18  ;;  %v7437_v60 = vadd.f32 %v7436_v32, %v7435_v33 }
 0x3cf   : > { %v11447_v3 = vadd.f32 %v4060_v59, %v11322_v30  ;;  %v7544_v21 = vpop.f32.mrb[200].mxu0 }
 0x3d0   : > { %v7545_v15 = vpop.f32.mrb[201].mxu0 }
 0x3d1   : > { %v7546_v25 = vadd.f32 %v7545_v15, %v7544_v21  ;;  %v7547_v44 = vpop.f32.mrb[202].mxu0  ;;  %v7438_v47 = vpop.f32.mrb[204].mxu1 }
 0x3d2   : > { %v7548_v57 = vpop.f32.mrb[203].mxu0  ;;  %v7439_v54 = vpop.f32.mrb[205].mxu1 }
 0x3d3   : > { %v4065_v22 = vadd.f32 %v7546_v25, %v7434_v53  ;;  %v7549_v28 = vadd.f32 %v7548_v57, %v7547_v44  ;;  %v7440_v61 = vadd.f32 %v7439_v54, %v7438_v47  ;;  %v7441_v12 = vpop.f32.mrb[206].mxu1  ;;  %v8570_v54 = vld [vmem:[#allocation13 + $0x10] sm:$0xff]  }
 0x3d4   : > { %v7442_v6 = vpop.f32.mrb[207].mxu1 }
 0x3d5   : > { %v11450_v48 = vadd.f32 %v4065_v22, %v11331_v10  ;;  %v4068_v43 = vadd.f32 %v7549_v28, %v7437_v60  ;;  %v7443_v5 = vadd.f32 %v7442_v6, %v7441_v12  ;;  %v8568_v60 = vld [vmem:[#allocation13] sm:$0xff]  }
 0x3d6   : > { %7924 = vmatprep.subr.bf16.mxu0 %v8568_v60 }
 0x3d7   : > { %v11453_v30 = vadd.f32 %v4068_v43, %v11333_v41  ;;  %v7550_v8 = vpop.f32.mrb[204].mxu0  ;;  %7925 = vmatpush3.bf16.msra.mxu0 %v8568_v60 }
 0x3d8   : > { %v7551_v19 = vpop.f32.mrb[205].mxu0 }
 0x3d9   : > { %v7552_v40 = vadd.f32 %v7551_v19, %v7550_v8  ;;  %v7553_v2 = vpop.f32.mrb[206].mxu0  ;;  %v7572_v62 = vpop.f32.mrb[208].mxu1 }
 0x3da   : > { %v7554_v56 = vpop.f32.mrb[207].mxu0  ;;  %v7573_v4 = vpop.f32.mrb[209].mxu1 }
 0x3db   : > { %v4073_v55 = vadd.f32 %v7552_v40, %v7440_v61  ;;  %v7555_v42 = vadd.f32 %v7554_v56, %v7553_v2  ;;  %v7574_v35 = vadd.f32 %v7573_v4, %v7572_v62  ;;  %v7575_v53 = vpop.f32.mrb[210].mxu1 }
 0x3dc   : > { %v7576_v33 = vpop.f32.mrb[211].mxu1 }
 0x3dd   : > { %v11456_v10 = vadd.f32 %v4073_v55, %v11342_v20  ;;  %v4076_v18 = vadd.f32 %v7555_v42, %v7443_v5  ;;  %v7577_v57 = vadd.f32 %v7576_v33, %v7575_v53  ;;  %v8569_v20 = vld [vmem:[#allocation13 + $0x8] sm:$0xff]  }
 0x3de   : > { %7926 = vmatprep.subr.bf16.mxu0 %v8569_v20 }
 0x3df   : > { %v11459_v41 = vadd.f32 %v4076_v18, %v11345_v31  ;;  %v7684_v59 = vpop.f32.mrb[208].mxu0  ;;  %7927 = vmatpush3.bf16.msra.mxu0 %v8569_v20 }
 0x3e0   : > { %v7685_v21 = vpop.f32.mrb[209].mxu0  ;;  %7928 = vmatprep.subr.bf16.mxu0 %v8570_v54 }
 0x3e1   : > { %v7686_v15 = vadd.f32 %v7685_v21, %v7684_v59  ;;  %v7687_v25 = vpop.f32.mrb[210].mxu0  ;;  %v7578_v47 = vpop.f32.mrb[212].mxu1 }
 0x3e2   : > { %v7688_v44 = vpop.f32.mrb[211].mxu0  ;;  %v7579_v19 = vpop.f32.mrb[213].mxu1 }
 0x3e3   : > { %v4949_v32 = vadd.f32 %v7686_v15, %v7574_v35  ;;  %v7689_v22 = vadd.f32 %v7688_v44, %v7687_v25  ;;  %v7580_v40 = vadd.f32 %v7579_v19, %v7578_v47  ;;  %v7581_v2 = vpop.f32.mrb[214].mxu1  ;;  %7929 = vmatpush3.bf16.msra.mxu0 %v8570_v54  ;;  %v8572_v15 = vld [vmem:[#allocation13 + $0x20] sm:$0xff]  }
 0x3e4   : > { %v7582_v55 = vpop.f32.mrb[215].mxu1 }
 0x3e5   : > { %v5075_v28 = vadd.f32 %v4949_v32, %v11352_v58  ;;  %v4952_v43 = vadd.f32 %v7689_v22, %v7577_v57  ;;  %v7583_v42 = vadd.f32 %v7582_v55, %v7581_v2 }
 0x3e7   : > { %v5076_v31 = vadd.f32 %v4952_v43, %v11355_v38  ;;  %v7690_v8 = vpop.f32.mrb[212].mxu0  ;;  %v8571_v38 = vld [vmem:[#allocation13 + $0x18] sm:$0xff]  }
 0x3e8   : > { %v7691_v61 = vpop.f32.mrb[213].mxu0  ;;  %7930 = vmatprep.subr.bf16.mxu0 %v8571_v38 }
 0x3e9   : > { %v7692_v12 = vadd.f32 %v7691_v61, %v7690_v8  ;;  %v7693_v6 = vpop.f32.mrb[214].mxu0  ;;  %v5107_v56 = vpack.c.bf16 %v5076_v31, %v5075_v28  ;;  %v7584_v21 = vpop.f32.mrb[216].mxu1  ;;  %7931 = vmatpush3.bf16.msra.mxu0 %v8571_v38 }
 0x3ea   : > { %v7694_v5 = vpop.f32.mrb[215].mxu0  ;;  %v7585_v53 = vpop.f32.mrb[217].mxu1  ;;  %7932 = vmatprep.subr.bf16.mxu0 %v8572_v15 }
 0x3eb   : > { %v4957_v58 = vadd.f32 %v7692_v12, %v7580_v40  ;;  %v7695_v18 = vadd.f32 %v7694_v5, %v7693_v6  ;;  %7892 = vmatprep.mubr.bf16.mxu1 %v5107_v56  ;;  %v7586_v44 = vadd.f32 %v7585_v53, %v7584_v21  ;;  %v7587_v57 = vpop.f32.mrb[218].mxu1 }
 0x3ec   : > { %v7588_v60 = vpop.f32.mrb[219].mxu1 }
 0x3ed   : > { %v5077_v62 = vadd.f32 %v4957_v58, %v11362_v63  ;;  %v4960_v59 = vadd.f32 %v7695_v18, %v7583_v42  ;;  %v7589_v63 = vadd.f32 %v7588_v60, %v7587_v57  ;;  %7933 = vmatpush3.bf16.msra.mxu0 %v8572_v15 }
 0x3ef   : > { %v5078_v4 = vadd.f32 %v4960_v59, %v11365_v45  ;;  %v7696_v35 = vpop.f32.mrb[216].mxu0  ;;  %v8573_v45 = vld [vmem:[#allocation13 + $0x28] sm:$0xff]  }
 0x3f0   : > { %v7697_v25 = vpop.f32.mrb[217].mxu0  ;;  %7934 = vmatprep.subr.bf16.mxu0 %v8573_v45 }
 0x3f1   : > { %v5108_v33 = vpack.c.bf16 %v5078_v4, %v5077_v62  ;;  %v7698_v32 = vadd.f32 %v7697_v25, %v7696_v35  ;;  %v7699_v22 = vpop.f32.mrb[218].mxu0  ;;  %v7590_v54 = vpop.f32.mrb[220].mxu1  ;;  %7935 = vmatpush3.bf16.msra.mxu0 %v8573_v45 }
 0x3f2   : > { %v7700_v20 = vpop.f32.mrb[219].mxu0  ;;  %v7591_v61 = vpop.f32.mrb[221].mxu1 }
 0x3f3   : > { %v4965_v28 = vadd.f32 %v7698_v32, %v7586_v44  ;;  %v7701_v43 = vadd.f32 %v7700_v20, %v7699_v22  ;;  %7893 = vmatmul.mubr.bf16.vlgmr.msra.gmra.mrb[16].mxu1 %v5108_v33  ;;  %v7592_v12 = vadd.f32 %v7591_v61, %v7590_v54  ;;  %v7593_v6 = vpop.f32.mrb[222].mxu1 }
 0x3f4   : > { %v7594_v5 = vpop.f32.mrb[223].mxu1 }
 0x3f5   : > { %v5079_v31 = vadd.f32 %v4965_v28, %v11372_v23  ;;  %v4968_v47 = vadd.f32 %v7701_v43, %v7589_v63  ;;  %v7595_v18 = vadd.f32 %v7594_v5, %v7593_v6 }
 0x3f7   : > { %v5080_v8 = vadd.f32 %v4968_v47, %v11375_v50  ;;  %v7702_v19 = vpop.f32.mrb[220].mxu0 }
 0x3f8   : > { %v7703_v40 = vpop.f32.mrb[221].mxu0 }
 0x3f9   : > { %v7704_v2 = vadd.f32 %v7703_v40, %v7702_v19  ;;  %v7705_v56 = vpop.f32.mrb[222].mxu0  ;;  %v5109_v55 = vpack.c.bf16 %v5080_v8, %v5079_v31  ;;  %v7596_v59 = vpop.f32.mrb[224].mxu1 }
 0x3fa   : > { %v7706_v58 = vpop.f32.mrb[223].mxu0  ;;  %v7597_v21 = vpop.f32.mrb[225].mxu1 }
 0x3fb   : > { %v4973_v42 = vadd.f32 %v7704_v2, %v7592_v12  ;;  %v7707_v23 = vadd.f32 %v7706_v58, %v7705_v56  ;;  %7896 = vmatprep.mubr.bf16.mxu1 %v5109_v55  ;;  %v7598_v53 = vadd.f32 %v7597_v21, %v7596_v59  ;;  %v7599_v33 = vpop.f32.mrb[226].mxu1 }
 0x3fc   : > { %v7600_v32 = vpop.f32.mrb[227].mxu1 }
 0x3fd   : > { %v5081_v38 = vadd.f32 %v4973_v42, %v11382_v17  ;;  %v4976_v50 = vadd.f32 %v7707_v23, %v7595_v18  ;;  %v7601_v60 = vadd.f32 %v7600_v32, %v7599_v33 }
 0x3ff   : > { %v5082_v62 = vadd.f32 %v4976_v50, %v11385_v24  ;;  %v7708_v4 = vpop.f32.mrb[224].mxu0 }
 0x400   : > { %v7709_v35 = vpop.f32.mrb[225].mxu0 }
 0x401   : > { %v5110_v15 = vpack.c.bf16 %v5082_v62, %v5081_v38  ;;  %v7710_v25 = vadd.f32 %v7709_v35, %v7708_v4  ;;  %v7711_v44 = vpop.f32.mrb[226].mxu0  ;;  %v7602_v63 = vpop.f32.mrb[228].mxu1 }
 0x402   : > { %v7712_v57 = vpop.f32.mrb[227].mxu0  ;;  %v7603_v45 = vpop.f32.mrb[229].mxu1 }
 0x403   : > { %v4981_v22 = vadd.f32 %v7710_v25, %v7598_v53  ;;  %v7713_v20 = vadd.f32 %v7712_v57, %v7711_v44  ;;  %7897 = vmatmul.mubr.bf16.gmra.mrb[20].mxu1 %v5110_v15  ;;  %v7604_v47 = vadd.f32 %v7603_v45, %v7602_v63  ;;  %v7605_v54 = vpop.f32.mrb[230].mxu1 }
 0x404   : > { %v7606_v40 = vpop.f32.mrb[231].mxu1 }
 0x405   : > { %v5083_v17 = vadd.f32 %v4981_v22, %v11390_v51  ;;  %v4984_v28 = vadd.f32 %v7713_v20, %v7601_v60  ;;  %v7607_v6 = vadd.f32 %v7606_v40, %v7605_v54 }
 0x407   : > { %v5084_v24 = vadd.f32 %v4984_v28, %v11393_v9  ;;  %v7714_v43 = vpop.f32.mrb[228].mxu0 }
 0x408   : > { %v7715_v31 = vpop.f32.mrb[229].mxu0 }
 0x409   : > { %v7716_v8 = vadd.f32 %v7715_v31, %v7714_v43  ;;  %v7717_v19 = vpop.f32.mrb[230].mxu0  ;;  %v5111_v61 = vpack.c.bf16 %v5084_v24, %v5083_v17  ;;  %v7608_v5 = vpop.f32.mrb[232].mxu1 }
 0x40a   : > { %v7718_v12 = vpop.f32.mrb[231].mxu0  ;;  %v7609_v42 = vpop.f32.mrb[233].mxu1 }
 0x40b   : > { %v4989_v2 = vadd.f32 %v7716_v8, %v7604_v47  ;;  %v7719_v56 = vadd.f32 %v7718_v12, %v7717_v19  ;;  %7900 = vmatprep.mubr.bf16.mxu1 %v5111_v61  ;;  %v7610_v38 = vadd.f32 %v7609_v42, %v7608_v5  ;;  %v7611_v62 = vpop.f32.mrb[234].mxu1 }
 0x40c   : > { %v7612_v4 = vpop.f32.mrb[235].mxu1 }
 0x40d   : > { %v5085_v51 = vadd.f32 %v4989_v2, %v11396_v49  ;;  %v4992_v55 = vadd.f32 %v7719_v56, %v7607_v6  ;;  %v7613_v15 = vadd.f32 %v7612_v4, %v7611_v62 }
 0x40f   : > { %v5086_v9 = vadd.f32 %v4992_v55, %v11399_v0  ;;  %v7720_v58 = vpop.f32.mrb[232].mxu0 }
 0x410   : > { %v7721_v18 = vpop.f32.mrb[233].mxu0 }
 0x411   : > { %v5112_v23 = vpack.c.bf16 %v5086_v9, %v5085_v51  ;;  %v7722_v50 = vadd.f32 %v7721_v18, %v7720_v58  ;;  %v7723_v59 = vpop.f32.mrb[234].mxu0  ;;  %v7614_v33 = vpop.f32.mrb[236].mxu1 }
 0x412   : > { %v7724_v21 = vpop.f32.mrb[235].mxu0  ;;  %v7615_v32 = vpop.f32.mrb[237].mxu1 }
 0x413   : > { %v4997_v35 = vadd.f32 %v7722_v50, %v7610_v38  ;;  %v7725_v53 = vadd.f32 %v7724_v21, %v7723_v59  ;;  %7901 = vmatmul.mubr.bf16.gmra.mrb[24].mxu1 %v5112_v23  ;;  %v7616_v22 = vadd.f32 %v7615_v32, %v7614_v33  ;;  %v7617_v20 = vpop.f32.mrb[238].mxu1 }
 0x414   : > { %v7618_v24 = vpop.f32.mrb[239].mxu1 }
 0x415   : > { %v5087_v49 = vadd.f32 %v4997_v35, %v11402_v7  ;;  %v5000_v25 = vadd.f32 %v7725_v53, %v7613_v15  ;;  %v7619_v45 = vadd.f32 %v7618_v24, %v7617_v20 }
 0x417   : > { %v5088_v0 = vadd.f32 %v5000_v25, %v11405_v36  ;;  %v7726_v44 = vpop.f32.mrb[236].mxu0 }
 0x418   : > { %v7727_v57 = vpop.f32.mrb[237].mxu0 }
 0x419   : > { %v7728_v60 = vadd.f32 %v7727_v57, %v7726_v44  ;;  %v7729_v17 = vpop.f32.mrb[238].mxu0  ;;  %v5113_v28 = vpack.c.bf16 %v5088_v0, %v5087_v49  ;;  %v7620_v8 = vpop.f32.mrb[240].mxu1 }
 0x41a   : > { %v7730_v63 = vpop.f32.mrb[239].mxu0  ;;  %v7621_v19 = vpop.f32.mrb[241].mxu1 }
 0x41b   : > { %v5005_v43 = vadd.f32 %v7728_v60, %v7616_v22  ;;  %v7731_v31 = vadd.f32 %v7730_v63, %v7729_v17  ;;  %7904 = vmatprep.mubr.bf16.mxu1 %v5113_v28  ;;  %v7622_v12 = vadd.f32 %v7621_v19, %v7620_v8  ;;  %v7623_v6 = vpop.f32.mrb[242].mxu1 }
 0x41c   : > { %v7624_v51 = vpop.f32.mrb[243].mxu1 }
 0x41d   : > { %v5089_v7 = vadd.f32 %v5005_v43, %v11408_v26  ;;  %v5008_v47 = vadd.f32 %v7731_v31, %v7619_v45  ;;  %v7625_v5 = vadd.f32 %v7624_v51, %v7623_v6 }
 0x41f   : > { %v5090_v36 = vadd.f32 %v5008_v47, %v11411_v1  ;;  %v7732_v54 = vpop.f32.mrb[240].mxu0 }
 0x420   : > { %v7733_v61 = vpop.f32.mrb[241].mxu0 }
 0x421   : > { %v5114_v40 = vpack.c.bf16 %v5090_v36, %v5089_v7  ;;  %v7734_v2 = vadd.f32 %v7733_v61, %v7732_v54  ;;  %v7735_v56 = vpop.f32.mrb[242].mxu0  ;;  %v7626_v18 = vpop.f32.mrb[244].mxu1 }
 0x422   : > { %v7736_v55 = vpop.f32.mrb[243].mxu0  ;;  %v7627_v38 = vpop.f32.mrb[245].mxu1 }
 0x423   : > { %v5013_v9 = vadd.f32 %v7734_v2, %v7622_v12  ;;  %v7737_v58 = vadd.f32 %v7736_v55, %v7735_v56  ;;  %7905 = vmatmul.mubr.bf16.gmra.mrb[28].mxu1 %v5114_v40  ;;  %v7628_v62 = vadd.f32 %v7627_v38, %v7626_v18  ;;  %v7629_v4 = vpop.f32.mrb[246].mxu1 }
 0x424   : > { %v7630_v15 = vpop.f32.mrb[247].mxu1 }
 0x425   : > { %v5091_v26 = vadd.f32 %v5013_v9, %v11414_v13  ;;  %v5016_v42 = vadd.f32 %v7737_v58, %v7625_v5  ;;  %v7631_v25 = vadd.f32 %v7630_v15, %v7629_v4 }
 0x427   : > { %v5092_v1 = vadd.f32 %v5016_v42, %v11417_v34  ;;  %v7738_v23 = vpop.f32.mrb[244].mxu0 }
 0x428   : > { %v7739_v50 = vpop.f32.mrb[245].mxu0 }
 0x429   : > { %v7740_v59 = vadd.f32 %v7739_v50, %v7738_v23  ;;  %v7741_v21 = vpop.f32.mrb[246].mxu0  ;;  %v5115_v35 = vpack.c.bf16 %v5092_v1, %v5091_v26  ;;  %v7632_v44 = vpop.f32.mrb[248].mxu1 }
 0x42a   : > { %v7742_v53 = vpop.f32.mrb[247].mxu0  ;;  %v7633_v57 = vpop.f32.mrb[249].mxu1 }
 0x42b   : > { %v5021_v49 = vadd.f32 %v7740_v59, %v7628_v62  ;;  %v7743_v0 = vadd.f32 %v7742_v53, %v7741_v21  ;;  %7908 = vmatprep.mubr.bf16.mxu1 %v5115_v35  ;;  %v7634_v20 = vadd.f32 %v7633_v57, %v7632_v44  ;;  %v7635_v28 = vpop.f32.mrb[250].mxu1 }
 0x42c   : > { %v7636_v63 = vpop.f32.mrb[251].mxu1 }
 0x42d   : > { %v5093_v13 = vadd.f32 %v5021_v49, %v11420_v46  ;;  %v5024_v33 = vadd.f32 %v7743_v0, %v7631_v25  ;;  %v7637_v31 = vadd.f32 %v7636_v63, %v7635_v28  ;;  %v8575_v63 = vld [vmem:[#allocation13 + $0x38] sm:$0xff]  }
 0x42f   : > { %v5094_v34 = vadd.f32 %v5024_v33, %v11423_v11  ;;  %v7744_v32 = vpop.f32.mrb[248].mxu0 }
 0x430   : > { %v7745_v22 = vpop.f32.mrb[249].mxu0 }
 0x431   : > { %v5116_v60 = vpack.c.bf16 %v5094_v34, %v5093_v13  ;;  %v7746_v17 = vadd.f32 %v7745_v22, %v7744_v32  ;;  %v7747_v24 = vpop.f32.mrb[250].mxu0  ;;  %v7638_v36 = vpop.f32.mrb[252].mxu1  ;;  %v8574_v13 = vld [vmem:[#allocation13 + $0x30] sm:$0xff]  }
 0x432   : > { %v7748_v43 = vpop.f32.mrb[251].mxu0  ;;  %v7639_v54 = vpop.f32.mrb[253].mxu1  ;;  %7936 = vmatprep.subr.bf16.mxu0 %v8574_v13 }
 0x433   : > { %v5029_v45 = vadd.f32 %v7746_v17, %v7634_v20  ;;  %v7749_v7 = vadd.f32 %v7748_v43, %v7747_v24  ;;  %7909 = vmatmul.mubr.bf16.gmra.mrb[32].mxu1 %v5116_v60  ;;  %v7640_v61 = vadd.f32 %v7639_v54, %v7638_v36  ;;  %v7641_v12 = vpop.f32.mrb[254].mxu1  ;;  %7937 = vmatpush3.bf16.msra.mxu0 %v8574_v13 }
 0x434   : > { %v7642_v56 = vpop.f32.mrb[255].mxu1  ;;  %7938 = vmatprep.subr.bf16.mxu0 %v8575_v63 }
 0x435   : > { %v5095_v46 = vadd.f32 %v5029_v45, %v11426_v52  ;;  %v5032_v47 = vadd.f32 %v7749_v7, %v7637_v31  ;;  %v7643_v9 = vadd.f32 %v7642_v56, %v7641_v12 }
 0x437   : > { %v5096_v11 = vadd.f32 %v5032_v47, %v11429_v16  ;;  %v7750_v8 = vpop.f32.mrb[252].mxu0  ;;  %7939 = vmatpush3.bf16.msra.mxu0 %v8575_v63 }
 0x438   : > { %v7751_v19 = vpop.f32.mrb[253].mxu0 }
 0x439   : > { %v7752_v40 = vadd.f32 %v7751_v19, %v7750_v8  ;;  %v7753_v2 = vpop.f32.mrb[254].mxu0  ;;  %v5117_v6 = vpack.c.bf16 %v5096_v11, %v5095_v46  ;;  %v7644_v26 = vpop.f32.mrb[0].mxu1 }
 0x43a   : > { %v7754_v51 = vpop.f32.mrb[255].mxu0  ;;  %v7645_v1 = vpop.f32.mrb[1].mxu1 }
 0x43b   : > { %v5037_v55 = vadd.f32 %v7752_v40, %v7640_v61  ;;  %v7755_v5 = vadd.f32 %v7754_v51, %v7753_v2  ;;  %7912 = vmatprep.mubr.bf16.mxu1 %v5117_v6  ;;  %v7646_v38 = vadd.f32 %v7645_v1, %v7644_v26  ;;  %v7647_v62 = vpop.f32.mrb[2].mxu1 }
 0x43c   : > { %v7648_v4 = vpop.f32.mrb[3].mxu1 }
 0x43d   : > { %v5097_v52 = vadd.f32 %v5037_v55, %v11432_v27  ;;  %v5040_v58 = vadd.f32 %v7755_v5, %v7643_v9  ;;  %v7649_v15 = vadd.f32 %v7648_v4, %v7647_v62  ;;  %v11493_v4 = vld [vmem:[#allocation12] ss:$0 sm:$0xff] }
 0x43f   : > { %v5098_v16 = vadd.f32 %v5040_v58, %v11435_v29  ;;  %v7756_v42 = vpop.f32.mrb[0].mxu0 }
 0x440   : > { %v7757_v18 = vpop.f32.mrb[1].mxu0 }
 0x441   : > { %v5118_v23 = vpack.c.bf16 %v5098_v16, %v5097_v52  ;;  %v7758_v50 = vadd.f32 %v7757_v18, %v7756_v42  ;;  %v7759_v59 = vpop.f32.mrb[2].mxu0  ;;  %v7650_v25 = vpop.f32.mrb[4].mxu1 }
 0x442   : > { %v7760_v21 = vpop.f32.mrb[3].mxu0  ;;  %v7651_v33 = vpop.f32.mrb[5].mxu1 }
 0x443   : > { %v5045_v35 = vadd.f32 %v7758_v50, %v7646_v38  ;;  %v7761_v53 = vadd.f32 %v7760_v21, %v7759_v59  ;;  %7913 = vmatmul.mubr.bf16.gmra.mrb[36].mxu1 %v5118_v23  ;;  %v7652_v44 = vadd.f32 %v7651_v33, %v7650_v25  ;;  %v7653_v57 = vpop.f32.mrb[6].mxu1 }
 0x444   : > { %v7654_v20 = vpop.f32.mrb[7].mxu1 }
 0x445   : > { %v5099_v27 = vadd.f32 %v5045_v35, %v11438_v39  ;;  %v5048_v49 = vadd.f32 %v7761_v53, %v7649_v15  ;;  %v7655_v24 = vadd.f32 %v7654_v20, %v7653_v57 }
 0x447   : > { %v5100_v29 = vadd.f32 %v5048_v49, %v11441_v14  ;;  %v7762_v0 = vpop.f32.mrb[4].mxu0 }
 0x448   : > { %v7763_v34 = vpop.f32.mrb[5].mxu0 }
 0x449   : > { %v7764_v32 = vadd.f32 %v7763_v34, %v7762_v0  ;;  %v7765_v22 = vpop.f32.mrb[6].mxu0  ;;  %v5119_v60 = vpack.c.bf16 %v5100_v29, %v5099_v27  ;;  %v7656_v31 = vpop.f32.mrb[8].mxu1 }
 0x44a   : > { %v7766_v17 = vpop.f32.mrb[7].mxu0  ;;  %v7657_v46 = vpop.f32.mrb[9].mxu1 }
 0x44b   : > { %v5053_v28 = vadd.f32 %v7764_v32, %v7652_v44  ;;  %v7767_v39 = vadd.f32 %v7766_v17, %v7765_v22  ;;  %7916 = vmatprep.mubr.bf16.mxu1 %v5119_v60  ;;  %v7658_v36 = vadd.f32 %v7657_v46, %v7656_v31  ;;  %v7659_v54 = vpop.f32.mrb[10].mxu1 }
 0x44c   : > { %v7660_v61 = vpop.f32.mrb[11].mxu1 }
 0x44d   : > { %v5101_v14 = vadd.f32 %v5053_v28, %v11444_v37  ;;  %v5056_v43 = vadd.f32 %v7767_v39, %v7655_v24  ;;  %v7661_v2 = vadd.f32 %v7660_v61, %v7659_v54 }
 0x44f   : > { %v5102_v45 = vadd.f32 %v5056_v43, %v11447_v3  ;;  %v7768_v7 = vpop.f32.mrb[8].mxu0 }
 0x450   : > { %v7769_v47 = vpop.f32.mrb[9].mxu0 }
 0x451   : > { %v5120_v11 = vpack.c.bf16 %v5102_v45, %v5101_v14  ;;  %v7770_v8 = vadd.f32 %v7769_v47, %v7768_v7  ;;  %v7771_v19 = vpop.f32.mrb[10].mxu0  ;;  %v7662_v51 = vpop.f32.mrb[12].mxu1 }
 0x452   : > { %v7772_v40 = vpop.f32.mrb[11].mxu0  ;;  %v7663_v9 = vpop.f32.mrb[13].mxu1 }
 0x453   : > { %v5061_v12 = vadd.f32 %v7770_v8, %v7658_v36  ;;  %v7773_v6 = vadd.f32 %v7772_v40, %v7771_v19  ;;  %7917 = vmatmul.mubr.bf16.gmra.mrb[40].mxu1 %v5120_v11  ;;  %v7664_v52 = vadd.f32 %v7663_v9, %v7662_v51  ;;  %v7665_v16 = vpop.f32.mrb[14].mxu1 }
 0x454   : > { %v7666_v1 = vpop.f32.mrb[15].mxu1 }
 0x455   : > { %v5103_v37 = vadd.f32 %v5061_v12, %v11450_v48  ;;  %v5064_v56 = vadd.f32 %v7773_v6, %v7661_v2  ;;  %v7667_v38 = vadd.f32 %v7666_v1, %v7665_v16 }
 0x457   : > { %v5104_v3 = vadd.f32 %v5064_v56, %v11453_v30  ;;  %v7774_v55 = vpop.f32.mrb[12].mxu0 }
 0x458   : > { %v7775_v5 = vpop.f32.mrb[13].mxu0 }
 0x459   : > { %v7776_v58 = vadd.f32 %v7775_v5, %v7774_v55  ;;  %v7777_v26 = vpop.f32.mrb[14].mxu0  ;;  %v5121_v42 = vpack.c.bf16 %v5104_v3, %v5103_v37 }
 0x45a   : > { %v7778_v18 = vpop.f32.mrb[15].mxu0 }
 0x45b   : > { %v5069_v23 = vadd.f32 %v7776_v58, %v7664_v52  ;;  %v7779_v50 = vadd.f32 %v7778_v18, %v7777_v26  ;;  %7920 = vmatprep.mubr.bf16.mxu1 %v5121_v42 }
 0x45d   : > { %v5105_v48 = vadd.f32 %v5069_v23, %v11456_v10  ;;  %v5072_v62 = vadd.f32 %v7779_v50, %v7667_v38 }
 0x45f   : > { %v5106_v30 = vadd.f32 %v5072_v62, %v11459_v41 }
 0x461   : > { %v5122_v59 = vpack.c.bf16 %v5106_v30, %v5105_v48 }
 0x463   : > { %7921 = vmatmul.mubr.bf16.gmra.mrb[44].mxu1 %v5122_v59 }
 0x4c6   : > { %v7894_v21 = vpop.f32.mrb[16].mxu1 }
 0x4c7   : > { %v5237_v35 = vadd.f32 %v7894_v21, %v11493_v4  ;;  %v5228_v15 = vpop.f32.mrb[17].mxu1 }
 0x4c8   : > { %v5229_v53 = vadd.f32 %v11493_v4, %v5228_v15  ;;  %v7895_v27 = vpop.f32.mrb[18].mxu1 }
 0x4c9   : > { %v5240_v49 = vadd.f32 %v7895_v27, %v11493_v4  ;;  %v5231_v29 = vpop.f32.mrb[19].mxu1  ;;  %v5357_v10 = vmax.f32 %v5237_v35, 0.0 }
 0x4ca   : > { %v5232_v25 = vadd.f32 %v11493_v4, %v5231_v29  ;;  %v5355_v13 = vmax.f32 %v5229_v53, 0.0 }
 0x4cb   : > { %v5358_v0 = vmax.f32 %v5240_v49, 0.0 }
 0x4cc   : > { %v5356_v41 = vmax.f32 %v5232_v25, 0.0 }
 0x4cd   : > { %v5388_v33 = vpack.c.bf16 %v5358_v0, %v5357_v10 }
 0x4ce   : > { %v5387_v34 = vpack.c.bf16 %v5356_v41, %v5355_v13 }
 0x4d0   : > { %7940 = vmatprep.mubr.bf16.mxu0 %v5387_v34 }
 0x4d1   : > { %7941 = vmatmul.mubr.bf16.vlgmr.msra.gmra.mrb[16].mxu0 %v5388_v33 }
 0x4d6   : > { %v7898_v44 = vpop.f32.mrb[20].mxu1 }
 0x4d7   : > { %v5253_v32 = vadd.f32 %v7898_v44, %v11493_v4  ;;  %v5244_v57 = vpop.f32.mrb[21].mxu1 }
 0x4d8   : > { %v5245_v22 = vadd.f32 %v11493_v4, %v5244_v57  ;;  %v7899_v60 = vpop.f32.mrb[22].mxu1 }
 0x4d9   : > { %v5256_v20 = vadd.f32 %v7899_v60, %v11493_v4  ;;  %v5247_v17 = vpop.f32.mrb[23].mxu1  ;;  %v5361_v24 = vmax.f32 %v5253_v32, 0.0 }
 0x4da   : > { %v5248_v28 = vadd.f32 %v11493_v4, %v5247_v17  ;;  %v5359_v63 = vmax.f32 %v5245_v22, 0.0 }
 0x4db   : > { %v5362_v39 = vmax.f32 %v5256_v20, 0.0 }
 0x4dc   : > { %v5360_v14 = vmax.f32 %v5248_v28, 0.0 }
 0x4dd   : > { %v5390_v43 = vpack.c.bf16 %v5362_v39, %v5361_v24 }
 0x4de   : > { %v5389_v45 = vpack.c.bf16 %v5360_v14, %v5359_v63 }
 0x4e0   : > { %7944 = vmatprep.mubr.bf16.mxu0 %v5389_v45 }
 0x4e1   : > { %7945 = vmatmul.mubr.bf16.gmra.mrb[20].mxu0 %v5390_v43 }
 0x4e6   : > { %v7902_v31 = vpop.f32.mrb[24].mxu1 }
 0x4e7   : > { %v5269_v7 = vadd.f32 %v7902_v31, %v11493_v4  ;;  %v5260_v46 = vpop.f32.mrb[25].mxu1 }
 0x4e8   : > { %v5261_v47 = vadd.f32 %v11493_v4, %v5260_v46  ;;  %v7903_v11 = vpop.f32.mrb[26].mxu1 }
 0x4e9   : > { %v5272_v36 = vadd.f32 %v7903_v11, %v11493_v4  ;;  %v5263_v8 = vpop.f32.mrb[27].mxu1  ;;  %v5365_v19 = vmax.f32 %v5269_v7, 0.0 }
 0x4ea   : > { %v5264_v54 = vadd.f32 %v11493_v4, %v5263_v8  ;;  %v5363_v40 = vmax.f32 %v5261_v47, 0.0 }
 0x4eb   : > { %v5366_v61 = vmax.f32 %v5272_v36, 0.0 }
 0x4ec   : > { %v5364_v12 = vmax.f32 %v5264_v54, 0.0 }
 0x4ed   : > { %v5392_v2 = vpack.c.bf16 %v5366_v61, %v5365_v19 }
 0x4ee   : > { %v5391_v6 = vpack.c.bf16 %v5364_v12, %v5363_v40 }
 0x4f0   : > { %7948 = vmatprep.mubr.bf16.mxu0 %v5391_v6 }
 0x4f1   : > { %7949 = vmatmul.mubr.bf16.gmra.mrb[24].mxu0 %v5392_v2 }
 0x4f6   : > { %v7906_v37 = vpop.f32.mrb[28].mxu1 }
 0x4f7   : > { %v5285_v56 = vadd.f32 %v7906_v37, %v11493_v4  ;;  %v5276_v3 = vpop.f32.mrb[29].mxu1 }
 0x4f8   : > { %v5277_v51 = vadd.f32 %v11493_v4, %v5276_v3  ;;  %v7907_v55 = vpop.f32.mrb[30].mxu1 }
 0x4f9   : > { %v5288_v9 = vadd.f32 %v7907_v55, %v11493_v4  ;;  %v5279_v5 = vpop.f32.mrb[31].mxu1  ;;  %v5369_v58 = vmax.f32 %v5285_v56, 0.0 }
 0x4fa   : > { %v5280_v52 = vadd.f32 %v11493_v4, %v5279_v5  ;;  %v5367_v26 = vmax.f32 %v5277_v51, 0.0 }
 0x4fb   : > { %v5370_v16 = vmax.f32 %v5288_v9, 0.0 }
 0x4fc   : > { %v5368_v42 = vmax.f32 %v5280_v52, 0.0  ;;  %v11527_v52 = vld [vmem:[#allocation15] ss:$0 sm:$0xff] }
 0x4fd   : > { %v5394_v1 = vpack.c.bf16 %v5370_v16, %v5369_v58 }
 0x4fe   : > { %v5393_v18 = vpack.c.bf16 %v5368_v42, %v5367_v26  ;;  %v11530_v42 = vld [vmem:[#allocation16] ss:$0 sm:$0xff] }
 0x500   : > { %7952 = vmatprep.mubr.bf16.mxu0 %v5393_v18 }
 0x501   : > { %7953 = vmatmul.mubr.bf16.gmra.mrb[28].mxu0 %v5394_v1 }
 0x506   : > { %v7910_v23 = vpop.f32.mrb[32].mxu1 }
 0x507   : > { %v5301_v38 = vadd.f32 %v7910_v23, %v11493_v4  ;;  %v5292_v50 = vpop.f32.mrb[33].mxu1 }
 0x508   : > { %v5293_v48 = vadd.f32 %v11493_v4, %v5292_v50  ;;  %v7911_v62 = vpop.f32.mrb[34].mxu1  ;;  %v11534_v50 = vld [vmem:[#allocation18] ss:$0 sm:$0xff] }
 0x509   : > { %v5304_v30 = vadd.f32 %v7911_v62, %v11493_v4  ;;  %v5295_v59 = vpop.f32.mrb[35].mxu1  ;;  %v5373_v35 = vmax.f32 %v5301_v38, 0.0 }
 0x50a   : > { %v5296_v21 = vadd.f32 %v11493_v4, %v5295_v59  ;;  %v5371_v53 = vmax.f32 %v5293_v48, 0.0 }
 0x50b   : > { %v5374_v15 = vmax.f32 %v5304_v30, 0.0 }
 0x50c   : > { %v5372_v27 = vmax.f32 %v5296_v21, 0.0 }
 0x50d   : > { %v5396_v49 = vpack.c.bf16 %v5374_v15, %v5373_v35 }
 0x50e   : > { %v5395_v29 = vpack.c.bf16 %v5372_v27, %v5371_v53 }
 0x510   : > { %7956 = vmatprep.mubr.bf16.mxu0 %v5395_v29 }
 0x511   : > { %7957 = vmatmul.mubr.bf16.gmra.mrb[32].mxu0 %v5396_v49 }
 0x516   : > { %v7914_v25 = vpop.f32.mrb[36].mxu1 }
 0x517   : > { %v5317_v10 = vadd.f32 %v7914_v25, %v11493_v4  ;;  %v5308_v0 = vpop.f32.mrb[37].mxu1 }
 0x518   : > { %v5309_v13 = vadd.f32 %v11493_v4, %v5308_v0  ;;  %v7915_v41 = vpop.f32.mrb[38].mxu1 }
 0x519   : > { %v5320_v33 = vadd.f32 %v7915_v41, %v11493_v4  ;;  %v5311_v34 = vpop.f32.mrb[39].mxu1  ;;  %v5377_v32 = vmax.f32 %v5317_v10, 0.0 }
 0x51a   : > { %v5312_v44 = vadd.f32 %v11493_v4, %v5311_v34  ;;  %v5375_v22 = vmax.f32 %v5309_v13, 0.0 }
 0x51b   : > { %v5378_v57 = vmax.f32 %v5320_v33, 0.0 }
 0x51c   : > { %v5376_v60 = vmax.f32 %v5312_v44, 0.0 }
 0x51d   : > { %v5398_v20 = vpack.c.bf16 %v5378_v57, %v5377_v32 }
 0x51e   : > { %v5397_v17 = vpack.c.bf16 %v5376_v60, %v5375_v22 }
 0x520   : > { %7960 = vmatprep.mubr.bf16.mxu0 %v5397_v17 }
 0x521   : > { %7961 = vmatmul.mubr.bf16.gmra.mrb[36].mxu0 %v5398_v20 }
 0x526   : > { %v7918_v28 = vpop.f32.mrb[40].mxu1 }
 0x527   : > { %v5333_v24 = vadd.f32 %v7918_v28, %v11493_v4  ;;  %v5324_v39 = vpop.f32.mrb[41].mxu1 }
 0x528   : > { %v5325_v63 = vadd.f32 %v11493_v4, %v5324_v39  ;;  %v7919_v14 = vpop.f32.mrb[42].mxu1 }
 0x529   : > { %v5336_v43 = vadd.f32 %v7919_v14, %v11493_v4  ;;  %v5327_v45 = vpop.f32.mrb[43].mxu1  ;;  %v5381_v7 = vmax.f32 %v5333_v24, 0.0 }
 0x52a   : > { %v5328_v31 = vadd.f32 %v11493_v4, %v5327_v45  ;;  %v5379_v47 = vmax.f32 %v5325_v63, 0.0 }
 0x52b   : > { %v5382_v46 = vmax.f32 %v5336_v43, 0.0 }
 0x52c   : > { %v5380_v11 = vmax.f32 %v5328_v31, 0.0 }
 0x52d   : > { %v5400_v36 = vpack.c.bf16 %v5382_v46, %v5381_v7 }
 0x52e   : > { %v5399_v8 = vpack.c.bf16 %v5380_v11, %v5379_v47 }
 0x530   : > { %7964 = vmatprep.mubr.bf16.mxu0 %v5399_v8 }
 0x531   : > { %7965 = vmatmul.mubr.bf16.gmra.mrb[40].mxu0 %v5400_v36 }
 0x536   : > { %v7922_v54 = vpop.f32.mrb[44].mxu1 }
 0x537   : > { %v5349_v19 = vadd.f32 %v7922_v54, %v11493_v4  ;;  %v5340_v61 = vpop.f32.mrb[45].mxu1 }
 0x538   : > { %v5341_v40 = vadd.f32 %v11493_v4, %v5340_v61  ;;  %v7923_v12 = vpop.f32.mrb[46].mxu1 }
 0x539   : > { %v5352_v2 = vadd.f32 %v7923_v12, %v11493_v4  ;;  %v5343_v6 = vpop.f32.mrb[47].mxu1  ;;  %v5385_v56 = vmax.f32 %v5349_v19, 0.0 }
 0x53a   : > { %v5344_v37 = vadd.f32 %v11493_v4, %v5343_v6  ;;  %v5383_v51 = vmax.f32 %v5341_v40, 0.0 }
 0x53b   : > { %v5386_v3 = vmax.f32 %v5352_v2, 0.0 }
 0x53c   : > { %v5384_v55 = vmax.f32 %v5344_v37, 0.0 }
 0x53d   : > { %v5402_v9 = vpack.c.bf16 %v5386_v3, %v5385_v56 }
 0x53e   : > { %v5401_v5 = vpack.c.bf16 %v5384_v55, %v5383_v51 }
 0x540   : > { %7968 = vmatprep.mubr.bf16.mxu0 %v5401_v5 }
 0x541   : > { %7969 = vmatmul.mubr.bf16.gmra.mrb[44].mxu0 %v5402_v9 }
 0x5a4   : > { %v7942_v58 = vpop.f32.mrb[16].mxu0 }
 0x5a5   : > { %v5517_v16 = vadd.f32 %v7942_v58, %v11527_v52  ;;  %v5508_v26 = vpop.f32.mrb[17].mxu0 }
 0x5a6   : > { %v5509_v1 = vadd.f32 %v11527_v52, %v5508_v26  ;;  %v7943_v18 = vpop.f32.mrb[18].mxu0 }
 0x5a7   : > { %v5637_v4 = vmax.f32 %v5517_v16, 0.0  ;;  %v5520_v23 = vadd.f32 %v7943_v18, %v11527_v52  ;;  %v5511_v38 = vpop.f32.mrb[19].mxu0 }
 0x5a8   : > { %v5635_v48 = vmax.f32 %v5509_v1, 0.0  ;;  %v5512_v62 = vadd.f32 %v11527_v52, %v5511_v38 }
 0x5a9   : > { %v5676_v30 = vmul.f32 %v11530_v42, %v5637_v4  ;;  %v5638_v59 = vmax.f32 %v5520_v23, 0.0 }
 0x5aa   : > { %v5674_v21 = vmul.f32 %v11530_v42, %v5635_v48  ;;  %v5636_v35 = vmax.f32 %v5512_v62, 0.0 }
 0x5ab   : > { %v5715_v15 = vadd.f32 %v11534_v50, %v5676_v30  ;;  %v5677_v53 = vmul.f32 %v11530_v42, %v5638_v59 }
 0x5ac   : > { %v5713_v27 = vadd.f32 %v11534_v50, %v5674_v21  ;;  %v5675_v49 = vmul.f32 %v11530_v42, %v5636_v35 }
 0x5ad   : > { %v5747_v29 = vmax.f32 %v5715_v15, 0.0  ;;  %v5716_v25 = vadd.f32 %v11534_v50, %v5677_v53 }
 0x5ae   : > { %v5745_v10 = vmax.f32 %v5713_v27, 0.0  ;;  %v5714_v0 = vadd.f32 %v11534_v50, %v5675_v49 }
 0x5af   : > { %5779 = vst [vmem:[%s11547_s16 + $0x10] sm:$0xff] %v5747_v29  ;;  %v5748_v13 = vmax.f32 %v5716_v25, 0.0 }
 0x5b0   : > { %5777 = vst [vmem:[%s11547_s16] sm:$0xff] %v5745_v10  ;;  %v5746_v41 = vmax.f32 %v5714_v0, 0.0 }
 0x5b1   : > { %5780 = vst [vmem:[%s11547_s16 + $0x18] sm:$0xff] %v5748_v13 }
 0x5b2   : > { %5778 = vst [vmem:[%s11547_s16 + $0x8] sm:$0xff] %v5746_v41 }
 0x5b4   : > { %v7946_v33 = vpop.f32.mrb[20].mxu0 }
 0x5b5   : > { %v5533_v34 = vadd.f32 %v7946_v33, %v11527_v52  ;;  %v5524_v44 = vpop.f32.mrb[21].mxu0 }
 0x5b6   : > { %v5525_v32 = vadd.f32 %v11527_v52, %v5524_v44  ;;  %v7947_v57 = vpop.f32.mrb[22].mxu0 }
 0x5b7   : > { %v5641_v22 = vmax.f32 %v5533_v34, 0.0  ;;  %v5536_v60 = vadd.f32 %v7947_v57, %v11527_v52  ;;  %v5527_v20 = vpop.f32.mrb[23].mxu0 }
 0x5b8   : > { %v5639_v17 = vmax.f32 %v5525_v32, 0.0  ;;  %v5528_v28 = vadd.f32 %v11527_v52, %v5527_v20 }
 0x5b9   : > { %v5680_v24 = vmul.f32 %v11530_v42, %v5641_v22  ;;  %v5642_v39 = vmax.f32 %v5536_v60, 0.0 }
 0x5ba   : > { %v5678_v63 = vmul.f32 %v11530_v42, %v5639_v17  ;;  %v5640_v14 = vmax.f32 %v5528_v28, 0.0 }
 0x5bb   : > { %v5719_v43 = vadd.f32 %v11534_v50, %v5680_v24  ;;  %v5681_v45 = vmul.f32 %v11530_v42, %v5642_v39 }
 0x5bc   : > { %v5717_v31 = vadd.f32 %v11534_v50, %v5678_v63  ;;  %v5679_v7 = vmul.f32 %v11530_v42, %v5640_v14 }
 0x5bd   : > { %v5751_v46 = vmax.f32 %v5719_v43, 0.0  ;;  %v5720_v47 = vadd.f32 %v11534_v50, %v5681_v45 }
 0x5be   : > { %v5749_v11 = vmax.f32 %v5717_v31, 0.0  ;;  %v5718_v36 = vadd.f32 %v11534_v50, %v5679_v7 }
 0x5bf   : > { %5783 = vst [vmem:[%s11547_s16 + $0x30] sm:$0xff] %v5751_v46  ;;  %v5752_v8 = vmax.f32 %v5720_v47, 0.0 }
 0x5c0   : > { %5781 = vst [vmem:[%s11547_s16 + $0x20] sm:$0xff] %v5749_v11  ;;  %v5750_v54 = vmax.f32 %v5718_v36, 0.0 }
 0x5c1   : > { %5784 = vst [vmem:[%s11547_s16 + $0x38] sm:$0xff] %v5752_v8 }
 0x5c2   : > { %5782 = vst [vmem:[%s11547_s16 + $0x28] sm:$0xff] %v5750_v54 }
 0x5c4   : > { %v7950_v19 = vpop.f32.mrb[24].mxu0 }
 0x5c5   : > { %v5549_v61 = vadd.f32 %v7950_v19, %v11527_v52  ;;  %v5540_v40 = vpop.f32.mrb[25].mxu0 }
 0x5c6   : > { %v5541_v12 = vadd.f32 %v11527_v52, %v5540_v40  ;;  %v7951_v2 = vpop.f32.mrb[26].mxu0 }
 0x5c7   : > { %v5645_v6 = vmax.f32 %v5549_v61, 0.0  ;;  %v5552_v37 = vadd.f32 %v7951_v2, %v11527_v52  ;;  %v5543_v56 = vpop.f32.mrb[27].mxu0 }
 0x5c8   : > { %v5643_v3 = vmax.f32 %v5541_v12, 0.0  ;;  %v5544_v51 = vadd.f32 %v11527_v52, %v5543_v56 }
 0x5c9   : > { %v5684_v55 = vmul.f32 %v11530_v42, %v5645_v6  ;;  %v5646_v9 = vmax.f32 %v5552_v37, 0.0 }
 0x5ca   : > { %v5682_v5 = vmul.f32 %v11530_v42, %v5643_v3  ;;  %v5644_v58 = vmax.f32 %v5544_v51, 0.0 }
 0x5cb   : > { %v5723_v16 = vadd.f32 %v11534_v50, %v5684_v55  ;;  %v5685_v26 = vmul.f32 %v11530_v42, %v5646_v9 }
 0x5cc   : > { %v5721_v1 = vadd.f32 %v11534_v50, %v5682_v5  ;;  %v5683_v18 = vmul.f32 %v11530_v42, %v5644_v58 }
 0x5cd   : > { %v5755_v4 = vmax.f32 %v5723_v16, 0.0  ;;  %v5724_v23 = vadd.f32 %v11534_v50, %v5685_v26 }
 0x5ce   : > { %v5753_v38 = vmax.f32 %v5721_v1, 0.0  ;;  %v5722_v48 = vadd.f32 %v11534_v50, %v5683_v18 }
 0x5cf   : > { %5787 = vst [vmem:[%s11547_s16 + $0x50] sm:$0xff] %v5755_v4  ;;  %v5756_v62 = vmax.f32 %v5724_v23, 0.0 }
 0x5d0   : > { %5785 = vst [vmem:[%s11547_s16 + $0x40] sm:$0xff] %v5753_v38  ;;  %v5754_v30 = vmax.f32 %v5722_v48, 0.0 }
 0x5d1   : > { %5788 = vst [vmem:[%s11547_s16 + $0x58] sm:$0xff] %v5756_v62 }
 0x5d2   : > { %5786 = vst [vmem:[%s11547_s16 + $0x48] sm:$0xff] %v5754_v30 }
 0x5d4   : > { %v7954_v59 = vpop.f32.mrb[28].mxu0 }
 0x5d5   : > { %v5565_v21 = vadd.f32 %v7954_v59, %v11527_v52  ;;  %v5556_v35 = vpop.f32.mrb[29].mxu0 }
 0x5d6   : > { %v5557_v15 = vadd.f32 %v11527_v52, %v5556_v35  ;;  %v7955_v53 = vpop.f32.mrb[30].mxu0 }
 0x5d7   : > { %v5649_v27 = vmax.f32 %v5565_v21, 0.0  ;;  %v5568_v49 = vadd.f32 %v7955_v53, %v11527_v52  ;;  %v5559_v29 = vpop.f32.mrb[31].mxu0 }
 0x5d8   : > { %v5647_v25 = vmax.f32 %v5557_v15, 0.0  ;;  %v5560_v10 = vadd.f32 %v11527_v52, %v5559_v29 }
 0x5d9   : > { %v5688_v0 = vmul.f32 %v11530_v42, %v5649_v27  ;;  %v5650_v13 = vmax.f32 %v5568_v49, 0.0 }
 0x5da   : > { %v5686_v41 = vmul.f32 %v11530_v42, %v5647_v25  ;;  %v5648_v33 = vmax.f32 %v5560_v10, 0.0 }
 0x5db   : > { %v5727_v34 = vadd.f32 %v11534_v50, %v5688_v0  ;;  %v5689_v44 = vmul.f32 %v11530_v42, %v5650_v13 }
 0x5dc   : > { %v5725_v32 = vadd.f32 %v11534_v50, %v5686_v41  ;;  %v5687_v57 = vmul.f32 %v11530_v42, %v5648_v33 }
 0x5dd   : > { %v5759_v22 = vmax.f32 %v5727_v34, 0.0  ;;  %v5728_v60 = vadd.f32 %v11534_v50, %v5689_v44 }
 0x5de   : > { %v5757_v20 = vmax.f32 %v5725_v32, 0.0  ;;  %v5726_v17 = vadd.f32 %v11534_v50, %v5687_v57 }
 0x5df   : > { %5791 = vst [vmem:[%s11547_s16 + $0x70] sm:$0xff] %v5759_v22  ;;  %v5760_v28 = vmax.f32 %v5728_v60, 0.0 }
 0x5e0   : > { %5789 = vst [vmem:[%s11547_s16 + $0x60] sm:$0xff] %v5757_v20  ;;  %v5758_v24 = vmax.f32 %v5726_v17, 0.0 }
 0x5e1   : > { %5792 = vst [vmem:[%s11547_s16 + $0x78] sm:$0xff] %v5760_v28 }
 0x5e2   : > { %5790 = vst [vmem:[%s11547_s16 + $0x68] sm:$0xff] %v5758_v24 }
 0x5e4   : > { %v7958_v39 = vpop.f32.mrb[32].mxu0 }
 0x5e5   : > { %v5581_v63 = vadd.f32 %v7958_v39, %v11527_v52  ;;  %v5572_v14 = vpop.f32.mrb[33].mxu0 }
 0x5e6   : > { %v5573_v43 = vadd.f32 %v11527_v52, %v5572_v14  ;;  %v7959_v45 = vpop.f32.mrb[34].mxu0 }
 0x5e7   : > { %v5653_v31 = vmax.f32 %v5581_v63, 0.0  ;;  %v5584_v7 = vadd.f32 %v7959_v45, %v11527_v52  ;;  %v5575_v46 = vpop.f32.mrb[35].mxu0 }
 0x5e8   : > { %v5651_v47 = vmax.f32 %v5573_v43, 0.0  ;;  %v5576_v11 = vadd.f32 %v11527_v52, %v5575_v46 }
 0x5e9   : > { %v5692_v36 = vmul.f32 %v11530_v42, %v5653_v31  ;;  %v5654_v8 = vmax.f32 %v5584_v7, 0.0 }
 0x5ea   : > { %v5690_v54 = vmul.f32 %v11530_v42, %v5651_v47  ;;  %v5652_v19 = vmax.f32 %v5576_v11, 0.0 }
 0x5eb   : > { %v5731_v61 = vadd.f32 %v11534_v50, %v5692_v36  ;;  %v5693_v40 = vmul.f32 %v11530_v42, %v5654_v8 }
 0x5ec   : > { %v5729_v12 = vadd.f32 %v11534_v50, %v5690_v54  ;;  %v5691_v2 = vmul.f32 %v11530_v42, %v5652_v19 }
 0x5ed   : > { %v5763_v6 = vmax.f32 %v5731_v61, 0.0  ;;  %v5732_v37 = vadd.f32 %v11534_v50, %v5693_v40 }
 0x5ee   : > { %v5761_v56 = vmax.f32 %v5729_v12, 0.0  ;;  %v5730_v3 = vadd.f32 %v11534_v50, %v5691_v2 }
 0x5ef   : > { %5795 = vst [vmem:[%s11547_s16 + $0x90] sm:$0xff] %v5763_v6  ;;  %v5764_v51 = vmax.f32 %v5732_v37, 0.0 }
 0x5f0   : > { %5793 = vst [vmem:[%s11547_s16 + $0x80] sm:$0xff] %v5761_v56  ;;  %v5762_v55 = vmax.f32 %v5730_v3, 0.0 }
 0x5f1   : > { %5796 = vst [vmem:[%s11547_s16 + $0x98] sm:$0xff] %v5764_v51 }
 0x5f2   : > { %5794 = vst [vmem:[%s11547_s16 + $0x88] sm:$0xff] %v5762_v55 }
 0x5f4   : > { %v7962_v9 = vpop.f32.mrb[36].mxu0 }
 0x5f5   : > { %v5597_v5 = vadd.f32 %v7962_v9, %v11527_v52  ;;  %v5588_v58 = vpop.f32.mrb[37].mxu0 }
 0x5f6   : > { %v5589_v16 = vadd.f32 %v11527_v52, %v5588_v58  ;;  %v7963_v26 = vpop.f32.mrb[38].mxu0 }
 0x5f7   : > { %v5657_v1 = vmax.f32 %v5597_v5, 0.0  ;;  %v5600_v18 = vadd.f32 %v7963_v26, %v11527_v52  ;;  %v5591_v4 = vpop.f32.mrb[39].mxu0 }
 0x5f8   : > { %v5655_v23 = vmax.f32 %v5589_v16, 0.0  ;;  %v5592_v38 = vadd.f32 %v11527_v52, %v5591_v4 }
 0x5f9   : > { %v5696_v48 = vmul.f32 %v11530_v42, %v5657_v1  ;;  %v5658_v62 = vmax.f32 %v5600_v18, 0.0 }
 0x5fa   : > { %v5694_v30 = vmul.f32 %v11530_v42, %v5655_v23  ;;  %v5656_v59 = vmax.f32 %v5592_v38, 0.0 }
 0x5fb   : > { %v5735_v21 = vadd.f32 %v11534_v50, %v5696_v48  ;;  %v5697_v35 = vmul.f32 %v11530_v42, %v5658_v62 }
 0x5fc   : > { %v5733_v15 = vadd.f32 %v11534_v50, %v5694_v30  ;;  %v5695_v53 = vmul.f32 %v11530_v42, %v5656_v59 }
 0x5fd   : > { %v5767_v27 = vmax.f32 %v5735_v21, 0.0  ;;  %v5736_v49 = vadd.f32 %v11534_v50, %v5697_v35 }
 0x5fe   : > { %v5765_v29 = vmax.f32 %v5733_v15, 0.0  ;;  %v5734_v25 = vadd.f32 %v11534_v50, %v5695_v53 }
 0x5ff   : > { %5799 = vst [vmem:[%s11547_s16 + $0xb0] sm:$0xff] %v5767_v27  ;;  %v5768_v10 = vmax.f32 %v5736_v49, 0.0 }
 0x600   : > { %5797 = vst [vmem:[%s11547_s16 + $0xa0] sm:$0xff] %v5765_v29  ;;  %v5766_v0 = vmax.f32 %v5734_v25, 0.0 }
 0x601   : > { %5800 = vst [vmem:[%s11547_s16 + $0xb8] sm:$0xff] %v5768_v10 }
 0x602   : > { %5798 = vst [vmem:[%s11547_s16 + $0xa8] sm:$0xff] %v5766_v0 }
 0x604   : > { %v7966_v13 = vpop.f32.mrb[40].mxu0 }
 0x605   : > { %v5613_v41 = vadd.f32 %v7966_v13, %v11527_v52  ;;  %v5604_v33 = vpop.f32.mrb[41].mxu0 }
 0x606   : > { %v5605_v34 = vadd.f32 %v11527_v52, %v5604_v33  ;;  %v7967_v44 = vpop.f32.mrb[42].mxu0 }
 0x607   : > { %v5661_v32 = vmax.f32 %v5613_v41, 0.0  ;;  %v5616_v57 = vadd.f32 %v7967_v44, %v11527_v52  ;;  %v5607_v22 = vpop.f32.mrb[43].mxu0 }
 0x608   : > { %v5659_v60 = vmax.f32 %v5605_v34, 0.0  ;;  %v5608_v20 = vadd.f32 %v11527_v52, %v5607_v22 }
 0x609   : > { %v5700_v17 = vmul.f32 %v11530_v42, %v5661_v32  ;;  %v5662_v28 = vmax.f32 %v5616_v57, 0.0 }
 0x60a   : > { %v5698_v24 = vmul.f32 %v11530_v42, %v5659_v60  ;;  %v5660_v39 = vmax.f32 %v5608_v20, 0.0 }
 0x60b   : > { %v5739_v63 = vadd.f32 %v11534_v50, %v5700_v17  ;;  %v5701_v14 = vmul.f32 %v11530_v42, %v5662_v28 }
 0x60c   : > { %v5737_v43 = vadd.f32 %v11534_v50, %v5698_v24  ;;  %v5699_v45 = vmul.f32 %v11530_v42, %v5660_v39 }
 0x60d   : > { %v5771_v31 = vmax.f32 %v5739_v63, 0.0  ;;  %v5740_v7 = vadd.f32 %v11534_v50, %v5701_v14 }
 0x60e   : > { %v5769_v46 = vmax.f32 %v5737_v43, 0.0  ;;  %v5738_v47 = vadd.f32 %v11534_v50, %v5699_v45 }
 0x60f   : > { %5803 = vst [vmem:[%s11547_s16 + $0xd0] sm:$0xff] %v5771_v31  ;;  %v5772_v11 = vmax.f32 %v5740_v7, 0.0 }
 0x610   : > { %5801 = vst [vmem:[%s11547_s16 + $0xc0] sm:$0xff] %v5769_v46  ;;  %v5770_v36 = vmax.f32 %v5738_v47, 0.0 }
 0x611   : > { %5804 = vst [vmem:[%s11547_s16 + $0xd8] sm:$0xff] %v5772_v11 }
 0x612   : > { %5802 = vst [vmem:[%s11547_s16 + $0xc8] sm:$0xff] %v5770_v36 }
 0x614   : > { %v7970_v8 = vpop.f32.mrb[44].mxu0 }
 0x615   : > { %v5629_v54 = vadd.f32 %v7970_v8, %v11527_v52  ;;  %v5620_v19 = vpop.f32.mrb[45].mxu0 }
 0x616   : > { %v5621_v61 = vadd.f32 %v11527_v52, %v5620_v19  ;;  %v7971_v40 = vpop.f32.mrb[46].mxu0 }
 0x617   : > { %v5665_v12 = vmax.f32 %v5629_v54, 0.0  ;;  %v5632_v2 = vadd.f32 %v7971_v40, %v11527_v52  ;;  %v5623_v6 = vpop.f32.mrb[47].mxu0 }
 0x618   : > { %v5663_v37 = vmax.f32 %v5621_v61, 0.0  ;;  %v5624_v56 = vadd.f32 %v11527_v52, %v5623_v6 }
 0x619   : > { %v5704_v3 = vmul.f32 %v11530_v42, %v5665_v12  ;;  %v5666_v51 = vmax.f32 %v5632_v2, 0.0 }
 0x61a   : > { %v5702_v55 = vmul.f32 %v11530_v42, %v5663_v37  ;;  %v5664_v9 = vmax.f32 %v5624_v56, 0.0 }
 0x61b   : > { %v5743_v5 = vadd.f32 %v11534_v50, %v5704_v3  ;;  %v5705_v58 = vmul.f32 %v11530_v42, %v5666_v51 }
 0x61c   : > { %v5741_v16 = vadd.f32 %v11534_v50, %v5702_v55  ;;  %v5703_v26 = vmul.f32 %v11530_v42, %v5664_v9 }
 0x61d   : > { %v5775_v52 = vmax.f32 %v5743_v5, 0.0  ;;  %v5744_v1 = vadd.f32 %v11534_v50, %v5705_v58 }
 0x61e   : > { %v5773_v18 = vmax.f32 %v5741_v16, 0.0  ;;  %v5742_v4 = vadd.f32 %v11534_v50, %v5703_v26 }
 0x61f   : > { %5807 = vst [vmem:[%s11547_s16 + $0xf0] sm:$0xff] %v5775_v52  ;;  %v5776_v23 = vmax.f32 %v5744_v1, 0.0 }
 0x620   : > { %5805 = vst [vmem:[%s11547_s16 + $0xe0] sm:$0xff] %v5773_v18  ;;  %v5774_v42 = vmax.f32 %v5742_v4, 0.0 }
 0x621   : > { %5808 = vst [vmem:[%s11547_s16 + $0xf8] sm:$0xff] %v5776_v23 }
 0x622   : > { %5806 = vst [vmem:[%s11547_s16 + $0xe8] sm:$0xff] %v5774_v42 }
 0x623   : > { %8869 = shalt.err (!%p8866_p2)
}
 0x624   : > { %s8870_s26 = scalar_lea.hbm %s11667_s14, 4096  ;;  %s8874_s29 = scalar_lea.hbm %s12065_s30, 8192 }
 0x625   : > { %p8871_p5 = scmp.ne.s32.totalorder %s11667_s14, %s8870_s26  ;;  %p8875_p6 = scmp.lt.u32.totalorder %s11667_s14, %s12065_s30 }
 0x626   : > { %p8876_p13 = scmp.lt.u32.totalorder %s8874_s29, %s8870_s26  ;;  %p8878_p0 = scmp.lt.u32.totalorder %s8870_s26, %s11667_s14 }
 0x627   : > { %p8872_p11 = pnand %p8871_p5, %p12066_p8 }
 0x628   : > { %p8877_p12 = por %p8876_p13, %p8875_p6 }
 0x629   : > { %p8873_p4 = pneg %p8872_p11 }
 0x62a   : > { %p8879_p7 = por %p8878_p0, %p8877_p12 }
 0x62c   : > { %p8880_p9 = pnand %p8879_p7, %p8873_p4 }
 0x62e   : > { %8883 = shalt.err (!%p8880_p9)
}
 0x62f   : > { %s8976_s3 = smov 128   ;;  %s8977_s23 = smov 8  }
 0x630   : > { %8039 = dma.vmem_to_hbm [thread:$0]  (%p12066_p8), %s11669_s25, 4096, %s11667_s14, %s5810_s11, %s8976_s3, %s8976_s3, %s8977_s23  }
 0x631 PF: > { %s12067_s22 = sld [smem:[#allocation32_spill]]  ;;  %s12068_s15 = sld [smem:[#allocation39_spill]] }
 0x632   : > { %p12070_p10 = scmp.ge.s32.totalorder %s8950_s20, 2 }
 0x637   : > { %s5838_s17 = sand.u32 1, %s12067_s22   ;;  %p12069_p3 = scmp.ne.s32.totalorder %s12068_s15, 0 }
 0x638   : > { %s5839_s27 = scalar_lea.sflag [#allocation4], %s5838_s17 }
 0x639   : > { %p8064_p1 = pnand %p12070_p10, %p12069_p3 }
 0x63b   : > { %8933 = dma.done.wait (!%p8064_p1), %s5839_s27, 4096  }
 0x63c   : > { %8935 = vsyncadd (!%p8064_p1), %s5839_s27, 4294963200  ;;  %s12071_s20 = sld [smem:[#allocation35_spill]]  ;;  %s12072_s17 = sld [smem:[#allocation33_spill]] }
 0x63d   : > { %s12073_s12 = sld [smem:[#allocation36_spill]]  ;;  %s12074_s18 = smov %s8946_s19 }
 0x642   : > { %p30_p2 = scmp.ge.s32.totalorder %s12071_s20, 4  }
 0x643   : > { %s12075_s19 = smov %s12073_s12 }
 0x644   :  { %32 = sbr.rel (!%p30_p2) target bundleno = 13 (0xd), region = 181 }
 0x64b   :  { %5844 = vsyncpa [#allocation3], 1 }
 0x64c   :  { %5846 = vsyncpa [#allocation3 + $0x1], 1 }
 0x64d   :  { %5847 = vsyncpa [#allocation6], 1 }
 0x64e   :  { %5849 = vsyncpa [#allocation6 + $0x1], 1 }
 0x64f   :  { %5850 = vsyncpa [#allocation9], 1 }
 0x650   :  { %5851 = vsyncpa [#allocation14], 1 }
 0x651   :  { %5852 = vsyncpa [#allocation17], 1 }
 0x652   :  { %5853 = vsyncpa [#allocation4], 1 }
 0x653   :  { %5855 = vsyncpa [#allocation4 + $0x1], 1 }

</bundles_post_ra>
